<compile_context>
chip_gen: v6e
topology: v6e:2x2x1
jax: 0.10.0
libtpu: 0.0.40
codegen_flags: <defaults>
</compile_context>

<pallas_src>
import functools

import jax
import jax.numpy as jnp
from jax import lax
from jax.experimental import pallas as pl
from jax.experimental.pallas import tpu as pltpu

_BN_EPS = 1e-3

# Explicit VMEM budget.  Per-image blocks at real SPPF sizes are a few MiB, so
# 32 MiB fits every generation (v7x: 64 MiB physical / 32 MiB scoped default).
# On v5e/v6e (128 MiB physical) this can be raised if larger feature maps are
# pushed through the kernel.
_VMEM_LIMIT = 32 * 1024 * 1024

# Set to jnp.bfloat16 on v6e/v7x for bandwidth + native MXU rate (accumulation
# stays f32).  f32 here keeps the self-check tight against the f32 reference.
_MATMUL_DTYPE = jnp.float32


# ----------------------------------------------------------------------------
# One-time probe: pltpu.roll shift convention / availability.
# ----------------------------------------------------------------------------
_ROLL_MODE = None  # +1: roll == jnp.roll, -1: reversed sign, 0: use fallback


def _probe_roll_convention():
    """Detect pltpu.roll's shift convention with a tiny kernel (outside jit)."""
    def kern(x_ref, o_ref):
        o_ref[...] = pltpu.roll(x_ref[...], 1, axis=0)

    try:
        x = jnp.broadcast_to(jnp.arange(8, dtype=jnp.float32)[:, None], (8, 128))
        y = pl.pallas_call(
            kern, out_shape=jax.ShapeDtypeStruct((8, 128), jnp.float32))(x)
        y00 = float(jax.device_get(y)[0, 0])
        if y00 == 7.0:      # jnp.roll convention: out[i] = x[(i - s) % n]
            return 1
        if y00 == 1.0:      # reversed convention: out[i] = x[(i + s) % n]
            return -1
        return 0
    except Exception:       # lowering failure / tracing context / non-TPU
        return 0


def _roll_mode():
    global _ROLL_MODE
    if _ROLL_MODE is None:
        _ROLL_MODE = _probe_roll_convention()
    return _ROLL_MODE


def _rotate_down(x, k, roll_mode):
    """Circular shift along axis 0: out[i] = x[(i - k) % M], k static."""
    m = x.shape[0]
    k = k % m
    if k == 0:
        return x
    if roll_mode == 1:
        return pltpu.roll(x, k, axis=0)            # XLU sublane rotation
    if roll_mode == -1:
        return pltpu.roll(x, m - k, axis=0)
    # Fallback: circular shift from two static slices (vreg-granular moves).
    return jnp.concatenate([x[m - k:, :], x[:m - k, :]], axis=0)


# ----------------------------------------------------------------------------
# Fused SPPF kernel: cv1 -> 3 chained 5x5 maxpools -> (virtual concat) cv2
# ----------------------------------------------------------------------------
def _sppf_fused_kernel(x_ref, w1_ref, b1_ref, w2_ref, b2_ref, o_ref,
                       *, H, W, roll_mode, mm_dtype):
    M = H * W
    C_ = w1_ref.shape[-1]
    f32 = jnp.float32
    neg = jnp.finfo(f32).min          # "-inf" pad; the center tap is always valid

    # ------------------ cv1: 1x1 conv (+ folded BN) + SiLU -------------------
    x = x_ref[...]                                              # (M, C1)
    t = jnp.dot(x.astype(mm_dtype), w1_ref[...].astype(mm_dtype),
                preferred_element_type=f32)
    t = t + b1_ref[...]
    t = t * jax.nn.sigmoid(t)                                   # SiLU, (M, C_)

    # -------- boundary masks (built once, shared by all three pools) ---------
    # In the flat (H*W, C) layout a W-shift of +-1/+-2 or an H-shift of
    # +-W/+-2W is a circular sublane rotation; the wrapped / row-crossing
    # entries are exactly the out-of-image taps and get masked to -inf.
    row = lax.broadcasted_iota(jnp.int32, (H, W, C_), 0).reshape(M, C_)
    col = lax.broadcasted_iota(jnp.int32, (H, W, C_), 1).reshape(M, C_)
    w_taps = [(j, (col + j >= 0) & (col + j < W)) for j in (-2, -1, 1, 2)]
    h_taps = [(j * W, (row + j >= 0) & (row + j < H)) for j in (-2, -1, 1, 2)]

    def shifted_max(v, taps):
        out = v                                                 # center tap
        for off, ok in taps:
            r = _rotate_down(v, (-off) % M, roll_mode)          # out[i] = v[i+off]
            out = jnp.maximum(out, jnp.where(ok, r, neg))
        return out

    def pool5(v):                            # 5x5 max pool, stride 1, "same"
        return shifted_max(shifted_max(v, w_taps), h_taps)      # separable

    y1 = pool5(t)
    y2 = pool5(y1)
    y3 = pool5(y2)

    # ------- cv2 over the virtual concat [t, y1, y2, y3] + BN + SiLU ---------
    # Sequential accumulation into one f32 accumulator (MRB-friendly on v7x);
    # the (4*C_, C2) concat is never materialized.
    acc = jnp.dot(t.astype(mm_dtype), w2_ref[0].astype(mm_dtype),
                  preferred_element_type=f32)
    acc += jnp.dot(y1.astype(mm_dtype), w2_ref[1].astype(mm_dtype),
                   preferred_element_type=f32)
    acc += jnp.dot(y2.astype(mm_dtype), w2_ref[2].astype(mm_dtype),
                   preferred_element_type=f32)
    acc += jnp.dot(y3.astype(mm_dtype), w2_ref[3].astype(mm_dtype),
                   preferred_element_type=f32)
    z = acc + b2_ref[...]
    o_ref[...] = z * jax.nn.sigmoid(z)                          # SiLU, (M, C2)


def sppf_fused(x_nhwc, w1, b1, w2, b2, *, mm_dtype=_MATMUL_DTYPE):
    """Fused SPPF: cv1 + 3 chained 5x5 maxpools + concat + cv2 in one kernel.

    x_nhwc: (N, H, W, c1) f32
    w1: (c1, c_), b1: (c_,)        -- cv1 with eval-mode BN folded in
    w2: (4, c_, c2), b2: (c2,)     -- cv2 weight split by concat chunk
    """
    N, H, W, C1 = x_nhwc.shape
    C_ = w1.shape[1]
    C2 = w2.shape[-1]
    M = H * W
    x_flat = x_nhwc.reshape(N, M, C1)        # row-major-compatible, free in XLA

    kernel = functools.partial(
        _sppf_fused_kernel, H=H, W=W, roll_mode=_roll_mode(), mm_dtype=mm_dtype)

    out = pl.pallas_call(
        kernel,
        out_shape=jax.ShapeDtypeStruct((N, M, C2), jnp.float32),
        grid=(N,),
        in_specs=[
            pl.BlockSpec((None, M, C1), lambda n: (n, 0, 0)),
            pl.BlockSpec((C1, C_), lambda n: (0, 0)),
            pl.BlockSpec((1, C_), lambda n: (0, 0)),
            pl.BlockSpec((4, C_, C2), lambda n: (0, 0, 0)),
            pl.BlockSpec((1, C2), lambda n: (0, 0)),
        ],
        # NOTE: C2 < 128 at demo widths => masked partial stores; real SPPF
        # widths (C2 >= 256) make the output lane-dense.
        out_specs=pl.BlockSpec((None, M, C2), lambda n: (n, 0, 0)),
        compiler_params=pltpu.CompilerParams(
            dimension_semantics=("parallel",),     # batch across TCs on v7x
            vmem_limit_bytes=_VMEM_LIMIT),
    )(x_flat, w1, b1.reshape(1, C_), w2, b2.reshape(1, C2))
    return out.reshape(N, H, W, C2)


# ----------------------------------------------------------------------------
# Parameter setup (deterministic; eval-mode BN folded into the convs)
# ----------------------------------------------------------------------------
def _init_conv_bn(key, cin, cout):
    kw, k1, k2, k3, k4 = jax.random.split(key, 5)
    w = 0.1 * jax.random.normal(kw, (cin, cout), jnp.float32)
    gamma = 1.0 + 0.1 * jax.random.normal(k1, (cout,), jnp.float32)
    beta = 0.1 * jax.random.normal(k2, (cout,), jnp.float32)
    mean = 0.1 * jax.random.normal(k3, (cout,), jnp.float32)
    var = 1.0 + 0.1 * jnp.abs(jax.random.normal(k4, (cout,), jnp.float32))
    scale = gamma / jnp.sqrt(var + _BN_EPS)       # running-stats BN, eval mode
    return {"w": w * scale, "b": beta - mean * scale}


def init_sppf(key, c1, c2):
    # Resolve the roll probe OUTSIDE jit so the fused kernel can use XLU rolls.
    _roll_mode()
    c_ = c1 // 2
    k1, k2 = jax.random.split(key)
    cv1 = _init_conv_bn(k1, c1, c_)
    cv2 = _init_conv_bn(k2, 4 * c_, c2)
    # Split cv2's (4*c_, c2) weight into 4 chunks matching the channel order
    # of torch.cat((x, y1, y2, y3), dim=1).
    return {"cv1_w": cv1["w"], "cv1_b": cv1["b"],
            "cv2_w": cv2["w"].reshape(4, c_, c2), "cv2_b": cv2["b"]}


# ----------------------------------------------------------------------------
# Forward pass (NCHW at the boundary to match PyTorch; NHWC/lanes inside)
# ----------------------------------------------------------------------------
@jax.jit
def sppf_forward(x_nchw, params):
    x = jnp.transpose(x_nchw, (0, 2, 3, 1))       # NCHW -> NHWC
    y = sppf_fused(x, params["cv1_w"], params["cv1_b"],
                   params["cv2_w"], params["cv2_b"])
    return jnp.transpose(y, (0, 3, 1, 2))         # NHWC -> NCHW


# ----------------------------------------------------------------------------
# Pure-JAX reference (correctness check only)
# ----------------------------------------------------------------------------
def _maxpool5_ref(x_nhwc):
    return jax.lax.reduce_window(
        x_nhwc, -jnp.inf, jax.lax.max,
        window_dimensions=(1, 5, 5, 1),
        window_strides=(1, 1, 1, 1),
        padding=((0, 0), (2, 2), (2, 2), (0, 0)))


def sppf_forward_ref(x_nchw, params):
    x = jnp.transpose(x_nchw, (0, 2, 3, 1))
    t = x @ params["cv1_w"] + params["cv1_b"]
    t = t * jax.nn.sigmoid(t)
    y1 = _maxpool5_ref(t)
    y2 = _maxpool5_ref(y1)
    y3 = _maxpool5_ref(y2)
    cat = jnp.concatenate([t, y1, y2, y3], axis=-1)
    w2 = params["cv2_w"].reshape(-1, params["cv2_w"].shape[-1])
    z = cat @ w2 + params["cv2_b"]
    z = z * jax.nn.sigmoid(z)
    return jnp.transpose(z, (0, 3, 1, 2))


# ----------------------------------------------------------------------------
if __name__ == "__main__":
    key = jax.random.PRNGKey(0)
    kx, kp = jax.random.split(key)

    # SPPF(c1=4, c2=8, k=5), input NCHW (2, 4, 16, 16)
    c1, c2 = 4, 8
    x = jax.random.normal(kx, (2, c1, 16, 16), jnp.float32)
    params = init_sppf(kp, c1, c2)

    y = sppf_forward(x, params)
    jax.block_until_ready(y)
    assert y.shape == (2, c2, 16, 16), y.shape

    y_ref = sppf_forward_ref(x, params)
    assert jnp.allclose(y, y_ref, rtol=2e-2, atol=2e-2), float(
        jnp.max(jnp.abs(y - y_ref)))

    print("KERNEL_OK")
</pallas_src>

<mosaic_0001>
module attributes {stable_mosaic.version = 11 : i64} {
  func.func @kern(%arg0: memref<8x128xf32, #tpu.memory_space<vmem>>, %arg1: memref<8x128xf32, #tpu.memory_space<vmem>>) attributes {dimension_semantics = [], scalar_prefetch = 0 : i64, scratch_operands = 0 : i64, tpu.core_type = #tpu.core_type<tc>} {
    %c0 = arith.constant 0 : index
    %c0_0 = arith.constant 0 : index
    %0 = vector.load %arg0[%c0, %c0_0] : memref<8x128xf32, #tpu.memory_space<vmem>>, vector<8x128xf32>
    %c1_i32 = arith.constant 1 : i32
    %1 = tpu.dynamic_rotate %0 by %c1_i32 dim 0 : vector<8x128xf32>, i32 -> vector<8x128xf32>
    %c0_1 = arith.constant 0 : index
    %c0_2 = arith.constant 0 : index
    %2 = vector.load %arg1[%c0_1, %c0_2] : memref<8x128xf32, #tpu.memory_space<vmem>>, vector<8x128xf32>
    tpu.vector_store %arg1[%c0_1, %c0_2], %1 {strides = array<i32>} : memref<8x128xf32, #tpu.memory_space<vmem>>, vector<8x128xf32>,
    return
  }
}

module attributes {stable_mosaic.version = 11 : i64} {
  func.func @_sppf_fused_kernel(%arg0: i32, %arg1: memref<1x256x4xf32, #tpu.memory_space<vmem>>, %arg2: memref<4x2xf32, #tpu.memory_space<vmem>>, %arg3: memref<1x2xf32, #tpu.memory_space<vmem>>, %arg4: memref<4x2x8xf32, #tpu.memory_space<vmem>>, %arg5: memref<1x8xf32, #tpu.memory_space<vmem>>, %arg6: memref<1x256x8xf32, #tpu.memory_space<vmem>>) attributes {dimension_semantics = [#tpu.dimension_semantics<parallel>], iteration_bounds = array<i64: 2>, scalar_prefetch = 0 : i64, scratch_operands = 0 : i64, tpu.core_type = #tpu.core_type<tc>, window_params = [{transform_indices = @transform_0, window_bounds = array<i64: 1, 256, 4>}, {pipeline_mode = #tpu.pipeline_mode<synchronous>, transform_indices = @transform_1, window_bounds = array<i64: 4, 2>}, {pipeline_mode = #tpu.pipeline_mode<synchronous>, transform_indices = @transform_2, window_bounds = array<i64: 1, 2>}, {pipeline_mode = #tpu.pipeline_mode<synchronous>, transform_indices = @transform_3, window_bounds = array<i64: 4, 2, 8>}, {pipeline_mode = #tpu.pipeline_mode<synchronous>, transform_indices = @transform_4, window_bounds = array<i64: 1, 8>}, {transform_indices = @transform_5, window_bounds = array<i64: 1, 256, 8>}]} {
    %c0 = arith.constant 0 : index
    %c0_0 = arith.constant 0 : index
    %c0_1 = arith.constant 0 : index
    %0 = vector.load %arg1[%c0, %c0_0, %c0_1] : memref<1x256x4xf32, #tpu.memory_space<vmem>>, vector<1x256x4xf32>
    %1 = vector.shape_cast %0 : vector<1x256x4xf32> to vector<256x4xf32>
    %c0_2 = arith.constant 0 : index
    %c0_3 = arith.constant 0 : index
    %2 = vector.load %arg2[%c0_2, %c0_3] : memref<4x2xf32, #tpu.memory_space<vmem>>, vector<4x2xf32>
    %cst = arith.constant dense<0.000000e+00> : vector<256x2xf32>
    %3 = tpu.matmul %1, %2, %cst {dimension_numbers = #tpu.dot_dimension_numbers<[1], [0], [0], [1], [0, 0, 1, 1], [], []>} : vector<256x4xf32>, vector<4x2xf32>, vector<256x2xf32> -> vector<256x2xf32>
    %c0_4 = arith.constant 0 : index
    %c0_5 = arith.constant 0 : index
    %4 = vector.load %arg3[%c0_4, %c0_5] : memref<1x2xf32, #tpu.memory_space<vmem>>, vector<1x2xf32>
    %5 = vector.broadcast %4 : vector<1x2xf32> to vector<256x2xf32>
    %6 = arith.addf %3, %5 : vector<256x2xf32>
    %7 = arith.negf %6 : vector<256x2xf32>
    %8 = math.exp %7 : vector<256x2xf32>
    %cst_6 = arith.constant 1.000000e+00 : f32
    %9 = vector.broadcast %cst_6 : f32 to vector<256x2xf32>
    %10 = arith.addf %9, %8 : vector<256x2xf32>
    %11 = arith.divf %9, %10 : vector<256x2xf32>
    %12 = arith.mulf %6, %11 : vector<256x2xf32>
    %13 = tpu.iota {dimensions = array<i32: 0>} : vector<16x16x2xi32>
    %14 = vector.shape_cast %13 : vector<16x16x2xi32> to vector<256x2xi32>
    %15 = tpu.iota {dimensions = array<i32: 1>} : vector<16x16x2xi32>
    %16 = vector.shape_cast %15 : vector<16x16x2xi32> to vector<256x2xi32>
    %c-2_i32 = arith.constant -2 : i32
    %17 = vector.broadcast %c-2_i32 : i32 to vector<256x2xi32>
    %18 = arith.addi %16, %17 : vector<256x2xi32>
    %c0_i32 = arith.constant 0 : i32
    %19 = vector.broadcast %c0_i32 : i32 to vector<256x2xi32>
    %20 = arith.cmpi sge, %18, %19 : vector<256x2xi32>
    %c-2_i32_7 = arith.constant -2 : i32
    %21 = vector.broadcast %c-2_i32_7 : i32 to vector<256x2xi32>
    %22 = arith.addi %16, %21 : vector<256x2xi32>
    %c16_i32 = arith.constant 16 : i32
    %23 = vector.broadcast %c16_i32 : i32 to vector<256x2xi32>
    %24 = arith.cmpi slt, %22, %23 : vector<256x2xi32>
    %25 = arith.andi %20, %24 : vector<256x2xi1>
    %c-1_i32 = arith.constant -1 : i32
    %26 = vector.broadcast %c-1_i32 : i32 to vector<256x2xi32>
    %27 = arith.addi %16, %26 : vector<256x2xi32>
    %c0_i32_8 = arith.constant 0 : i32
    %28 = vector.broadcast %c0_i32_8 : i32 to vector<256x2xi32>
    %29 = arith.cmpi sge, %27, %28 : vector<256x2xi32>
    %c-1_i32_9 = arith.constant -1 : i32
    %30 = vector.broadcast %c-1_i32_9 : i32 to vector<256x2xi32>
    %31 = arith.addi %16, %30 : vector<256x2xi32>
    %c16_i32_10 = arith.constant 16 : i32
    %32 = vector.broadcast %c16_i32_10 : i32 to vector<256x2xi32>
    %33 = arith.cmpi slt, %31, %32 : vector<256x2xi32>
    %34 = arith.andi %29, %33 : vector<256x2xi1>
    %c1_i32 = arith.constant 1 : i32
    %35 = vector.broadcast %c1_i32 : i32 to vector<256x2xi32>
    %36 = arith.addi %16, %35 : vector<256x2xi32>
    %c0_i32_11 = arith.constant 0 : i32
    %37 = vector.broadcast %c0_i32_11 : i32 to vector<256x2xi32>
    %38 = arith.cmpi sge, %36, %37 : vector<256x2xi32>
    %c1_i32_12 = arith.constant 1 : i32
    %39 = vector.broadcast %c1_i32_12 : i32 to vector<256x2xi32>
    %40 = arith.addi %16, %39 : vector<256x2xi32>
    %c16_i32_13 = arith.constant 16 : i32
    %41 = vector.broadcast %c16_i32_13 : i32 to vector<256x2xi32>
    %42 = arith.cmpi slt, %40, %41 : vector<256x2xi32>
    %43 = arith.andi %38, %42 : vector<256x2xi1>
    %c2_i32 = arith.constant 2 : i32
    %44 = vector.broadcast %c2_i32 : i32 to vector<256x2xi32>
    %45 = arith.addi %16, %44 : vector<256x2xi32>
    %c0_i32_14 = arith.constant 0 : i32
    %46 = vector.broadcast %c0_i32_14 : i32 to vector<256x2xi32>
    %47 = arith.cmpi sge, %45, %46 : vector<256x2xi32>
    %c2_i32_15 = arith.constant 2 : i32
    %48 = vector.broadcast %c2_i32_15 : i32 to vector<256x2xi32>
    %49 = arith.addi %16, %48 : vector<256x2xi32>
    %c16_i32_16 = arith.constant 16 : i32
    %50 = vector.broadcast %c16_i32_16 : i32 to vector<256x2xi32>
    %51 = arith.cmpi slt, %49, %50 : vector<256x2xi32>
    %52 = arith.andi %47, %51 : vector<256x2xi1>
    %c-2_i32_17 = arith.constant -2 : i32
    %53 = vector.broadcast %c-2_i32_17 : i32 to vector<256x2xi32>
    %54 = arith.addi %14, %53 : vector<256x2xi32>
    %c0_i32_18 = arith.constant 0 : i32
    %55 = vector.broadcast %c0_i32_18 : i32 to vector<256x2xi32>
    %56 = arith.cmpi sge, %54, %55 : vector<256x2xi32>
    %c-2_i32_19 = arith.constant -2 : i32
    %57 = vector.broadcast %c-2_i32_19 : i32 to vector<256x2xi32>
    %58 = arith.addi %14, %57 : vector<256x2xi32>
    %c16_i32_20 = arith.constant 16 : i32
    %59 = vector.broadcast %c16_i32_20 : i32 to vector<256x2xi32>
    %60 = arith.cmpi slt, %58, %59 : vector<256x2xi32>
    %61 = arith.andi %56, %60 : vector<256x2xi1>
    %c-1_i32_21 = arith.constant -1 : i32
    %62 = vector.broadcast %c-1_i32_21 : i32 to vector<256x2xi32>
    %63 = arith.addi %14, %62 : vector<256x2xi32>
    %c0_i32_22 = arith.constant 0 : i32
    %64 = vector.broadcast %c0_i32_22 : i32 to vector<256x2xi32>
    %65 = arith.cmpi sge, %63, %64 : vector<256x2xi32>
    %c-1_i32_23 = arith.constant -1 : i32
    %66 = vector.broadcast %c-1_i32_23 : i32 to vector<256x2xi32>
    %67 = arith.addi %14, %66 : vector<256x2xi32>
    %c16_i32_24 = arith.constant 16 : i32
    %68 = vector.broadcast %c16_i32_24 : i32 to vector<256x2xi32>
    %69 = arith.cmpi slt, %67, %68 : vector<256x2xi32>
    %70 = arith.andi %65, %69 : vector<256x2xi1>
    %c1_i32_25 = arith.constant 1 : i32
    %71 = vector.broadcast %c1_i32_25 : i32 to vector<256x2xi32>
    %72 = arith.addi %14, %71 : vector<256x2xi32>
    %c0_i32_26 = arith.constant 0 : i32
    %73 = vector.broadcast %c0_i32_26 : i32 to vector<256x2xi32>
    %74 = arith.cmpi sge, %72, %73 : vector<256x2xi32>
    %c1_i32_27 = arith.constant 1 : i32
    %75 = vector.broadcast %c1_i32_27 : i32 to vector<256x2xi32>
    %76 = arith.addi %14, %75 : vector<256x2xi32>
    %c16_i32_28 = arith.constant 16 : i32
    %77 = vector.broadcast %c16_i32_28 : i32 to vector<256x2xi32>
    %78 = arith.cmpi slt, %76, %77 : vector<256x2xi32>
    %79 = arith.andi %74, %78 : vector<256x2xi1>
    %c2_i32_29 = arith.constant 2 : i32
    %80 = vector.broadcast %c2_i32_29 : i32 to vector<256x2xi32>
    %81 = arith.addi %14, %80 : vector<256x2xi32>
    %c0_i32_30 = arith.constant 0 : i32
    %82 = vector.broadcast %c0_i32_30 : i32 to vector<256x2xi32>
    %83 = arith.cmpi sge, %81, %82 : vector<256x2xi32>
    %c2_i32_31 = arith.constant 2 : i32
    %84 = vector.broadcast %c2_i32_31 : i32 to vector<256x2xi32>
    %85 = arith.addi %14, %84 : vector<256x2xi32>
    %c16_i32_32 = arith.constant 16 : i32
    %86 = vector.broadcast %c16_i32_32 : i32 to vector<256x2xi32>
    %87 = arith.cmpi slt, %85, %86 : vector<256x2xi32>
    %88 = arith.andi %83, %87 : vector<256x2xi1>
    %89 = vector.extract_strided_slice %12 {offsets = [254, 0], sizes = [2, 2], strides = [1, 1]} : vector<256x2xf32> to vector<2x2xf32>
    %90 = vector.extract_strided_slice %12 {offsets = [0, 0], sizes = [254, 2], strides = [1, 1]} : vector<256x2xf32> to vector<254x2xf32>
    %91 = tpu.concatenate %89, %90 in 0 : vector<2x2xf32>, vector<254x2xf32> -> vector<256x2xf32>
    %cst_33 = arith.constant -3.40282347E+38 : f32
    %92 = vector.broadcast %cst_33 : f32 to vector<256x2xf32>
    %93 = arith.select %25, %91, %92 : vector<256x2xi1>, vector<256x2xf32>
    %94 = arith.maximumf %12, %93 : vector<256x2xf32>
    %95 = vector.extract_strided_slice %12 {offsets = [255, 0], sizes = [1, 2], strides = [1, 1]} : vector<256x2xf32> to vector<1x2xf32>
    %96 = vector.extract_strided_slice %12 {offsets = [0, 0], sizes = [255, 2], strides = [1, 1]} : vector<256x2xf32> to vector<255x2xf32>
    %97 = tpu.concatenate %95, %96 in 0 : vector<1x2xf32>, vector<255x2xf32> -> vector<256x2xf32>
    %cst_34 = arith.constant -3.40282347E+38 : f32
    %98 = vector.broadcast %cst_34 : f32 to vector<256x2xf32>
    %99 = arith.select %34, %97, %98 : vector<256x2xi1>, vector<256x2xf32>
    %100 = arith.maximumf %94, %99 : vector<256x2xf32>
    %101 = vector.extract_strided_slice %12 {offsets = [1, 0], sizes = [255, 2], strides = [1, 1]} : vector<256x2xf32> to vector<255x2xf32>
    %102 = vector.extract_strided_slice %12 {offsets = [0, 0], sizes = [1, 2], strides = [1, 1]} : vector<256x2xf32> to vector<1x2xf32>
    %103 = tpu.concatenate %101, %102 in 0 : vector<255x2xf32>, vector<1x2xf32> -> vector<256x2xf32>
    %cst_35 = arith.constant -3.40282347E+38 : f32
    %104 = vector.broadcast %cst_35 : f32 to vector<256x2xf32>
    %105 = arith.select %43, %103, %104 : vector<256x2xi1>, vector<256x2xf32>
    %106 = arith.maximumf %100, %105 : vector<256x2xf32>
    %107 = vector.extract_strided_slice %12 {offsets = [2, 0], sizes = [254, 2], strides = [1, 1]} : vector<256x2xf32> to vector<254x2xf32>
    %108 = vector.extract_strided_slice %12 {offsets = [0, 0], sizes = [2, 2], strides = [1, 1]} : vector<256x2xf32> to vector<2x2xf32>
    %109 = tpu.concatenate %107, %108 in 0 : vector<254x2xf32>, vector<2x2xf32> -> vector<256x2xf32>
    %cst_36 = arith.constant -3.40282347E+38 : f32
    %110 = vector.broadcast %cst_36 : f32 to vector<256x2xf32>
    %111 = arith.select %52, %109, %110 : vector<256x2xi1>, vector<256x2xf32>
    %112 = arith.maximumf %106, %111 : vector<256x2xf32>
    %113 = vector.extract_strided_slice %112 {offsets = [224, 0], sizes = [32, 2], strides = [1, 1]} : vector<256x2xf32> to vector<32x2xf32>
    %114 = vector.extract_strided_slice %112 {offsets = [0, 0], sizes = [224, 2], strides = [1, 1]} : vector<256x2xf32> to vector<224x2xf32>
    %115 = tpu.concatenate %113, %114 in 0 : vector<32x2xf32>, vector<224x2xf32> -> vector<256x2xf32>
    %cst_37 = arith.constant -3.40282347E+38 : f32
    %116 = vector.broadcast %cst_37 : f32 to vector<256x2xf32>
    %117 = arith.select %61, %115, %116 : vector<256x2xi1>, vector<256x2xf32>
    %118 = arith.maximumf %112, %117 : vector<256x2xf32>
    %119 = vector.extract_strided_slice %112 {offsets = [240, 0], sizes = [16, 2], strides = [1, 1]} : vector<256x2xf32> to vector<16x2xf32>
    %120 = vector.extract_strided_slice %112 {offsets = [0, 0], sizes = [240, 2], strides = [1, 1]} : vector<256x2xf32> to vector<240x2xf32>
    %121 = tpu.concatenate %119, %120 in 0 : vector<16x2xf32>, vector<240x2xf32> -> vector<256x2xf32>
    %cst_38 = arith.constant -3.40282347E+38 : f32
    %122 = vector.broadcast %cst_38 : f32 to vector<256x2xf32>
    %123 = arith.select %70, %121, %122 : vector<256x2xi1>, vector<256x2xf32>
    %124 = arith.maximumf %118, %123 : vector<256x2xf32>
    %125 = vector.extract_strided_slice %112 {offsets = [16, 0], sizes = [240, 2], strides = [1, 1]} : vector<256x2xf32> to vector<240x2xf32>
    %126 = vector.extract_strided_slice %112 {offsets = [0, 0], sizes = [16, 2], strides = [1, 1]} : vector<256x2xf32> to vector<16x2xf32>
    %127 = tpu.concatenate %125, %126 in 0 : vector<240x2xf32>, vector<16x2xf32> -> vector<256x2xf32>
    %cst_39 = arith.constant -3.40282347E+38 : f32
    %128 = vector.broadcast %cst_39 : f32 to vector<256x2xf32>
    %129 = arith.select %79, %127, %128 : vector<256x2xi1>, vector<256x2xf32>
    %130 = arith.maximumf %124, %129 : vector<256x2xf32>
    %131 = vector.extract_strided_slice %112 {offsets = [32, 0], sizes = [224, 2], strides = [1, 1]} : vector<256x2xf32> to vector<224x2xf32>
    %132 = vector.extract_strided_slice %112 {offsets = [0, 0], sizes = [32, 2], strides = [1, 1]} : vector<256x2xf32> to vector<32x2xf32>
    %133 = tpu.concatenate %131, %132 in 0 : vector<224x2xf32>, vector<32x2xf32> -> vector<256x2xf32>
    %cst_40 = arith.constant -3.40282347E+38 : f32
    %134 = vector.broadcast %cst_40 : f32 to vector<256x2xf32>
    %135 = arith.select %88, %133, %134 : vector<256x2xi1>, vector<256x2xf32>
    %136 = arith.maximumf %130, %135 : vector<256x2xf32>
    %137 = vector.extract_strided_slice %136 {offsets = [254, 0], sizes = [2, 2], strides = [1, 1]} : vector<256x2xf32> to vector<2x2xf32>
    %138 = vector.extract_strided_slice %136 {offsets = [0, 0], sizes = [254, 2], strides = [1, 1]} : vector<256x2xf32> to vector<254x2xf32>
    %139 = tpu.concatenate %137, %138 in 0 : vector<2x2xf32>, vector<254x2xf32> -> vector<256x2xf32>
    %cst_41 = arith.constant -3.40282347E+38 : f32
    %140 = vector.broadcast %cst_41 : f32 to vector<256x2xf32>
    %141 = arith.select %25, %139, %140 : vector<256x2xi1>, vector<256x2xf32>
    %142 = arith.maximumf %136, %141 : vector<256x2xf32>
    %143 = vector.extract_strided_slice %136 {offsets = [255, 0], sizes = [1, 2], strides = [1, 1]} : vector<256x2xf32> to vector<1x2xf32>
    %144 = vector.extract_strided_slice %136 {offsets = [0, 0], sizes = [255, 2], strides = [1, 1]} : vector<256x2xf32> to vector<255x2xf32>
    %145 = tpu.concatenate %143, %144 in 0 : vector<1x2xf32>, vector<255x2xf32> -> vector<256x2xf32>
    %cst_42 = arith.constant -3.40282347E+38 : f32
    %146 = vector.broadcast %cst_42 : f32 to vector<256x2xf32>
    %147 = arith.select %34, %145, %146 : vector<256x2xi1>, vector<256x2xf32>
    %148 = arith.maximumf %142, %147 : vector<256x2xf32>
    %149 = vector.extract_strided_slice %136 {offsets = [1, 0], sizes = [255, 2], strides = [1, 1]} : vector<256x2xf32> to vector<255x2xf32>
    %150 = vector.extract_strided_slice %136 {offsets = [0, 0], sizes = [1, 2], strides = [1, 1]} : vector<256x2xf32> to vector<1x2xf32>
    %151 = tpu.concatenate %149, %150 in 0 : vector<255x2xf32>, vector<1x2xf32> -> vector<256x2xf32>
    %cst_43 = arith.constant -3.40282347E+38 : f32
    %152 = vector.broadcast %cst_43 : f32 to vector<256x2xf32>
    %153 = arith.select %43, %151, %152 : vector<256x2xi1>, vector<256x2xf32>
    %154 = arith.maximumf %148, %153 : vector<256x2xf32>
    %155 = vector.extract_strided_slice %136 {offsets = [2, 0], sizes = [254, 2], strides = [1, 1]} : vector<256x2xf32> to vector<254x2xf32>
    %156 = vector.extract_strided_slice %136 {offsets = [0, 0], sizes = [2, 2], strides = [1, 1]} : vector<256x2xf32> to vector<2x2xf32>
    %157 = tpu.concatenate %155, %156 in 0 : vector<254x2xf32>, vector<2x2xf32> -> vector<256x2xf32>
    %cst_44 = arith.constant -3.40282347E+38 : f32
    %158 = vector.broadcast %cst_44 : f32 to vector<256x2xf32>
    %159 = arith.select %52, %157, %158 : vector<256x2xi1>, vector<256x2xf32>
    %160 = arith.maximumf %154, %159 : vector<256x2xf32>
    %161 = vector.extract_strided_slice %160 {offsets = [224, 0], sizes = [32, 2], strides = [1, 1]} : vector<256x2xf32> to vector<32x2xf32>
    %162 = vector.extract_strided_slice %160 {offsets = [0, 0], sizes = [224, 2], strides = [1, 1]} : vector<256x2xf32> to vector<224x2xf32>
    %163 = tpu.concatenate %161, %162 in 0 : vector<32x2xf32>, vector<224x2xf32> -> vector<256x2xf32>
    %cst_45 = arith.constant -3.40282347E+38 : f32
    %164 = vector.broadcast %cst_45 : f32 to vector<256x2xf32>
    %165 = arith.select %61, %163, %164 : vector<256x2xi1>, vector<256x2xf32>
    %166 = arith.maximumf %160, %165 : vector<256x2xf32>
    %167 = vector.extract_strided_slice %160 {offsets = [240, 0], sizes = [16, 2], strides = [1, 1]} : vector<256x2xf32> to vector<16x2xf32>
    %168 = vector.extract_strided_slice %160 {offsets = [0, 0], sizes = [240, 2], strides = [1, 1]} : vector<256x2xf32> to vector<240x2xf32>
    %169 = tpu.concatenate %167, %168 in 0 : vector<16x2xf32>, vector<240x2xf32> -> vector<256x2xf32>
    %cst_46 = arith.constant -3.40282347E+38 : f32
    %170 = vector.broadcast %cst_46 : f32 to vector<256x2xf32>
    %171 = arith.select %70, %169, %170 : vector<256x2xi1>, vector<256x2xf32>
    %172 = arith.maximumf %166, %171 : vector<256x2xf32>
    %173 = vector.extract_strided_slice %160 {offsets = [16, 0], sizes = [240, 2], strides = [1, 1]} : vector<256x2xf32> to vector<240x2xf32>
    %174 = vector.extract_strided_slice %160 {offsets = [0, 0], sizes = [16, 2], strides = [1, 1]} : vector<256x2xf32> to vector<16x2xf32>
    %175 = tpu.concatenate %173, %174 in 0 : vector<240x2xf32>, vector<16x2xf32> -> vector<256x2xf32>
    %cst_47 = arith.constant -3.40282347E+38 : f32
    %176 = vector.broadcast %cst_47 : f32 to vector<256x2xf32>
    %177 = arith.select %79, %175, %176 : vector<256x2xi1>, vector<256x2xf32>
    %178 = arith.maximumf %172, %177 : vector<256x2xf32>
    %179 = vector.extract_strided_slice %160 {offsets = [32, 0], sizes = [224, 2], strides = [1, 1]} : vector<256x2xf32> to vector<224x2xf32>
    %180 = vector.extract_strided_slice %160 {offsets = [0, 0], sizes = [32, 2], strides = [1, 1]} : vector<256x2xf32> to vector<32x2xf32>
    %181 = tpu.concatenate %179, %180 in 0 : vector<224x2xf32>, vector<32x2xf32> -> vector<256x2xf32>
    %cst_48 = arith.constant -3.40282347E+38 : f32
    %182 = vector.broadcast %cst_48 : f32 to vector<256x2xf32>
    %183 = arith.select %88, %181, %182 : vector<256x2xi1>, vector<256x2xf32>
    %184 = arith.maximumf %178, %183 : vector<256x2xf32>
    %185 = vector.extract_strided_slice %184 {offsets = [254, 0], sizes = [2, 2], strides = [1, 1]} : vector<256x2xf32> to vector<2x2xf32>
    %186 = vector.extract_strided_slice %184 {offsets = [0, 0], sizes = [254, 2], strides = [1, 1]} : vector<256x2xf32> to vector<254x2xf32>
    %187 = tpu.concatenate %185, %186 in 0 : vector<2x2xf32>, vector<254x2xf32> -> vector<256x2xf32>
    %cst_49 = arith.constant -3.40282347E+38 : f32
    %188 = vector.broadcast %cst_49 : f32 to vector<256x2xf32>
    %189 = arith.select %25, %187, %188 : vector<256x2xi1>, vector<256x2xf32>
    %190 = arith.maximumf %184, %189 : vector<256x2xf32>
    %191 = vector.extract_strided_slice %184 {offsets = [255, 0], sizes = [1, 2], strides = [1, 1]} : vector<256x2xf32> to vector<1x2xf32>
    %192 = vector.extract_strided_slice %184 {offsets = [0, 0], sizes = [255, 2], strides = [1, 1]} : vector<256x2xf32> to vector<255x2xf32>
    %193 = tpu.concatenate %191, %192 in 0 : vector<1x2xf32>, vector<255x2xf32> -> vector<256x2xf32>
    %cst_50 = arith.constant -3.40282347E+38 : f32
    %194 = vector.broadcast %cst_50 : f32 to vector<256x2xf32>
    %195 = arith.select %34, %193, %194 : vector<256x2xi1>, vector<256x2xf32>
    %196 = arith.maximumf %190, %195 : vector<256x2xf32>
    %197 = vector.extract_strided_slice %184 {offsets = [1, 0], sizes = [255, 2], strides = [1, 1]} : vector<256x2xf32> to vector<255x2xf32>
    %198 = vector.extract_strided_slice %184 {offsets = [0, 0], sizes = [1, 2], strides = [1, 1]} : vector<256x2xf32> to vector<1x2xf32>
    %199 = tpu.concatenate %197, %198 in 0 : vector<255x2xf32>, vector<1x2xf32> -> vector<256x2xf32>
    %cst_51 = arith.constant -3.40282347E+38 : f32
    %200 = vector.broadcast %cst_51 : f32 to vector<256x2xf32>
    %201 = arith.select %43, %199, %200 : vector<256x2xi1>, vector<256x2xf32>
    %202 = arith.maximumf %196, %201 : vector<256x2xf32>
    %203 = vector.extract_strided_slice %184 {offsets = [2, 0], sizes = [254, 2], strides = [1, 1]} : vector<256x2xf32> to vector<254x2xf32>
    %204 = vector.extract_strided_slice %184 {offsets = [0, 0], sizes = [2, 2], strides = [1, 1]} : vector<256x2xf32> to vector<2x2xf32>
    %205 = tpu.concatenate %203, %204 in 0 : vector<254x2xf32>, vector<2x2xf32> -> vector<256x2xf32>
    %cst_52 = arith.constant -3.40282347E+38 : f32
    %206 = vector.broadcast %cst_52 : f32 to vector<256x2xf32>
    %207 = arith.select %52, %205, %206 : vector<256x2xi1>, vector<256x2xf32>
    %208 = arith.maximumf %202, %207 : vector<256x2xf32>
    %209 = vector.extract_strided_slice %208 {offsets = [224, 0], sizes = [32, 2], strides = [1, 1]} : vector<256x2xf32> to vector<32x2xf32>
    %210 = vector.extract_strided_slice %208 {offsets = [0, 0], sizes = [224, 2], strides = [1, 1]} : vector<256x2xf32> to vector<224x2xf32>
    %211 = tpu.concatenate %209, %210 in 0 : vector<32x2xf32>, vector<224x2xf32> -> vector<256x2xf32>
    %cst_53 = arith.constant -3.40282347E+38 : f32
    %212 = vector.broadcast %cst_53 : f32 to vector<256x2xf32>
    %213 = arith.select %61, %211, %212 : vector<256x2xi1>, vector<256x2xf32>
    %214 = arith.maximumf %208, %213 : vector<256x2xf32>
    %215 = vector.extract_strided_slice %208 {offsets = [240, 0], sizes = [16, 2], strides = [1, 1]} : vector<256x2xf32> to vector<16x2xf32>
    %216 = vector.extract_strided_slice %208 {offsets = [0, 0], sizes = [240, 2], strides = [1, 1]} : vector<256x2xf32> to vector<240x2xf32>
    %217 = tpu.concatenate %215, %216 in 0 : vector<16x2xf32>, vector<240x2xf32> -> vector<256x2xf32>
    %cst_54 = arith.constant -3.40282347E+38 : f32
    %218 = vector.broadcast %cst_54 : f32 to vector<256x2xf32>
    %219 = arith.select %70, %217, %218 : vector<256x2xi1>, vector<256x2xf32>
    %220 = arith.maximumf %214, %219 : vector<256x2xf32>
    %221 = vector.extract_strided_slice %208 {offsets = [16, 0], sizes = [240, 2], strides = [1, 1]} : vector<256x2xf32> to vector<240x2xf32>
    %222 = vector.extract_strided_slice %208 {offsets = [0, 0], sizes = [16, 2], strides = [1, 1]} : vector<256x2xf32> to vector<16x2xf32>
    %223 = tpu.concatenate %221, %222 in 0 : vector<240x2xf32>, vector<16x2xf32> -> vector<256x2xf32>
    %cst_55 = arith.constant -3.40282347E+38 : f32
    %224 = vector.broadcast %cst_55 : f32 to vector<256x2xf32>
    %225 = arith.select %79, %223, %224 : vector<256x2xi1>, vector<256x2xf32>
    %226 = arith.maximumf %220, %225 : vector<256x2xf32>
    %227 = vector.extract_strided_slice %208 {offsets = [32, 0], sizes = [224, 2], strides = [1, 1]} : vector<256x2xf32> to vector<224x2xf32>
    %228 = vector.extract_strided_slice %208 {offsets = [0, 0], sizes = [32, 2], strides = [1, 1]} : vector<256x2xf32> to vector<32x2xf32>
    %229 = tpu.concatenate %227, %228 in 0 : vector<224x2xf32>, vector<32x2xf32> -> vector<256x2xf32>
    %cst_56 = arith.constant -3.40282347E+38 : f32
    %230 = vector.broadcast %cst_56 : f32 to vector<256x2xf32>
    %231 = arith.select %88, %229, %230 : vector<256x2xi1>, vector<256x2xf32>
    %232 = arith.maximumf %226, %231 : vector<256x2xf32>
    %c0_57 = arith.constant 0 : index
    %c0_58 = arith.constant 0 : index
    %c0_59 = arith.constant 0 : index
    %233 = vector.load %arg4[%c0_57, %c0_58, %c0_59] : memref<4x2x8xf32, #tpu.memory_space<vmem>>, vector<1x2x8xf32>
    %234 = vector.shape_cast %233 : vector<1x2x8xf32> to vector<2x8xf32>
    %cst_60 = arith.constant dense<0.000000e+00> : vector<256x8xf32>
    %235 = tpu.matmul %12, %234, %cst_60 {dimension_numbers = #tpu.dot_dimension_numbers<[1], [0], [0], [1], [0, 0, 1, 1], [], []>} : vector<256x2xf32>, vector<2x8xf32>, vector<256x8xf32> -> vector<256x8xf32>
    %c1 = arith.constant 1 : index
    %c0_61 = arith.constant 0 : index
    %c0_62 = arith.constant 0 : index
    %236 = vector.load %arg4[%c1, %c0_61, %c0_62] : memref<4x2x8xf32, #tpu.memory_space<vmem>>, vector<1x2x8xf32>
    %237 = vector.shape_cast %236 : vector<1x2x8xf32> to vector<2x8xf32>
    %cst_63 = arith.constant dense<0.000000e+00> : vector<256x8xf32>
    %238 = tpu.matmul %136, %237, %cst_63 {dimension_numbers = #tpu.dot_dimension_numbers<[1], [0], [0], [1], [0, 0, 1, 1], [], []>} : vector<256x2xf32>, vector<2x8xf32>, vector<256x8xf32> -> vector<256x8xf32>
    %239 = arith.addf %235, %238 : vector<256x8xf32>
    %c2 = arith.constant 2 : index
    %c0_64 = arith.constant 0 : index
    %c0_65 = arith.constant 0 : index
    %240 = vector.load %arg4[%c2, %c0_64, %c0_65] : memref<4x2x8xf32, #tpu.memory_space<vmem>>, vector<1x2x8xf32>
    %241 = vector.shape_cast %240 : vector<1x2x8xf32> to vector<2x8xf32>
    %cst_66 = arith.constant dense<0.000000e+00> : vector<256x8xf32>
    %242 = tpu.matmul %184, %241, %cst_66 {dimension_numbers = #tpu.dot_dimension_numbers<[1], [0], [0], [1], [0, 0, 1, 1], [], []>} : vector<256x2xf32>, vector<2x8xf32>, vector<256x8xf32> -> vector<256x8xf32>
    %243 = arith.addf %239, %242 : vector<256x8xf32>
    %c3 = arith.constant 3 : index
    %c0_67 = arith.constant 0 : index
    %c0_68 = arith.constant 0 : index
    %244 = vector.load %arg4[%c3, %c0_67, %c0_68] : memref<4x2x8xf32, #tpu.memory_space<vmem>>, vector<1x2x8xf32>
    %245 = vector.shape_cast %244 : vector<1x2x8xf32> to vector<2x8xf32>
    %cst_69 = arith.constant dense<0.000000e+00> : vector<256x8xf32>
    %246 = tpu.matmul %232, %245, %cst_69 {dimension_numbers = #tpu.dot_dimension_numbers<[1], [0], [0], [1], [0, 0, 1, 1], [], []>} : vector<256x2xf32>, vector<2x8xf32>, vector<256x8xf32> -> vector<256x8xf32>
    %247 = arith.addf %243, %246 : vector<256x8xf32>
    %c0_70 = arith.constant 0 : index
    %c0_71 = arith.constant 0 : index
    %248 = vector.load %arg5[%c0_70, %c0_71] : memref<1x8xf32, #tpu.memory_space<vmem>>, vector<1x8xf32>
    %249 = vector.broadcast %248 : vector<1x8xf32> to vector<256x8xf32>
    %250 = arith.addf %247, %249 : vector<256x8xf32>
    %251 = arith.negf %250 : vector<256x8xf32>
    %252 = math.exp %251 : vector<256x8xf32>
    %cst_72 = arith.constant 1.000000e+00 : f32
    %253 = vector.broadcast %cst_72 : f32 to vector<256x8xf32>
    %254 = arith.addf %253, %252 : vector<256x8xf32>
    %255 = arith.divf %253, %254 : vector<256x8xf32>
    %256 = arith.mulf %250, %255 : vector<256x8xf32>
    %c0_73 = arith.constant 0 : index
    %c0_74 = arith.constant 0 : index
    %c0_75 = arith.constant 0 : index
    %257 = vector.load %arg6[%c0_73, %c0_74, %c0_75] : memref<1x256x8xf32, #tpu.memory_space<vmem>>, vector<1x256x8xf32>
    %258 = vector.shape_cast %257 : vector<1x256x8xf32> to vector<256x8xf32>
    %259 = vector.shape_cast %256 : vector<256x8xf32> to vector<1x256x8xf32>
    tpu.vector_store %arg6[%c0_73, %c0_74, %c0_75], %259 {strides = array<i32>} : memref<1x256x8xf32, #tpu.memory_space<vmem>>, vector<1x256x8xf32>,
    return
  }
  func.func @transform_0(%arg0: i32) -> (i32, i32, i32) {
    %c0_i32 = arith.constant 0 : i32
    %c0_i32_0 = arith.constant 0 : i32
    %c0_i32_1 = arith.constant 0 : i32
    return %arg0, %c0_i32, %c0_i32_0 : i32, i32, i32
  }
  func.func @transform_1(%arg0: i32) -> (i32, i32) {
    %c0_i32 = arith.constant 0 : i32
    %c0_i32_0 = arith.constant 0 : i32
    %c0_i32_1 = arith.constant 0 : i32
    return %c0_i32, %c0_i32_0 : i32, i32
  }
  func.func @transform_2(%arg0: i32) -> (i32, i32) {
    %c0_i32 = arith.constant 0 : i32
    %c0_i32_0 = arith.constant 0 : i32
    %c0_i32_1 = arith.constant 0 : i32
    return %c0_i32, %c0_i32_0 : i32, i32
  }
  func.func @transform_3(%arg0: i32) -> (i32, i32, i32) {
    %c0_i32 = arith.constant 0 : i32
    %c0_i32_0 = arith.constant 0 : i32
    %c0_i32_1 = arith.constant 0 : i32
    %c0_i32_2 = arith.constant 0 : i32
    return %c0_i32, %c0_i32_0, %c0_i32_1 : i32, i32, i32
  }
  func.func @transform_4(%arg0: i32) -> (i32, i32) {
    %c0_i32 = arith.constant 0 : i32
    %c0_i32_0 = arith.constant 0 : i32
    %c0_i32_1 = arith.constant 0 : i32
    return %c0_i32, %c0_i32_0 : i32, i32
  }
  func.func @transform_5(%arg0: i32) -> (i32, i32, i32) {
    %c0_i32 = arith.constant 0 : i32
    %c0_i32_0 = arith.constant 0 : i32
    %c0_i32_1 = arith.constant 0 : i32
    return %arg0, %c0_i32, %c0_i32_0 : i32, i32, i32
  }
}

</mosaic_0001>

<bundles_post_ra>
// kernel: tpu_custom_call.1
= control target key start
LH: loop header
LB: loop body
LE: loop exit
PB: predicated region body
PF: predicated region fallthrough
CT: control target
= control target key end

     0   :  { %6 = vsyncpa [#allocation3], 0  ;;  %s103_s0 = inlined_call_operand.hbm [shape: f32[8,128], index: 0, kind: input, shape index: {}]   ;;  %s104_s1 = inlined_call_operand.hbm [shape: f32[8,128], index: 1, kind: output, shape index: {}]  }
   0x1   :  { %7 = vsyncpa [#allocation4], 0  ;;  %s85_s6 = smov [#allocation2]  }
   0x2   :  { %s14_s7 = sshll.u32 %s85_s6, 4  ;;  %s15_s7 = int_to_ptr.vmem [resolvable:$true] %s14_s7 }
   0x3   :  { %s49_s8 = scalar_lea.vmem %s15_s7, 128  ;;  %p54_p1 = scmp.lt.s32.totalorder %s15_s7, %s15_s7 }
   0x4   :  { %p50_p0 = scmp.ne.s32.totalorder %s15_s7, %s49_s8  ;;  %p55_p2 = scmp.lt.s32.totalorder %s49_s8, %s49_s8 }
   0x6   :  { %p56_p3 = por %p55_p2, %p54_p1 }
   0x8   :  { %p57_p4 = pnand %p56_p3, %p50_p0 }
   0xa   :  { %60 = shalt.err (!%p57_p4)
}
   0xb   :  { %17 = dma.hbm_to_vmem [thread:$0]  %s103_s0, 128, %s15_s7, [#allocation3]  }
   0xc   :  { %81 = dma.done.wait [#allocation3], 128  }
   0xd   :  { %82 = vsyncadd [#allocation3], 4294967168  ;;  %s86_s11 = smov [#allocation5]   ;;  %v21_v0 = vld [vmem:[#allocation2] sm:$0xff] }
   0xe   :  { %s30_s12 = sshll.u32 %s86_s11, 4  ;;  %v22_v1 = vrot.slane %v21_v0, 7  ;;  %s31_s12 = int_to_ptr.vmem [resolvable:$true] %s30_s12 }
   0xf   :  { %s61_s13 = scalar_lea.vmem %s31_s12, 128  ;;  %p66_p6 = scmp.lt.s32.totalorder %s31_s12, %s31_s12 }
  0x10   :  { %23 = vst [vmem:[#allocation5] sm:$0xff] %v22_v1  ;;  %p62_p5 = scmp.ne.s32.totalorder %s31_s12, %s61_s13  ;;  %p67_p7 = scmp.lt.s32.totalorder %s61_s13, %s61_s13 }
  0x12   :  { %p68_p8 = por %p67_p7, %p66_p6 }
  0x14   :  { %p69_p9 = pnand %p68_p8, %p62_p5 }
  0x16   :  { %72 = shalt.err (!%p69_p9)
}
  0x17   :  { %33 = dma.vmem_to_hbm [thread:$0]  %s31_s12, 128, %s104_s1, [#allocation4]  }
  0x18   :  { %83 = dma.done.wait [#allocation4], 128  }
  0x19   :  { %84 = vsyncadd [#allocation4], 4294967168 }
  0x1a   :  { %37 = vsyncpa [#allocation3], 1 }
  0x1b   :  { %38 = vsyncpa [#allocation4], 1 }

// kernel: sppf_forward.1
= control target key start
LH: loop header
LB: loop body
LE: loop exit
PB: predicated region body
PF: predicated region fallthrough
CT: control target
= control target key end

     0   :  { %s5856_s18 = smov 0   ;;  %s9316_s0 = inlined_call_operand.vmem [shape: f32[2,256,4], index: 0, kind: input, shape index: {}]   ;;  %s9317_s1 = inlined_call_operand.vmem [shape: f32[4,2], index: 1, kind: input, shape index: {}]   ;;  %s9318_s2 = inlined_call_operand.vmem [shape: f32[1,2], index: 2, kind: input, shape index: {}]   ;;  %s9319_s3 = inlined_call_operand.vmem [shape: f32[4,2,8], index: 3, kind: input, shape index: {}]   ;;  %s9320_s4 = inlined_call_operand.vmem [shape: f32[1,8], index: 4, kind: input, shape index: {}]   ;;  %s9321_s5 = inlined_call_operand.vmem [shape: f32[2,256,8], index: 5, kind: output, shape index: {}]  }
   0x1 LB: > { %s4889_s19 = sadd.s32 4294967295, %s5824_s18   ;;  %p4893_p0 = scmp.ge.s32.totalorder %s5824_s18, 1  ;;  %s5824_s18 = sphi %s5856_s18, %s15_s18  }
   0x2   : > { %p187_p1 = scmp.lt.s32.totalorder %s5824_s18, 3 }
   0x4   : > { %p188_p2 = pnand %p4893_p0, %p187_p1 }
   0x6   : > { %191 = sbr.rel (%p188_p2) target bundleno = 987 (0x3db), region = 40 }
   0xb   : > { %v257_v0 = vld [vmem:[%s9317_s1] sm:$0xf]  ;;  %vm362_vm0 = vcmask 1043456   ;;  %p215_p3 = scmp.lt.s32.totalorder %s4889_s19, 1  ;;  %vm265_vm1 = vcmask 31744   ;;  %vm884_vm2 = vcmask 1041408  }
   0xc   : > { %5301 = vmatprep.subr.msk.mxu0 %vm362_vm0, %v257_v0  ;;  %5551 = vmatprep.subr.msk.mxu1 %vm362_vm0, %v257_v0  ;;  %v5944_v33 = vld [vmem:[%s9318_s2] ss:$0 sm:$0xff]  ;;  %vm1046_vm3 = vcmask 1040384   ;;  %vm3269_vm4 = vcmask 15360   ;;  %vm1206_vm7 = vcmask 1046528   ;;  %vm1368_vm9 = vcmask 1045504  }
   0xd   : > { %5302 = vmatpush3.msk.msra.mxu0 %vm362_vm0, %v257_v0  ;;  %5552 = vmatpush3.msk.msra.mxu1 %vm362_vm0, %v257_v0  ;;  %s9738_s19 = smov (!%p215_p3, %s4889_s19), 1  ;;  %vm4801_vm11 = vcmask 64512  }
   0xe   : > { %s5134_s22 = sshll.u32 %s9738_s19, 8 }
   0xf   : > { %s5875_s25 = scalar_lea.vmem %s9316_s0, %s5134_s22  ;;  %s9100_s17 = scalar_lea.vmem %s9321_s5, %s5134_s22 }
  0x10   : > { %v225_v1 = vld [vmem:[%s5875_s25] sm:$0xff]  ;;  %v226_v3 = vld [vmem:[%s5875_s25 + $0x8] sm:$0xff]  ;;  %v227_v5 = vld [vmem:[%s5875_s25 + $0x10] sm:$0xff] }
  0x11   : > { %v241_v2 = vld [vmem:[%s5875_s25 + $0x80] sm:$0xff]  ;;  %5303 = vmatprep.mubr.msk.f32.mxu0 %vm265_vm1, %v225_v1  ;;  %v242_v4 = vld [vmem:[%s5875_s25 + $0x88] sm:$0xff]  ;;  %v243_v6 = vld [vmem:[%s5875_s25 + $0x90] sm:$0xff] }
  0x12   : > { %5327 = vmatprep.mubr.msk.f32.mxu1 %vm265_vm1, %v241_v2  ;;  %5304 = vmatmul.mubr.msk.f32.vlgmr.msra.gmra.mxu0 %vm265_vm1, %v226_v3  ;;  %v228_v7 = vld [vmem:[%s5875_s25 + $0x18] sm:$0xff]  ;;  %v229_v9 = vld [vmem:[%s5875_s25 + $0x20] sm:$0xff]  ;;  %v230_v11 = vld [vmem:[%s5875_s25 + $0x28] sm:$0xff] }
  0x13   : > { %5328 = vmatmul.mubr.msk.f32.vlgmr.msra.gmra.mxu1 %vm265_vm1, %v242_v4  ;;  %5306 = vmatprep.mubr.msk.f32.mxu0 %vm265_vm1, %v227_v5  ;;  %v244_v8 = vld [vmem:[%s5875_s25 + $0x98] sm:$0xff]  ;;  %v245_v10 = vld [vmem:[%s5875_s25 + $0xa0] sm:$0xff]  ;;  %v246_v12 = vld [vmem:[%s5875_s25 + $0xa8] sm:$0xff] }
  0x14   : > { %5330 = vmatprep.mubr.msk.f32.mxu1 %vm265_vm1, %v243_v6  ;;  %v231_v13 = vld [vmem:[%s5875_s25 + $0x30] sm:$0xff]  ;;  %v232_v15 = vld [vmem:[%s5875_s25 + $0x38] sm:$0xff]  ;;  %v233_v17 = vld [vmem:[%s5875_s25 + $0x40] sm:$0xff] }
  0x15   : > { %v247_v14 = vld [vmem:[%s5875_s25 + $0xb0] sm:$0xff]  ;;  %v248_v16 = vld [vmem:[%s5875_s25 + $0xb8] sm:$0xff]  ;;  %v249_v18 = vld [vmem:[%s5875_s25 + $0xc0] sm:$0xff] }
  0x16   : > { %5307 = vmatmul.mubr.msk.f32.gmra.mxu0 %vm265_vm1, %v228_v7  ;;  %v234_v19 = vld [vmem:[%s5875_s25 + $0x48] sm:$0xff]  ;;  %v235_v21 = vld [vmem:[%s5875_s25 + $0x50] sm:$0xff]  ;;  %v236_v23 = vld [vmem:[%s5875_s25 + $0x58] sm:$0xff] }
  0x17   : > { %5331 = vmatmul.mubr.msk.f32.gmra.mxu1 %vm265_vm1, %v244_v8  ;;  %5309 = vmatprep.mubr.msk.f32.mxu0 %vm265_vm1, %v229_v9  ;;  %v250_v20 = vld [vmem:[%s5875_s25 + $0xc8] sm:$0xff]  ;;  %v251_v22 = vld [vmem:[%s5875_s25 + $0xd0] sm:$0xff]  ;;  %v252_v24 = vld [vmem:[%s5875_s25 + $0xd8] sm:$0xff] }
  0x18   : > { %5333 = vmatprep.mubr.msk.f32.mxu1 %vm265_vm1, %v245_v10  ;;  %v237_v25 = vld [vmem:[%s5875_s25 + $0x60] sm:$0xff]  ;;  %v238_v27 = vld [vmem:[%s5875_s25 + $0x68] sm:$0xff]  ;;  %v239_v29 = vld [vmem:[%s5875_s25 + $0x70] sm:$0xff] }
  0x19   : > { %v253_v26 = vld [vmem:[%s5875_s25 + $0xe0] sm:$0xff]  ;;  %v254_v28 = vld [vmem:[%s5875_s25 + $0xe8] sm:$0xff]  ;;  %v255_v30 = vld [vmem:[%s5875_s25 + $0xf0] sm:$0xff] }
  0x1a   : > { %5310 = vmatmul.mubr.msk.f32.gmra.mxu0 %vm265_vm1, %v230_v11  ;;  %v240_v31 = vld [vmem:[%s5875_s25 + $0x78] sm:$0xff] }
  0x1b   : > { %5334 = vmatmul.mubr.msk.f32.gmra.mxu1 %vm265_vm1, %v246_v12  ;;  %5312 = vmatprep.mubr.msk.f32.mxu0 %vm265_vm1, %v231_v13  ;;  %v256_v32 = vld [vmem:[%s5875_s25 + $0xf8] sm:$0xff] }
  0x1c   : > { %5336 = vmatprep.mubr.msk.f32.mxu1 %vm265_vm1, %v247_v14 }
  0x1e   : > { %5313 = vmatmul.mubr.msk.f32.gmra.mxu0 %vm265_vm1, %v232_v15 }
  0x1f   : > { %5337 = vmatmul.mubr.msk.f32.gmra.mxu1 %vm265_vm1, %v248_v16  ;;  %5315 = vmatprep.mubr.msk.f32.mxu0 %vm265_vm1, %v233_v17 }
  0x20   : > { %5339 = vmatprep.mubr.msk.f32.mxu1 %vm265_vm1, %v249_v18 }
  0x22   : > { %5316 = vmatmul.mubr.msk.f32.gmra.mxu0 %vm265_vm1, %v234_v19 }
  0x23   : > { %5340 = vmatmul.mubr.msk.f32.gmra.mxu1 %vm265_vm1, %v250_v20  ;;  %5318 = vmatprep.mubr.msk.f32.mxu0 %vm265_vm1, %v235_v21 }
  0x24   : > { %5342 = vmatprep.mubr.msk.f32.mxu1 %vm265_vm1, %v251_v22 }
  0x26   : > { %5319 = vmatmul.mubr.msk.f32.gmra.mxu0 %vm265_vm1, %v236_v23 }
  0x27   : > { %5343 = vmatmul.mubr.msk.f32.gmra.mxu1 %vm265_vm1, %v252_v24  ;;  %5321 = vmatprep.mubr.msk.f32.mxu0 %vm265_vm1, %v237_v25 }
  0x28   : > { %5345 = vmatprep.mubr.msk.f32.mxu1 %vm265_vm1, %v253_v26 }
  0x2a   : > { %5322 = vmatmul.mubr.msk.f32.gmra.mxu0 %vm265_vm1, %v238_v27  ;;  %v815_v27 = vlaneseq }
  0x2b   : > { %5346 = vmatmul.mubr.msk.f32.gmra.mxu1 %vm265_vm1, %v254_v28  ;;  %5324 = vmatprep.mubr.msk.f32.mxu0 %vm265_vm1, %v239_v29 }
  0x2c   : > { %5348 = vmatprep.mubr.msk.f32.mxu1 %vm265_vm1, %v255_v30 }
  0x2e   : > { %5325 = vmatmul.mubr.msk.f32.gmra.mxu0 %vm265_vm1, %v240_v31 }
  0x2f   : > { %5349 = vmatmul.mubr.msk.f32.gmra.mxu1 %vm265_vm1, %v256_v32 }
  0xd2   : > { %v5305_v34 = vpop.f32.mrf.mxu0 }
  0xd3   : > { %v5329_v35 = vpop.f32.mrf.mxu1  ;;  %v5947_v36 = vadd.f32 %v5305_v34, %v5944_v33 }
  0xd4   : > { %v5950_v37 = vadd.f32 %v5329_v35, %v5944_v33  ;;  %v432_v38 = vpop.f32.mrf.mxu0 }
  0xd5   : > { %v512_v39 = vpop.f32.mrf.mxu1  ;;  %v4933_v40 = vmul.f32 -1.442695, %v5947_v36  ;;  %v5954_v41 = vadd.f32 %v5944_v33, %v432_v38 }
  0xd6   : > { %v5957_v42 = vadd.f32 %v5944_v33, %v512_v39  ;;  %v5308_v43 = vpop.f32.mrf.mxu0  ;;  %v4949_v47 = vmul.f32 -1.442695, %v5950_v37 }
  0xd7   : > { %v5332_v44 = vpop.f32.mrf.mxu1  ;;  %5561 = vpow2.f32 %v4933_v40  ;;  %v4932_v45 = vmul.f32 -1.442695, %v5954_v41  ;;  %v5961_v46 = vadd.f32 %v5308_v43, %v5944_v33  ;;  %v816_v40 = vshrl.u32 %v815_v27, 7 }
  0xd8   : > { %v442_v48 = vpop.f32.mrf.mxu0  ;;  %v4948_v50 = vmul.f32 -1.442695, %v5957_v42  ;;  %v5974_v59 = vadd.f32 %v5332_v44, %v5944_v33 }
  0xd9   : > { %v522_v49 = vpop.f32.mrf.mxu1  ;;  %5563 = vpow2.f32 %v4932_v45  ;;  %v4935_v51 = vmul.f32 -1.442695, %v5961_v46  ;;  %v5967_v52 = vadd.f32 %v5944_v33, %v442_v48 }
  0xda   : > { %v5311_v53 = vpop.f32.mrf.mxu0  ;;  %v5980_v61 = vadd.f32 %v5944_v33, %v522_v49  ;;  %v4951_v5 = vmul.f32 -1.442695, %v5974_v59 }
  0xdb   : > { %v5335_v54 = vpop.f32.mrf.mxu1  ;;  %5565 = vpow2.f32 %v4935_v51  ;;  %v4934_v55 = vmul.f32 -1.442695, %v5967_v52  ;;  %v5971_v56 = vadd.f32 %v5311_v53, %v5944_v33  ;;  %v817_v51 = vadd.s32 8, %v816_v40 }
  0xdc   : > { %5567 = vpow2.f32 %v4949_v47  ;;  %v452_v57 = vpop.f32.mrf.mxu0  ;;  %v5984_v1 = vadd.f32 %v5335_v54, %v5944_v33  ;;  %v4950_v6 = vmul.f32 -1.442695, %v5980_v61 }
  0xdd   : > { %v532_v58 = vpop.f32.mrf.mxu1  ;;  %5569 = vpow2.f32 %v4948_v50  ;;  %v5977_v60 = vadd.f32 %v5944_v33, %v452_v57  ;;  %v4937_v0 = vmul.f32 -1.442695, %v5971_v56  ;;  %v3266_v50 = vld [vmem:[%s9319_s3] sm:$0x3] }
  0xde   : > { %5571 = vpow2.f32 %v4934_v55  ;;  %v5314_v62 = vpop.f32.mrf.mxu0  ;;  %v5990_v7 = vadd.f32 %v5944_v33, %v532_v58  ;;  %v4953_v10 = vmul.f32 -1.442695, %v5984_v1  ;;  %5401 = vmatprep.subr.msk.mxu0 %vm884_vm2, %v3266_v50 }
  0xdf   : > { %v5338_v63 = vpop.f32.mrf.mxu1  ;;  %v4936_v2 = vmul.f32 -1.442695, %v5977_v60  ;;  %v5994_v11 = vadd.f32 %v5314_v62, %v5944_v33  ;;  %5402 = vmatpush3.msk.msra.mxu0 %vm884_vm2, %v3266_v50 }
  0xe0   : > { %v462_v3 = vpop.f32.mrf.mxu0  ;;  %v5997_v13 = vadd.f32 %v5338_v63, %v5944_v33  ;;  %v4952_v19 = vmul.f32 -1.442695, %v5990_v7 }
  0xe1   : > { %v542_v4 = vpop.f32.mrf.mxu1  ;;  %5573 = vpow2.f32 %v4936_v2  ;;  %v6000_v16 = vadd.f32 %v5944_v33, %v462_v3  ;;  %v4939_v22 = vmul.f32 -1.442695, %v5994_v11 }
  0xe2   : > { %v5317_v8 = vpop.f32.mrf.mxu0  ;;  %5575 = vpow2.f32 %v4937_v0  ;;  %v6004_v20 = vadd.f32 %v5944_v33, %v542_v4  ;;  %v4955_v24 = vmul.f32 -1.442695, %v5997_v13 }
  0xe3   : > { %v5341_v9 = vpop.f32.mrf.mxu1  ;;  %5577 = vpow2.f32 %v4951_v5  ;;  %v4938_v28 = vmul.f32 -1.442695, %v6000_v16  ;;  %v6014_v53 = vadd.f32 %v5317_v8, %v5944_v33  ;;  %v6027_v5 = vadd.s32 4294967294, %v816_v40 }
  0xe4   : > { %v5562_v12 = vpop.eup %5561  ;;  %v472_v14 = vpop.f32.mrf.mxu0  ;;  %5579 = vpow2.f32 %v4950_v6  ;;  %v4954_v31 = vmul.f32 -1.442695, %v6004_v20  ;;  %v6018_v57 = vadd.f32 %v5341_v9, %v5944_v33  ;;  %v6029_v6 = vadd.s32 4294967295, %v816_v40 }
  0xe5   : > { %v688_v15 = vadd.f32 1.0, %v5562_v12  ;;  %v552_v17 = vpop.f32.mrf.mxu1  ;;  %5581 = vpow2.f32 %v4953_v10  ;;  %v6021_v58 = vadd.f32 %v5944_v33, %v472_v14  ;;  %v6031_v8 = vadd.s32 1, %v817_v51 }
  0xe6   : > { %v5564_v18 = vpop.eup %5563  ;;  %v5320_v25 = vpop.f32.mrf.mxu0  ;;  %v6025_v0 = vadd.f32 %v5944_v33, %v552_v17  ;;  %v6034_v9 = vmul.f32 -1.442695, %v6014_v53  ;;  %vm820_vm5 = vcmp.ge.s32.totalorder %v6027_v5, 0  ;;  %vm828_vm8 = vcmp.ge.s32.totalorder %v6029_v6, 0 }
  0xe7   : > { %v687_v21 = vadd.f32 1.0, %v5564_v18  ;;  %5583 = vrcp.f32 %v688_v15  ;;  %v5344_v29 = vpop.f32.mrf.mxu1  ;;  %v6037_v15 = vmul.f32 -1.442695, %v6018_v57  ;;  %v6040_v17 = vmul.f32 -1.442695, %v6021_v58 }
  0xe8   : > { %v5566_v23 = vpop.eup %5565  ;;  %v482_v38 = vpop.f32.mrf.mxu0  ;;  %v6043_v18 = vadd.f32 %v5320_v25, %v5944_v33  ;;  %vm839_vm6 = vcmp.lt.s32.totalorder %v6031_v8, 16 }
  0xe9   : > { %v5568_v26 = vpop.eup %5567  ;;  %5585 = vrcp.f32 %v687_v21  ;;  %v690_v34 = vadd.f32 1.0, %v5566_v23  ;;  %v562_v43 = vpop.f32.mrf.mxu1  ;;  %v6046_v21 = vmul.f32 -1.442695, %v6025_v0  ;;  %v6052_v23 = vadd.f32 %v5944_v33, %v482_v38 }
  0xea   : > { %v5570_v30 = vpop.eup %5569  ;;  %5587 = vpow2.f32 %v4952_v19  ;;  %v704_v35 = vadd.f32 1.0, %v5568_v26  ;;  %v5323_v49 = vpop.f32.mrf.mxu0  ;;  %9429 = vst [vmem:[#allocation2_spill] sm:$0xff] %v6043_v18  ;;  %v6058_v25 = vadd.f32 %v5944_v33, %v562_v43 }
  0xeb   : > { %v5572_v32 = vpop.eup %5571  ;;  %5589 = vpow2.f32 %v4939_v22  ;;  %v703_v39 = vadd.f32 1.0, %v5570_v30  ;;  %v5347_v54 = vpop.f32.mrf.mxu1  ;;  %v6049_v22 = vadd.f32 %v5344_v29, %v5944_v33  ;;  %9431 = vst [vmem:[#allocation4_spill] sm:$0xff] %v6052_v23  ;;  %v6064_v29 = vadd.f32 %v5323_v49, %v5944_v33 }
  0xec   : > { %5591 = vpow2.f32 %v4955_v24  ;;  %v689_v45 = vadd.f32 1.0, %v5572_v32  ;;  %v492_v3 = vpop.f32.mrf.mxu0  ;;  %9432 = vst [vmem:[#allocation5_spill] sm:$0xff] %v6058_v25  ;;  %v6067_v32 = vadd.f32 %v5347_v54, %v5944_v33  ;;  %v6092_v54 = vmul.f32 -1.442695, %v6058_v25 }
  0xed   : > { %5593 = vpow2.f32 %v4938_v28  ;;  %v572_v10 = vpop.f32.mrf.mxu1  ;;  %9430 = vst [vmem:[#allocation3_spill] sm:$0xff] %v6049_v22  ;;  %9434 = vst [vmem:[#allocation7_spill] sm:$0xff] %v6064_v29 }
  0xee   : > { %v5574_v44 = vpop.eup %5573  ;;  %5595 = vpow2.f32 %v4954_v31  ;;  %v5326_v28 = vpop.f32.mrf.mxu0  ;;  %9435 = vst [vmem:[#allocation8_spill] sm:$0xff] %v6067_v32  ;;  %v6076_v40 = vadd.f32 %v5944_v33, %v572_v10 }
  0xef   : > { %5597 = vrcp.f32 %v690_v34  ;;  %v691_v47 = vadd.f32 1.0, %v5574_v44  ;;  %v5576_v48 = vpop.eup %5575  ;;  %v5350_v34 = vpop.f32.mrf.mxu1  ;;  %v6079_v44 = vadd.s32 2, %v817_v51 }
  0xf0   : > { %5599 = vrcp.f32 %v704_v35  ;;  %v5578_v55 = vpop.eup %5577  ;;  %v692_v63 = vadd.f32 1.0, %v5576_v48  ;;  %9437 = vst [vmem:[#allocation10_spill] sm:$0xff] %v6076_v40  ;;  %v502_v51 = vpop.f32.mrf.mxu0 }
  0xf1   : > { %5601 = vrcp.f32 %v703_v39  ;;  %v5580_v62 = vpop.eup %5579  ;;  %v706_v27 = vadd.f32 1.0, %v5578_v55  ;;  %v6073_v39 = vmul.f32 -1.442695, %v6043_v18  ;;  %vm847_vm10 = vcmp.lt.s32.totalorder %v6079_v44, 16 }
  0xf2   : > { %5603 = vrcp.f32 %v689_v45  ;;  %v5582_v2 = vpop.eup %5581  ;;  %v705_v14 = vadd.f32 1.0, %v5580_v62  ;;  %v6082_v45 = vmul.f32 -1.442695, %v6049_v22  ;;  %v6098_v62 = vmul.f32 -1.442695, %v6064_v29 }
  0xf3   : > { %5605 = vrcp.f32 %v691_v47  ;;  %v708_v38 = vadd.f32 1.0, %v5582_v2  ;;  %v6085_v47 = vmul.f32 -1.442695, %v6052_v23 }
  0xf4   : > { %v5584_v4 = vpop.eup %5583  ;;  %5607 = vrcp.f32 %v692_v63  ;;  %v6101_v63 = vmul.f32 -1.442695, %v6067_v32 }
  0xf5   : > { %v6055_v26 = vmul.f32 %v5584_v4, %v5947_v36  ;;  %v6070_v36 = vadd.f32 %v5944_v33, %v492_v3  ;;  %5609 = vrcp.f32 %v705_v14  ;;  %v6107_v3 = vadd.f32 %v5326_v28, %v5944_v33  ;;  %v582_v4 = vpop.f32.mrf.mxu1 }
  0xf6   : > { %v5586_v12 = vpop.eup %5585  ;;  %5611 = vrcp.f32 %v706_v27  ;;  %v6114_v14 = vmul.f32 -1.442695, %v6076_v40  ;;  %v6127_v40 = vadd.f32 %v5944_v33, %v582_v4 }
  0xf7   : > { %v5588_v19 = vpop.eup %5587  ;;  %v6061_v31 = vmul.f32 %v5586_v12, %v5954_v41  ;;  %9436 = vst [vmem:[#allocation9_spill] sm:$0xff] %v6070_v36  ;;  %v886_v49 = vrot.slane %v6055_v26, 6  ;;  %v6104_v2 = vmul.f32 -1.442695, %v6070_v36  ;;  %9438 = vst [vmem:[#allocation11_spill] sm:$0xff] %v6107_v3  ;;  %5613 = vrcp.f32 %v708_v38 }
  0xf8   : > { %v5590_v24 = vpop.eup %5589  ;;  %v707_v50 = vadd.f32 1.0, %v5588_v19  ;;  %v6117_v19 = vadd.f32 %v5350_v34, %v5944_v33  ;;  %9441 = vst [vmem:[#allocation14_spill] sm:$0xff] %v6127_v40  ;;  %v1048_v34 = vrot.slane %v6055_v26, 7 }
  0xf9   : > { %v5592_v30 = vpop.eup %5591  ;;  %9433 = vst [vmem:[#allocation6_spill] sm:$0xff] %v6061_v31  ;;  %v9324_v43 = vrot.slane %v6061_v31, 6  ;;  %5403 = vmatprep.mubr.msk.f32.mxu0 %vm3269_vm4, %v6061_v31  ;;  %v694_v32 = vadd.f32 1.0, %v5590_v24 }
  0xfa   : > { %v5594_v35 = vpop.eup %5593  ;;  %5404 = vmatmul.mubr.msk.f32.vlgmr.msra.gmra.mxu0 %vm3269_vm4, %v6055_v26  ;;  %9439 = vst [vmem:[#allocation12_spill] sm:$0xff] %v6117_v19  ;;  %5615 = vrcp.f32 %v707_v50  ;;  %v710_v38 = vadd.f32 1.0, %v5592_v30 }
  0xfb   : > { %v5596_v41 = vpop.eup %5595  ;;  %v887_v12 = vsel %vm884_vm2, %v9324_v43, %v886_v49  ;;  %v6124_v43 = vadd.f32 %v5944_v33, %v502_v51  ;;  %v693_v25 = vadd.f32 1.0, %v5594_v35  ;;  %v9444_v33 = vrot.slane %v6061_v31, 7 }
  0xfc   : > { %v5598_v48 = vpop.eup %5597  ;;  %v1013_v23 = vmax.f32 %v6055_v26, %v887_v12  ;;  %5617 = vrcp.f32 %v694_v32  ;;  %v6217_v32 = vmul.f32 -1.442695, %v6127_v40 }
  0xfd   : > { %v5600_v55 = vpop.eup %5599  ;;  %v6121_v36 = vmul.f32 %v5598_v48, %v5961_v46  ;;  %9440 = vst [vmem:[#allocation13_spill] sm:$0xff] %v6124_v43  ;;  %v709_v46 = vadd.f32 1.0, %v5596_v41  ;;  %v1049_v35 = vsel %vm1046_vm3, %v9444_v33, %v1048_v34  ;;  %5619 = vrcp.f32 %v710_v38 }
  0xfe   : > { %v5602_v10 = vpop.eup %5601  ;;  %v6137_v51 = vmul.f32 %v5600_v55, %v5950_v37  ;;  %v6149_v37 = vmax.f32 %v1013_v23, %v1049_v35  ;;  %5621 = vrcp.f32 %v693_v25 }
  0xff   : > { %v5604_v27 = vpop.eup %5603  ;;  %v6132_v28 = vmul.f32 %v5602_v10, %v5957_v42  ;;  %v9329_v50 = vrot.slane %v6121_v36, 6  ;;  %v9330_v4 = vrot.slane %v6121_v36, 7  ;;  %5623 = vrcp.f32 %v709_v46 }
 0x100   : > { %v5606_v29 = vpop.eup %5605  ;;  %9443 = vst [vmem:[#allocation16_spill] sm:$0xff] %v6137_v51  ;;  %v785_v30 = vmul.f32 %v5604_v27, %v5967_v52  ;;  %5625 = vpow2.f32 %v6034_v9  ;;  %v9451_v25 = vrot.slane %v6121_v36, 7 }
 0x101   : > { %9442 = vst [vmem:[#allocation15_spill] sm:$0xff] %v6132_v28  ;;  %v6146_v42 = vmul.f32 %v5606_v29, %v5977_v60  ;;  %v5608_v41 = vpop.eup %5607  ;;  %v9449_v38 = vrot.slane %v6132_v28, 6  ;;  %5627 = vpow2.f32 %v6037_v15 }
 0x102   : > { %v888_v10 = vrot.slane %v785_v30, 6  ;;  %v1050_v12 = vrot.slane %v785_v30, 7  ;;  %v1210_v48 = vrot.slane %v785_v30, 1  ;;  %v1372_v24 = vrot.slane %v785_v30, 2  ;;  %5406 = vmatprep.mubr.msk.f32.mxu0 %vm3269_vm4, %v785_v30  ;;  %v5610_v35 = vpop.eup %5609 }
 0x103   : > { %5407 = vmatmul.mubr.msk.f32.gmra.mxu0 %vm3269_vm4, %v6121_v36  ;;  %v5612_v22 = vpop.eup %5611  ;;  %5629 = vpow2.f32 %v6040_v17 }
 0x104   : > { %v889_v60 = vsel %vm884_vm2, %v886_v49, %v888_v10  ;;  %v891_v29 = vsel %vm884_vm2, %v888_v10, %v9329_v50  ;;  %v1051_v33 = vsel %vm1046_vm3, %v1048_v34, %v1050_v12  ;;  %v1053_v23 = vsel %vm1046_vm3, %v1050_v12, %v9330_v4  ;;  %5409 = vmatprep.mubr.msk.f32.mxu0 %vm3269_vm4, %v6146_v42 }
 0x105   : > { %v982_v52 = vsel %vm820_vm5, %v889_v60, -3.4028235e+38  ;;  %v1015_v27 = vmax.f32 %v6121_v36, %v891_v29  ;;  %v9445_v49 = vrot.slane %v6055_v26, 1  ;;  %v6173_v10 = vmul.f32 %v5608_v41, %v5971_v56 }
 0x106   : > { %v1014_v34 = vmax.f32 %v785_v30, %v982_v52  ;;  %v9446_v50 = vrot.slane %v6121_v36, 1  ;;  %v9447_v60 = vrot.slane %v6055_v26, 2  ;;  %v6199_v52 = vmul.f32 %v5610_v35, %v5980_v61 }
 0x107   : > { %v1211_v55 = vsel %vm1206_vm7, %v9445_v49, %v1210_v48  ;;  %v1144_v49 = vsel %vm828_vm8, %v1051_v33, -3.4028235e+38  ;;  %v6189_v56 = vmax.f32 %v1015_v27, %v1053_v23  ;;  %5410 = vmatmul.mubr.msk.f32.gmra.mxu0 %vm3269_vm4, %v6173_v10  ;;  %v6204_v27 = vpop.eup %5613  ;;  %v918_v33 = vrot.slane %v6137_v51, 6 }
 0x108   : > { %v1213_v12 = vsel %vm1206_vm7, %v1210_v48, %v9446_v50  ;;  %v6180_v4 = vsel %vm839_vm6, %v1211_v55, -3.4028235e+38  ;;  %v6185_v29 = vsel %vm1368_vm9, %v9447_v60, %v1372_v24  ;;  %v9448_v48 = vrot.slane %v6121_v36, 2  ;;  %v5616_v35 = vpop.eup %5615 }
 0x109   : > { %v1176_v41 = vmax.f32 %v1014_v34, %v1144_v49  ;;  %v6202_v55 = vmul.f32 -1.442695, %v6107_v3  ;;  %v6208_v23 = vmul.f32 -1.442695, %v6117_v19  ;;  %v6214_v34 = vmul.f32 %v5612_v22, %v5974_v59  ;;  %v5618_v18 = vpop.eup %5617 }
 0x10a   : > { %v1375_v50 = vsel %vm1368_vm9, %v1372_v24, %v9448_v48  ;;  %v6211_v24 = vmul.f32 -1.442695, %v6124_v43  ;;  %v919_v48 = vsel %vm884_vm2, %v9449_v38, %v918_v33  ;;  %v920_v22 = vrot.slane %v6199_v52, 6 }
 0x10b   : > { %v1338_v61 = vmax.f32 %v1176_v41, %v1213_v12  ;;  %v1029_v46 = vmax.f32 %v6137_v51, %v919_v48  ;;  %v892_v49 = vrot.slane %v6146_v42, 6  ;;  %v1054_v60 = vrot.slane %v6146_v42, 7 }
 0x10c   : > { %v921_v41 = vsel %vm884_vm2, %v918_v33, %v920_v22  ;;  %v1214_v48 = vrot.slane %v6146_v42, 1  ;;  %v1376_v38 = vrot.slane %v6146_v42, 2  ;;  %v9450_v30 = vrot.slane %v6121_v36, 6 }
 0x10d   : > { %v6226_v59 = vmax.f32 %v1338_v61, %v1375_v50  ;;  %v9336_v61 = vrot.slane %v6173_v10, 6  ;;  %v1055_v9 = vsel %vm1046_vm3, %v9451_v25, %v1054_v60  ;;  %v9452_v33 = vrot.slane %v6173_v10, 7 }
 0x10e   : > { %v893_v50 = vsel %vm884_vm2, %v9450_v30, %v892_v49  ;;  %v9453_v30 = vrot.slane %v6121_v36, 1 }
 0x10f   : > { %v895_v12 = vsel %vm884_vm2, %v892_v49, %v9336_v61  ;;  %v1057_v15 = vsel %vm1046_vm3, %v1054_v60, %v9452_v33  ;;  %v984_v43 = vsel %vm820_vm5, %v893_v50, -3.4028235e+38  ;;  %v9454_v61 = vrot.slane %v6173_v10, 1 }
 0x110   : > { %v1017_v19 = vmax.f32 %v6173_v10, %v895_v12  ;;  %v1215_v3 = vsel %vm1206_vm7, %v9453_v30, %v1214_v48  ;;  %v1016_v49 = vmax.f32 %v6146_v42, %v984_v43  ;;  %v9455_v33 = vrot.slane %v6121_v36, 2 }
 0x111   : > { %v1217_v25 = vsel %vm1206_vm7, %v1214_v48, %v9454_v61  ;;  %v1307_v60 = vsel %vm839_vm6, %v1215_v3, -3.4028235e+38  ;;  %v1146_v12 = vsel %vm828_vm8, %v1055_v9, -3.4028235e+38  ;;  %v9456_v43 = vrot.slane %v6173_v10, 2  ;;  %v5620_v9 = vpop.eup %5619 }
 0x112   : > { %v1377_v40 = vsel %vm1368_vm9, %v9455_v33, %v1376_v38  ;;  %v6276_v50 = vmax.f32 %v1017_v19, %v1057_v15  ;;  %v1339_v30 = vmax.f32 %v6189_v56, %v1307_v60  ;;  %v9457_v61 = vrot.slane %v6055_v26, 1 }
 0x113   : > { %v1379_v42 = vsel %vm1368_vm9, %v1376_v38, %v9456_v43  ;;  %v9458_v3 = vrot.slane %v6061_v31, 1  ;;  %v1082_v48 = vrot.slane %v6199_v52, 7  ;;  %v1178_v33 = vmax.f32 %v1016_v49, %v1146_v12  ;;  %v5622_v49 = vpop.eup %5621 }
 0x114   : > { %v1469_v19 = vsel %vm847_vm10, %v1377_v40, -3.4028235e+38  ;;  %v9460_v56 = vrot.slane %v6055_v26, 2  ;;  %v9461_v15 = vrot.slane %v6061_v31, 2  ;;  %v9463_v60 = vrot.slane %v6214_v34, 6 }
 0x115   : > { %v6287_v36 = vsel %vm1206_vm7, %v9458_v3, %v9457_v61  ;;  %v1242_v61 = vrot.slane %v6199_v52, 1  ;;  %v6303_v3 = vmax.f32 %v1339_v30, %v1469_v19  ;;  %v9464_v12 = vrot.slane %v6137_v51, 7  ;;  %v6319_v30 = vpop.eup %5623 }
 0x116   : > { %9459 = vst [vmem:[#allocation17_spill] sm:$0xff] %v6287_v36  ;;  %v6297_v38 = vsel %vm1368_vm9, %v9461_v15, %v9460_v56  ;;  %v923_v43 = vsel %vm884_vm2, %v920_v22, %v9463_v60  ;;  %v9465_v40 = vrot.slane %v6132_v28, 7  ;;  %v9466_v36 = vrot.slane %v6137_v51, 1 }
 0x117   : > { %9462 = vst [vmem:[#allocation18_spill] sm:$0xff] %v6297_v38  ;;  %v9467_v56 = vrot.slane %v6132_v28, 1  ;;  %v998_v22 = vsel %vm820_vm5, %v921_v41, -3.4028235e+38  ;;  %v1340_v60 = vmax.f32 %v1178_v33, %v1217_v25  ;;  %v9469_v38 = vrot.slane %v6137_v51, 2 }
 0x118   : > { %v1081_v26 = vsel %vm1046_vm3, %v9465_v40, %v9464_v12  ;;  %v9470_v31 = vrot.slane %v6132_v28, 2  ;;  %v1031_v41 = vmax.f32 %v6214_v34, %v923_v43  ;;  %v9472_v25 = vrot.slane %v6137_v51, 7 }
 0x119   : > { %v6315_v15 = vsel %vm1206_vm7, %v9467_v56, %v9466_v36  ;;  %v6321_v19 = vmax.f32 %v1029_v46, %v1081_v26  ;;  %v6332_v36 = vmul.f32 %v5616_v35, %v5990_v7  ;;  %v5626_v56 = vpop.eup %5625  ;;  %v9342_v33 = vrot.slane %v6199_v52, 2 }
 0x11a   : > { %9468 = vst [vmem:[#allocation19_spill] sm:$0xff] %v6315_v15  ;;  %v6328_v12 = vsel %vm1368_vm9, %v9470_v31, %v9469_v38  ;;  %v1083_v46 = vsel %vm1046_vm3, %v9472_v25, %v1082_v48  ;;  %v6339_v26 = vmax.f32 %v1340_v60, %v1379_v42  ;;  %v6341_v15 = vpop.eup %5627  ;;  %v9341_v31 = vrot.slane %v6214_v34, 1 }
 0x11b   : > { %9471 = vst [vmem:[#allocation20_spill] sm:$0xff] %v6328_v12  ;;  %v1030_v38 = vmax.f32 %v6199_v52, %v998_v22  ;;  %v9473_v7 = vrot.slane %v6137_v51, 1  ;;  %v6349_v43 = vmul.f32 %v5618_v18, %v5994_v11  ;;  %v6355_v42 = vsel %vm847_vm10, %v6185_v29, -3.4028235e+38 }
 0x11c   : > { %v6359_v60 = vmul.f32 %v6204_v27, %v5984_v1  ;;  %v6362_v22 = vmul.f32 %v5620_v9, %v5997_v13  ;;  %v9474_v25 = vrot.slane %v6214_v34, 7  ;;  %v1160_v11 = vsel %vm828_vm8, %v1083_v46, -3.4028235e+38  ;;  %v4964_v9 = vld [vmem:[%s9319_s3 + $0x2] sm:$0x3] }
 0x11d   : > { %v1243_v35 = vsel %vm1206_vm7, %v9473_v7, %v1242_v61  ;;  %v1245_v18 = vsel %vm1206_vm7, %v1242_v61, %v9341_v31  ;;  %v924_v29 = vrot.slane %v6332_v36, 6  ;;  %v9475_v13 = vrot.slane %v6137_v51, 2  ;;  %5351 = vmatprep.subr.msk.mxu1 %vm884_vm2, %v4964_v9 }
 0x11e   : > { %v1085_v7 = vsel %vm1046_vm3, %v1082_v48, %v9474_v25  ;;  %v1321_v1 = vsel %vm839_vm6, %v1243_v35, -3.4028235e+38  ;;  %v789_v48 = vmul.f32 %v5622_v49, %v6000_v16  ;;  %v1192_v61 = vmax.f32 %v1030_v38, %v1160_v11  ;;  %5352 = vmatpush3.msk.msra.mxu1 %vm884_vm2, %v4964_v9 }
 0x11f   : > { %v6373_v40 = vmax.f32 %v1031_v41, %v1085_v7  ;;  %v1405_v27 = vsel %vm1368_vm9, %v9475_v13, %v9342_v33  ;;  %v9344_v46 = vrot.slane %v6349_v43, 6  ;;  %v9347_v41 = vrot.slane %v6349_v43, 7 }
 0x120   : > { %v896_v35 = vrot.slane %v789_v48, 6  ;;  %v1058_v25 = vrot.slane %v789_v48, 7  ;;  %v1218_v7 = vrot.slane %v789_v48, 1  ;;  %v1380_v31 = vrot.slane %v789_v48, 2  ;;  %5412 = vmatprep.mubr.msk.f32.mxu0 %vm3269_vm4, %v789_v48 }
 0x121   : > { %v1353_v16 = vmax.f32 %v6321_v19, %v1321_v1  ;;  %v9476_v49 = vrot.slane %v6214_v34, 6  ;;  %5413 = vmatmul.mubr.msk.f32.gmra.mxu0 %vm3269_vm4, %v6349_v43  ;;  %v9477_v13 = vrot.slane %v6173_v10, 6  ;;  %v9478_v19 = vrot.slane %v6173_v10, 7 }
 0x122   : > { %v899_v9 = vsel %vm884_vm2, %v896_v35, %v9344_v46  ;;  %v9480_v46 = vrot.slane %v6349_v43, 1 }
 0x123   : > { %v925_v38 = vsel %vm884_vm2, %v9476_v49, %v924_v29  ;;  %v897_v33 = vsel %vm884_vm2, %v9477_v13, %v896_v35  ;;  %v1059_v1 = vsel %vm1046_vm3, %v9478_v19, %v1058_v25  ;;  %v1061_v49 = vsel %vm1046_vm3, %v1058_v25, %v9347_v41 }
 0x124   : > { %v986_v17 = vsel %vm820_vm5, %v897_v33, -3.4028235e+38  ;;  %v1019_v12 = vmax.f32 %v6349_v43, %v899_v9  ;;  %v9479_v13 = vrot.slane %v6173_v10, 1  ;;  %v1221_v19 = vsel %vm1206_vm7, %v1218_v7, %v9480_v46 }
 0x125   : > { %v1018_v35 = vmax.f32 %v789_v48, %v986_v17  ;;  %v9481_v25 = vrot.slane %v6173_v10, 2  ;;  %v1148_v33 = vsel %vm828_vm8, %v1059_v1, -3.4028235e+38  ;;  %v9482_v48 = vrot.slane %v6349_v43, 2 }
 0x126   : > { %v1219_v51 = vsel %vm1206_vm7, %v9479_v13, %v1218_v7  ;;  %v6429_v9 = vmax.f32 %v1019_v12, %v1061_v49  ;;  %v1483_v46 = vsel %vm847_vm10, %v1405_v27, -3.4028235e+38  ;;  %v1354_v13 = vmax.f32 %v1192_v61, %v1245_v18 }
 0x127   : > { %v1309_v28 = vsel %vm839_vm6, %v1219_v51, -3.4028235e+38  ;;  %v1381_v41 = vsel %vm1368_vm9, %v9481_v25, %v1380_v31  ;;  %v1383_v17 = vsel %vm1368_vm9, %v1380_v31, %v9482_v48  ;;  %v926_v51 = vrot.slane %v6359_v60, 6 }
 0x128   : > { %v1341_v11 = vmax.f32 %v6276_v50, %v1309_v28  ;;  %v1180_v7 = vmax.f32 %v1018_v35, %v1148_v33  ;;  %v1471_v10 = vsel %vm847_vm10, %v1381_v41, -3.4028235e+38  ;;  %v1000_v12 = vsel %vm820_vm5, %v925_v38, -3.4028235e+38 }
 0x129   : > { %v696_v28 = vadd.f32 1.0, %v5626_v56  ;;  %v927_v50 = vsel %vm884_vm2, %v924_v29, %v926_v51  ;;  %v1246_v31 = vrot.slane %v6332_v36, 1  ;;  %v6448_v27 = vmul.f32 %v6319_v30, %v6004_v20 }
 0x12a   : > { %v6442_v1 = vmax.f32 %v1341_v11, %v1471_v10  ;;  %v1342_v49 = vmax.f32 %v1180_v7, %v1221_v19  ;;  %v9484_v35 = vrot.slane %v6214_v34, 2  ;;  %v9485_v41 = vrot.slane %v6199_v52, 2  ;;  %v5630_v10 = vpop.eup %5629 }
 0x12b   : > { %v6455_v61 = vmax.f32 %v1353_v16, %v1483_v46  ;;  %v1088_v38 = vrot.slane %v6359_v60, 7  ;;  %v9487_v56 = vrot.slane %v6332_v36, 7  ;;  %v9488_v29 = vrot.slane %v6214_v34, 7  ;;  %v5031_v16 = vld [vmem:[%s9319_s3 + $0x4] sm:$0x3] }
 0x12c   : > { %9483 = vst [vmem:[#allocation21_spill] sm:$0xff] %v6442_v1  ;;  %v1407_v18 = vsel %vm1368_vm9, %v9485_v41, %v9484_v35  ;;  %v1248_v19 = vrot.slane %v6359_v60, 1  ;;  %v1410_v20 = vrot.slane %v6359_v60, 2  ;;  %v1032_v30 = vmax.f32 %v6332_v36, %v1000_v12  ;;  %5451 = vmatprep.subr.msk.mxu1 %vm884_vm2, %v5031_v16 }
 0x12d   : > { %9486 = vst [vmem:[#allocation22_spill] sm:$0xff] %v6455_v61  ;;  %v1087_v11 = vsel %vm1046_vm3, %v9488_v29, %v9487_v56  ;;  %v6466_v25 = vmax.f32 %v1342_v49, %v1383_v17  ;;  %v6471_v33 = vmax.f32 %v1354_v13, %v1407_v18  ;;  %v1033_v48 = vmax.f32 %v6359_v60, %v927_v50 }
 0x12e   : > { %5631 = vrcp.f32 %v696_v28  ;;  %v9490_v46 = vmax.f32 %v6149_v37, %v6180_v4  ;;  %v1162_v17 = vsel %vm828_vm8, %v1087_v11, -3.4028235e+38  ;;  %v9491_v12 = vrot.slane %v6214_v34, 1 }
 0x12f   : > { %9489 = vst [vmem:[#allocation23_spill] sm:$0xff] %v6471_v33  ;;  %v928_v13 = vrot.slane %v6448_v27, 6  ;;  %v1533_v50 = vmax.f32 %v6303_v3, -3.4028235e+38  ;;  %v695_v28 = vadd.f32 1.0, %v5630_v10  ;;  %5633 = vpow2.f32 %v6046_v21 }
 0x130   : > { %v1499_v7 = vmax.f32 %v9490_v46, %v6355_v42  ;;  %v1247_v49 = vsel %vm1206_vm7, %v9491_v12, %v1246_v31  ;;  %v1194_v4 = vmax.f32 %v1032_v30, %v1162_v17  ;;  %5635 = vpow2.f32 %v6073_v39  ;;  %v5065_v39 = vld [vmem:[%s9319_s3 + $0x6] sm:$0x3] }
 0x131   : > { %v1536_v42 = vmax.f32 %v6466_v25, %v6226_v59  ;;  %v1408_v18 = vrot.slane %v6332_v36, 2  ;;  %5637 = vrcp.f32 %v695_v28  ;;  %v712_v21 = vadd.f32 1.0, %v6341_v15  ;;  %5501 = vmatprep.subr.msk.mxu0 %vm884_vm2, %v5065_v39 }
 0x132   : > { %v1531_v35 = vmax.f32 %v1499_v7, -3.4028235e+38  ;;  %v1535_v41 = vmax.f32 %v6442_v1, %v1499_v7  ;;  %v6489_v37 = vmax.f32 %v1533_v50, %v1499_v7  ;;  %5639 = vpow2.f32 %v6082_v45  ;;  %5502 = vmatpush3.msk.msra.mxu0 %vm884_vm2, %v5065_v39 }
 0x133   : > { %v6505_v30 = vmax.f32 %v1536_v42, %v6339_v26  ;;  %v1323_v16 = vsel %vm839_vm6, %v1247_v49, -3.4028235e+38  ;;  %v929_v46 = vsel %vm884_vm2, %v926_v51, %v928_v13  ;;  %5641 = vpow2.f32 %v6085_v47 }
 0x134   : > { %v1563_v56 = vmax.f32 %v1531_v35, -3.4028235e+38  ;;  %v6495_v29 = vmax.f32 %v1535_v41, %v6303_v3  ;;  %v1597_v11 = vmax.f32 %v6489_v37, %v6442_v1  ;;  %v9492_v45 = vrot.slane %v6332_v36, 7  ;;  %v9504_v37 = vld [vmem:[#allocation3_spill] sm:$0xff] }
 0x135   : > { %v930_v10 = vrot.slane %v6362_v22, 6  ;;  %v1250_v17 = vrot.slane %v6448_v27, 1  ;;  %5643 = vpow2.f32 %v6092_v54  ;;  %v1249_v47 = vsel %vm1206_vm7, %v1246_v31, %v1248_v19 }
 0x136   : > { %v1595_v15 = vmax.f32 %v1563_v56, %v6303_v3  ;;  %v1089_v7 = vsel %vm1046_vm3, %v9492_v45, %v1088_v38  ;;  %v9493_v51 = vrot.slane %v6214_v34, 2  ;;  %v1090_v49 = vrot.slane %v6448_v27, 7 }
 0x137   : > { %v1355_v28 = vmax.f32 %v6373_v40, %v1323_v16  ;;  %v931_v35 = vsel %vm884_vm2, %v928_v13, %v930_v10  ;;  %v1002_v54 = vsel %vm820_vm5, %v929_v46, -3.4028235e+38  ;;  %5645 = vrcp.f32 %v712_v21 }
 0x138   : > { %v1409_v12 = vsel %vm1368_vm9, %v9493_v51, %v1408_v18  ;;  %v6528_v50 = vmax.f32 %v1595_v15, %v6442_v1  ;;  %v6536_v31 = vmax.f32 %v1033_v48, %v1089_v7  ;;  %v1356_v41 = vmax.f32 %v1194_v4, %v1249_v47 }
 0x139   : > { %v1412_v42 = vrot.slane %v6448_v27, 2  ;;  %5647 = vpow2.f32 %v6098_v62  ;;  %v1411_v56 = vsel %vm1368_vm9, %v1408_v18, %v1410_v20  ;;  %v1485_v40 = vsel %vm847_vm10, %v1409_v12, -3.4028235e+38 }
 0x13a   : > { %v1251_v13 = vsel %vm1206_vm7, %v1248_v19, %v1250_v17  ;;  %5649 = vpow2.f32 %v6101_v63  ;;  %v1034_v21 = vmax.f32 %v6448_v27, %v1002_v54  ;;  %v1035_v48 = vmax.f32 %v6362_v22, %v931_v35 }
 0x13b   : > { %v1091_v4 = vsel %vm1046_vm3, %v1088_v38, %v1090_v49  ;;  %5651 = vpow2.f32 %v6104_v2  ;;  %v5632_v62 = vpop.eup %5631  ;;  %v6553_v39 = vmax.f32 %v1355_v28, %v1485_v40  ;;  %v1092_v18 = vrot.slane %v6362_v22, 7 }
 0x13c   : > { %v9351_v16 = vrot.slane %v6362_v22, 1  ;;  %5653 = vpow2.f32 %v6114_v14  ;;  %v6558_v63 = vmax.f32 %v1356_v41, %v1411_v56  ;;  %v9350_v19 = vrot.slane %v6362_v22, 2  ;;  %v5634_v38 = vpop.eup %5633 }
 0x13d   : > { %9494 = vst [vmem:[#allocation24_spill] sm:$0xff] %v6553_v39  ;;  %v6563_v46 = vsel %vm839_vm6, %v1251_v13, -3.4028235e+38  ;;  %v1413_v2 = vsel %vm1368_vm9, %v1410_v20, %v1412_v42  ;;  %v1093_v15 = vsel %vm1046_vm3, %v1090_v49, %v1092_v18  ;;  %v1164_v14 = vsel %vm828_vm8, %v1091_v4, -3.4028235e+38  ;;  %v5636_v7 = vpop.eup %5635 }
 0x13e   : > { %9495 = vst [vmem:[#allocation25_spill] sm:$0xff] %v6558_v63  ;;  %v6574_v45 = vmul.f32 %v5632_v62, %v6014_v53  ;;  %5655 = vpow2.f32 %v6202_v55  ;;  %v6577_v47 = vmax.f32 %v1034_v21, %v1164_v14  ;;  %v6579_v51 = vmax.f32 %v1035_v48, %v1093_v15  ;;  %v5638_v12 = vpop.eup %5637 }
 0x13f   : > { %v6584_v20 = vsel %vm1206_vm7, %v1250_v17, %v9351_v16  ;;  %5657 = vpow2.f32 %v6208_v23  ;;  %v1357_v49 = vmax.f32 %v6536_v31, %v6563_v46  ;;  %v6592_v53 = vsel %vm1368_vm9, %v1412_v42, %v9350_v19  ;;  %v5640_v28 = vpop.eup %5639 }
 0x140   : > { %v1487_v55 = vsel %vm847_vm10, %v1413_v2, -3.4028235e+38  ;;  %5659 = vpow2.f32 %v6211_v24  ;;  %v791_v17 = vmul.f32 %v5638_v12, %v6021_v58  ;;  %v711_v35 = vadd.f32 1.0, %v5634_v38  ;;  %v5642_v54 = vpop.eup %5641 }
 0x141   : > { %5661 = vpow2.f32 %v6217_v32  ;;  %v9348_v31 = vrot.slane %v6574_v45, 6  ;;  %v9349_v41 = vrot.slane %v6574_v45, 7  ;;  %v1224_v42 = vrot.slane %v6574_v45, 1 }
 0x142   : > { %v9357_v56 = vrot.slane %v6574_v45, 2  ;;  %v5644_v40 = vpop.eup %5643  ;;  %v900_v13 = vrot.slane %v791_v17, 6  ;;  %v1062_v24 = vrot.slane %v791_v17, 7  ;;  %v1222_v21 = vrot.slane %v791_v17, 1  ;;  %5415 = vmatprep.mubr.msk.f32.mxu0 %vm3269_vm4, %v791_v17 }
 0x143   : > { %v1384_v48 = vrot.slane %v791_v17, 2  ;;  %5663 = vrcp.f32 %v711_v35  ;;  %v698_v58 = vadd.f32 1.0, %v5636_v7  ;;  %v714_v32 = vadd.f32 1.0, %v5640_v28  ;;  %5416 = vmatmul.mubr.msk.f32.gmra.mxu0 %vm3269_vm4, %v6574_v45 }
 0x144   : > { %v697_v4 = vadd.f32 1.0, %v5642_v54  ;;  %v5646_v62 = vpop.eup %5645  ;;  %v9496_v46 = vrot.slane %v6349_v43, 6  ;;  %v903_v38 = vsel %vm884_vm2, %v900_v13, %v9348_v31  ;;  %v9497_v15 = vrot.slane %v6349_v43, 7 }
 0x145   : > { %v1065_v7 = vsel %vm1046_vm3, %v1062_v24, %v9349_v41  ;;  %v1021_v35 = vmax.f32 %v6574_v45, %v903_v38  ;;  %v9498_v54 = vrot.slane %v6349_v43, 1  ;;  %v713_v23 = vadd.f32 1.0, %v5644_v40 }
 0x146   : > { %v901_v2 = vsel %vm884_vm2, %v9496_v46, %v900_v13  ;;  %v1063_v14 = vsel %vm1046_vm3, %v9497_v15, %v1062_v24  ;;  %v5648_v12 = vpop.eup %5647  ;;  %v1225_v15 = vsel %vm1206_vm7, %v1222_v21, %v1224_v42  ;;  %v9499_v41 = vrot.slane %v6349_v43, 2 }
 0x147   : > { %v988_v28 = vsel %vm820_vm5, %v901_v2, -3.4028235e+38  ;;  %v1223_v46 = vsel %vm1206_vm7, %v9498_v54, %v1222_v21  ;;  %v5650_v13 = vpop.eup %5649  ;;  %v1150_v38 = vsel %vm828_vm8, %v1063_v14, -3.4028235e+38  ;;  %v6635_v16 = vmax.f32 %v1021_v35, %v1065_v7 }
 0x148   : > { %v1020_v31 = vmax.f32 %v791_v17, %v988_v28  ;;  %v1311_v24 = vsel %vm839_vm6, %v1223_v46, -3.4028235e+38  ;;  %v1385_v2 = vsel %vm1368_vm9, %v9499_v41, %v1384_v48  ;;  %v5652_v19 = vpop.eup %5651  ;;  %v1387_v17 = vsel %vm1368_vm9, %v1384_v48, %v9357_v56 }
 0x149   : > { %v1343_v40 = vmax.f32 %v6429_v9, %v1311_v24  ;;  %v5654_v21 = vpop.eup %5653  ;;  %v1473_v54 = vsel %vm847_vm10, %v1385_v2, -3.4028235e+38  ;;  %5665 = vrcp.f32 %v698_v58  ;;  %v700_v43 = vadd.f32 1.0, %v5648_v12 }
 0x14a   : > { %v1182_v28 = vmax.f32 %v1020_v31, %v1150_v38  ;;  %v1358_v41 = vmax.f32 %v6577_v47, %v6584_v20  ;;  %v6645_v46 = vmax.f32 %v1357_v49, %v1487_v55  ;;  %5667 = vrcp.f32 %v714_v32 }
 0x14b   : > { %v6647_v14 = vmax.f32 %v1343_v40, %v1473_v54  ;;  %v5656_v9 = vpop.eup %5655  ;;  %v6650_v7 = vmul.f32 %v5646_v62, %v6018_v57  ;;  %5669 = vrcp.f32 %v697_v4  ;;  %v716_v31 = vadd.f32 1.0, %v5650_v13 }
 0x14c   : > { %9500 = vst [vmem:[#allocation26_spill] sm:$0xff] %v6645_v46  ;;  %v1344_v48 = vmax.f32 %v1182_v28, %v1225_v15  ;;  %v5658_v35 = vpop.eup %5657  ;;  %5671 = vrcp.f32 %v713_v23  ;;  %v699_v24 = vadd.f32 1.0, %v5652_v19  ;;  %v715_v58 = vadd.f32 1.0, %v5654_v21 }
 0x14d   : > { %v6656_v47 = vmax.f32 %v1597_v11, %v6647_v14  ;;  %v5660_v20 = vpop.eup %5659  ;;  %5673 = vrcp.f32 %v700_v43  ;;  %v1537_v55 = vmax.f32 %v6647_v14, %v6303_v3  ;;  %v6665_v19 = vmax.f32 %v1358_v41, %v6592_v53  ;;  %v9503_v3 = vld [vmem:[#allocation2_spill] sm:$0xff] }
 0x14e   : > { %v6658_v49 = vmax.f32 %v1344_v48, %v1387_v17  ;;  %v5662_v32 = vpop.eup %5661  ;;  %v702_v23 = vadd.f32 1.0, %v5656_v9  ;;  %5675 = vrcp.f32 %v716_v31  ;;  %v718_v11 = vadd.f32 1.0, %v5658_v35 }
 0x14f   : > { %v6672_v12 = vmax.f32 %v1537_v55, %v6442_v1  ;;  %5677 = vrcp.f32 %v699_v24  ;;  %v9355_v2 = vrot.slane %v6650_v7, 6  ;;  %v9354_v38 = vrot.slane %v6650_v7, 7 }
 0x150   : > { %v1538_v53 = vmax.f32 %v6658_v49, %v6339_v26  ;;  %v5664_v15 = vpop.eup %5663  ;;  %5679 = vrcp.f32 %v715_v58  ;;  %v701_v40 = vadd.f32 1.0, %v5660_v20  ;;  %v717_v21 = vadd.f32 1.0, %v5662_v32 }
 0x151   : > { %v6681_v17 = vmul.f32 %v5664_v15, %v6025_v0  ;;  %5681 = vrcp.f32 %v702_v23  ;;  %v9353_v54 = vrot.slane %v6650_v7, 1  ;;  %v9352_v43 = vrot.slane %v6650_v7, 2 }
 0x152   : > { %v6684_v28 = vmax.f32 %v1538_v53, %v6466_v25  ;;  %5683 = vrcp.f32 %v718_v11 }
 0x153   : > { %v932_v9 = vrot.slane %v6681_v17, 6  ;;  %v1094_v48 = vrot.slane %v6681_v17, 7  ;;  %v1254_v31 = vrot.slane %v6681_v17, 1  ;;  %v1416_v0 = vrot.slane %v6681_v17, 2 }
 0x154   : > { %5685 = vrcp.f32 %v701_v40 }
 0x155   : > { %v933_v55 = vsel %vm884_vm2, %v930_v10, %v932_v9  ;;  %v935_v32 = vsel %vm884_vm2, %v932_v9, %v9355_v2  ;;  %v1095_v23 = vsel %vm1046_vm3, %v1092_v18, %v1094_v48  ;;  %5687 = vrcp.f32 %v717_v21 }
 0x156   : > { %v5666_v20 = vpop.eup %5665  ;;  %v1004_v53 = vsel %vm820_vm5, %v933_v55, -3.4028235e+38  ;;  %v1037_v15 = vmax.f32 %v6650_v7, %v935_v32  ;;  %v1097_v40 = vsel %vm1046_vm3, %v1094_v48, %v9354_v38  ;;  %v9501_v10 = vrot.slane %v6362_v22, 1 }
 0x157   : > { %v5668_v11 = vpop.eup %5667  ;;  %v1036_v24 = vmax.f32 %v6681_v17, %v1004_v53  ;;  %v1166_v18 = vsel %vm828_vm8, %v1095_v23, -3.4028235e+38  ;;  %v9502_v55 = vrot.slane %v6362_v22, 2  ;;  %v1257_v48 = vsel %vm1206_vm7, %v1254_v31, %v9353_v54 }
 0x158   : > { %v1255_v58 = vsel %vm1206_vm7, %v9501_v10, %v1254_v31  ;;  %v5670_v9 = vpop.eup %5669  ;;  %v6722_v41 = vmax.f32 %v1037_v15, %v1097_v40  ;;  %v6734_v4 = vmul.f32 %v5668_v11, %v9504_v37  ;;  %v1419_v40 = vsel %vm1368_vm9, %v1416_v0, %v9352_v43 }
 0x159   : > { %v1327_v21 = vsel %vm839_vm6, %v1255_v58, -3.4028235e+38  ;;  %v1417_v32 = vsel %vm1368_vm9, %v9502_v55, %v1416_v0  ;;  %v5672_v35 = vpop.eup %5671  ;;  %v1198_v13 = vmax.f32 %v1036_v24, %v1166_v18  ;;  %v6731_v58 = vmul.f32 %v5666_v20, %v9503_v3  ;;  %v9505_v55 = vld [vmem:[#allocation4_spill] sm:$0xff] }
 0x15a   : > { %v1359_v10 = vmax.f32 %v6579_v51, %v1327_v21  ;;  %v1489_v53 = vsel %vm847_vm10, %v1417_v32, -3.4028235e+38  ;;  %v5674_v23 = vpop.eup %5673  ;;  %v793_v15 = vmul.f32 %v5670_v9, %v9505_v55  ;;  %v9506_v51 = vld [vmem:[#allocation5_spill] sm:$0xff]  ;;  %v9507_v32 = vld [vmem:[#allocation7_spill] sm:$0xff] }
 0x15b   : > { %v6743_v21 = vmul.f32 %v5672_v35, %v9506_v51  ;;  %v6746_v62 = vmul.f32 %v5674_v23, %v9507_v32  ;;  %v6748_v24 = vpop.eup %5675  ;;  %v1360_v3 = vmax.f32 %v1198_v13, %v1257_v48  ;;  %v9356_v37 = vrot.slane %v6731_v58, 6 }
 0x15c   : > { %v6740_v31 = vmax.f32 %v1359_v10, %v1489_v53  ;;  %v9358_v20 = vrot.slane %v6731_v58, 7  ;;  %v9360_v11 = vrot.slane %v6731_v58, 1  ;;  %5418 = vmatprep.mubr.msk.f32.mxu0 %vm3269_vm4, %v793_v15  ;;  %v6754_v0 = vpop.eup %5677  ;;  %v904_v23 = vrot.slane %v793_v15, 6 }
 0x15d   : > { %5419 = vmatmul.mubr.msk.f32.gmra.mxu0 %vm3269_vm4, %v6731_v58  ;;  %v5680_v13 = vpop.eup %5679  ;;  %v6762_v48 = vmax.f32 %v1360_v3, %v1419_v40  ;;  %v1066_v55 = vrot.slane %v793_v15, 7  ;;  %v1226_v32 = vrot.slane %v793_v15, 1  ;;  %v1388_v57 = vrot.slane %v793_v15, 2 }
 0x15e   : > { %v5682_v51 = vpop.eup %5681  ;;  %v936_v43 = vrot.slane %v6743_v21, 6  ;;  %v1098_v54 = vrot.slane %v6743_v21, 7  ;;  %v9508_v10 = vrot.slane %v6574_v45, 6  ;;  %v907_v40 = vsel %vm884_vm2, %v904_v23, %v9356_v37 }
 0x15f   : > { %v5684_v18 = vpop.eup %5683  ;;  %v9509_v3 = vrot.slane %v6574_v45, 7  ;;  %v1069_v35 = vsel %vm1046_vm3, %v1066_v55, %v9358_v20  ;;  %v1023_v9 = vmax.f32 %v6731_v58, %v907_v40  ;;  %v9530_v33 = vrot.slane %v6731_v58, 1 }
 0x160   : > { %v905_v38 = vsel %vm884_vm2, %v9508_v10, %v904_v23  ;;  %v1227_v23 = vsel %vm1206_vm7, %v1224_v42, %v1226_v32  ;;  %v9511_v42 = vrot.slane %v6731_v58, 2  ;;  %v9531_v61 = vrot.slane %v6746_v62, 1 }
 0x161   : > { %v1067_v53 = vsel %vm1046_vm3, %v9509_v3, %v1066_v55  ;;  %v990_v2 = vsel %vm820_vm5, %v905_v38, -3.4028235e+38  ;;  %v5686_v37 = vpop.eup %5685  ;;  %v1229_v3 = vsel %vm1206_vm7, %v1226_v32, %v9360_v11  ;;  %v1313_v55 = vsel %vm839_vm6, %v1227_v23, -3.4028235e+38 }
 0x162   : > { %v1152_v10 = vsel %vm828_vm8, %v1067_v53, -3.4028235e+38  ;;  %v1022_v56 = vmax.f32 %v793_v15, %v990_v2  ;;  %v9510_v38 = vrot.slane %v6574_v45, 2  ;;  %v6795_v20 = vpop.eup %5687  ;;  %v6797_v53 = vmax.f32 %v1023_v9, %v1069_v35 }
 0x163   : > { %v1345_v46 = vmax.f32 %v6635_v16, %v1313_v55  ;;  %v1391_v2 = vsel %vm1368_vm9, %v1388_v57, %v9511_v42  ;;  %v9512_v23 = vrot.slane %v6650_v7, 6  ;;  %v9514_v9 = vrot.slane %v6650_v7, 7 }
 0x164   : > { %v1389_v40 = vsel %vm1368_vm9, %v9510_v38, %v1388_v57  ;;  %v1184_v32 = vmax.f32 %v1022_v56, %v1152_v10  ;;  %v9513_v38 = vrot.slane %v6734_v4, 6  ;;  %v9515_v56 = vrot.slane %v6734_v4, 7 }
 0x165   : > { %v1475_v15 = vsel %vm847_vm10, %v1389_v40, -3.4028235e+38  ;;  %v937_v45 = vsel %vm884_vm2, %v9512_v23, %v936_v43  ;;  %v1099_v16 = vsel %vm1046_vm3, %v9514_v9, %v1098_v54  ;;  %v1258_v23 = vrot.slane %v6743_v21, 1 }
 0x166   : > { %v939_v11 = vsel %vm884_vm2, %v936_v43, %v9513_v38  ;;  %v6814_v35 = vmax.f32 %v1345_v46, %v1475_v15  ;;  %v1006_v57 = vsel %vm820_vm5, %v937_v45, -3.4028235e+38  ;;  %v1101_v10 = vsel %vm1046_vm3, %v1098_v54, %v9515_v56  ;;  %v9522_v15 = vld [vmem:[#allocation10_spill] sm:$0xff] }
 0x167   : > { %v1039_v55 = vmax.f32 %v6734_v4, %v939_v11  ;;  %v1346_v40 = vmax.f32 %v1184_v32, %v1229_v3  ;;  %v1038_v42 = vmax.f32 %v6743_v21, %v1006_v57  ;;  %v1168_v43 = vsel %vm828_vm8, %v1099_v16, -3.4028235e+38  ;;  %v9521_v11 = vld [vmem:[#allocation9_spill] sm:$0xff] }
 0x168   : > { %v1420_v46 = vrot.slane %v6743_v21, 2  ;;  %v9516_v54 = vrot.slane %v6650_v7, 1  ;;  %v9517_v32 = vrot.slane %v6734_v4, 1  ;;  %v6859_v63 = vmul.f32 %v5680_v13, %v9522_v15 }
 0x169   : > { %v6826_v38 = vmax.f32 %v1039_v55, %v1101_v10  ;;  %v6831_v45 = vmax.f32 %v1346_v40, %v1391_v2  ;;  %v1200_v9 = vmax.f32 %v1038_v42, %v1168_v43  ;;  %v9518_v55 = vrot.slane %v6650_v7, 2 }
 0x16a   : > { %v1259_v3 = vsel %vm1206_vm7, %v9516_v54, %v1258_v23  ;;  %v1261_v16 = vsel %vm1206_vm7, %v1258_v23, %v9517_v32  ;;  %v9519_v10 = vrot.slane %v6734_v4, 2  ;;  %v9520_v32 = vld [vmem:[#allocation8_spill] sm:$0xff]  ;;  %v9528_v15 = vrot.slane %v6731_v58, 7 }
 0x16b   : > { %v1329_v57 = vsel %vm839_vm6, %v1259_v3, -3.4028235e+38  ;;  %v1421_v56 = vsel %vm1368_vm9, %v9518_v55, %v1420_v46  ;;  %v1362_v43 = vmax.f32 %v1200_v9, %v1261_v16  ;;  %v6854_v3 = vmul.f32 %v6748_v24, %v9520_v32  ;;  %v9524_v16 = vld [vmem:[#allocation12_spill] sm:$0xff] }
 0x16c   : > { %v1423_v2 = vsel %vm1368_vm9, %v1420_v46, %v9519_v10  ;;  %v1361_v42 = vmax.f32 %v6722_v41, %v1329_v57  ;;  %v1491_v54 = vsel %vm847_vm10, %v1421_v56, -3.4028235e+38  ;;  %v795_v55 = vmul.f32 %v6754_v0, %v9521_v11  ;;  %v9523_v46 = vld [vmem:[#allocation11_spill] sm:$0xff]  ;;  %v9525_v56 = vld [vmem:[#allocation13_spill] sm:$0xff] }
 0x16d   : > { %v6862_v10 = vmul.f32 %v5682_v51, %v9523_v46  ;;  %v6866_v9 = vmax.f32 %v1362_v43, %v1423_v2  ;;  %v6869_v57 = vmul.f32 %v5684_v18, %v9524_v16  ;;  %v6872_v23 = vmul.f32 %v5686_v37, %v9525_v56 }
 0x16e   : > { %v6864_v41 = vmax.f32 %v1361_v42, %v1491_v54  ;;  %5421 = vmatprep.mubr.msk.f32.mxu0 %vm3269_vm4, %v795_v55  ;;  %v908_v51 = vrot.slane %v795_v55, 6  ;;  %v1070_v11 = vrot.slane %v795_v55, 7  ;;  %v1230_v2 = vrot.slane %v795_v55, 1 }
 0x16f   : > { %v1392_v42 = vrot.slane %v795_v55, 2  ;;  %5422 = vmatmul.mubr.msk.f32.gmra.mxu0 %vm3269_vm4, %v6746_v62  ;;  %v940_v37 = vrot.slane %v6859_v63, 6  ;;  %v1102_v18 = vrot.slane %v6859_v63, 7  ;;  %v1262_v43 = vrot.slane %v6859_v63, 1 }
 0x170   : > { %v1424_v54 = vrot.slane %v6859_v63, 2  ;;  %5424 = vmatprep.mubr.msk.f32.mxu0 %vm3269_vm4, %v6872_v23  ;;  %v9526_v32 = vrot.slane %v6731_v58, 6  ;;  %v9527_v16 = vrot.slane %v6746_v62, 6  ;;  %v1071_v13 = vsel %vm1046_vm3, %v9528_v15, %v1070_v11 }
 0x171   : > { %v9529_v0 = vrot.slane %v6746_v62, 7  ;;  %v1233_v15 = vsel %vm1206_vm7, %v1230_v2, %v9531_v61 }
 0x172   : > { %v909_v46 = vsel %vm884_vm2, %v9526_v32, %v908_v51  ;;  %v911_v56 = vsel %vm884_vm2, %v908_v51, %v9527_v16  ;;  %v1154_v32 = vsel %vm828_vm8, %v1071_v13, -3.4028235e+38  ;;  %v1231_v51 = vsel %vm1206_vm7, %v9530_v33, %v1230_v2 }
 0x173   : > { %v1073_v24 = vsel %vm1046_vm3, %v1070_v11, %v9529_v0  ;;  %v992_v40 = vsel %vm820_vm5, %v909_v46, -3.4028235e+38  ;;  %v1025_v39 = vmax.f32 %v6746_v62, %v911_v56  ;;  %v1315_v0 = vsel %vm839_vm6, %v1231_v51, -3.4028235e+38  ;;  %5425 = vmatmul.mubr.msk.f32.gmra.mxu0 %vm3269_vm4, %v6862_v10 }
 0x174   : > { %v1024_v16 = vmax.f32 %v795_v55, %v992_v40  ;;  %v9532_v11 = vrot.slane %v6731_v58, 2  ;;  %v1347_v56 = vmax.f32 %v6797_v53, %v1315_v0  ;;  %v9533_v33 = vrot.slane %v6746_v62, 2  ;;  %v9534_v55 = vld [vmem:[#allocation15_spill] sm:$0xff] }
 0x175   : > { %v6917_v13 = vmax.f32 %v1025_v39, %v1073_v24  ;;  %5427 = vmatprep.mubr.msk.f32.mxu0 %vm3269_vm4, %v9534_v55  ;;  %v9535_v2 = vrot.slane %v6734_v4, 6  ;;  %v9536_v39 = vrot.slane %v6854_v3, 6  ;;  %v9537_v53 = vrot.slane %v6734_v4, 7 }
 0x176   : > { %v1393_v46 = vsel %vm1368_vm9, %v9532_v11, %v1392_v42  ;;  %v1395_v40 = vsel %vm1368_vm9, %v1392_v42, %v9533_v33  ;;  %v1186_v58 = vmax.f32 %v1024_v16, %v1154_v32  ;;  %v9538_v32 = vrot.slane %v6854_v3, 7 }
 0x177   : > { %v1477_v61 = vsel %vm847_vm10, %v1393_v46, -3.4028235e+38  ;;  %v941_v51 = vsel %vm884_vm2, %v9535_v2, %v940_v37  ;;  %v943_v24 = vsel %vm884_vm2, %v940_v37, %v9536_v39  ;;  %v1103_v0 = vsel %vm1046_vm3, %v9537_v53, %v1102_v18 }
 0x178   : > { %v6936_v42 = vmax.f32 %v1347_v56, %v1477_v61  ;;  %v1008_v11 = vsel %vm820_vm5, %v941_v51, -3.4028235e+38  ;;  %v1041_v46 = vmax.f32 %v6854_v3, %v943_v24  ;;  %v1105_v16 = vsel %vm1046_vm3, %v1102_v18, %v9538_v32  ;;  %v9540_v61 = vld [vmem:[#allocation16_spill] sm:$0xff] }
 0x179   : > { %v1348_v33 = vmax.f32 %v1186_v58, %v1233_v15  ;;  %v1040_v2 = vmax.f32 %v6859_v63, %v1008_v11  ;;  %v1170_v37 = vsel %vm828_vm8, %v1103_v0, -3.4028235e+38  ;;  %v9539_v39 = vrot.slane %v6734_v4, 1  ;;  %5428 = vmatmul.mubr.msk.f32.gmra.mxu0 %vm3269_vm4, %v9540_v61 }
 0x17a   : > { %v6952_v51 = vmax.f32 %v1041_v46, %v1105_v16  ;;  %v9541_v24 = vrot.slane %v6854_v3, 1  ;;  %v9542_v15 = vrot.slane %v6734_v4, 2  ;;  %5430 = vmatprep.mubr.msk.f32.mxu0 %vm3269_vm4, %v6199_v52  ;;  %v9544_v32 = vrot.slane %v6854_v3, 2 }
 0x17b   : > { %v1263_v56 = vsel %vm1206_vm7, %v9539_v39, %v1262_v43  ;;  %v6964_v0 = vmax.f32 %v1348_v33, %v1395_v40  ;;  %v1202_v11 = vmax.f32 %v1040_v2, %v1170_v37  ;;  %v914_v39 = vrot.slane %v6862_v10, 6 }
 0x17c   : > { %v1265_v53 = vsel %vm1206_vm7, %v1262_v43, %v9541_v24  ;;  %v1331_v18 = vsel %vm839_vm6, %v1263_v56, -3.4028235e+38  ;;  %v1425_v58 = vsel %vm1368_vm9, %v9542_v15, %v1424_v54  ;;  %v1427_v16 = vsel %vm1368_vm9, %v1424_v54, %v9544_v32 }
 0x17d   : > { %9543 = vst [vmem:[#allocation2_spill] sm:$0xff] %v6964_v0  ;;  %v1363_v46 = vmax.f32 %v6826_v38, %v1331_v18  ;;  %v1493_v43 = vsel %vm847_vm10, %v1425_v58, -3.4028235e+38  ;;  %v1076_v56 = vrot.slane %v6862_v10, 7  ;;  %v1236_v61 = vrot.slane %v6862_v10, 1  ;;  %5431 = vmatmul.mubr.msk.f32.gmra.mxu0 %vm3269_vm4, %v6214_v34 }
 0x17e   : > { %v1364_v24 = vmax.f32 %v1202_v11, %v1265_v53  ;;  %v1398_v40 = vrot.slane %v6862_v10, 2  ;;  %v9366_v38 = vrot.slane %v6869_v57, 6  ;;  %v9545_v54 = vrot.slane %v9534_v55, 6  ;;  %5433 = vmatprep.mubr.msk.f32.mxu0 %vm3269_vm4, %v6332_v36 }
 0x17f   : > { %v6975_v52 = vmax.f32 %v1363_v46, %v1493_v43  ;;  %v9546_v2 = vrot.slane %v9534_v55, 7  ;;  %v9547_v18 = vrot.slane %v9534_v55, 1  ;;  %v9365_v15 = vrot.slane %v6869_v57, 7 }
 0x180   : > { %v917_v33 = vsel %vm884_vm2, %v914_v39, %v9545_v54  ;;  %v6993_v58 = vmax.f32 %v1364_v24, %v1427_v16  ;;  %v9549_v43 = vrot.slane %v9534_v55, 2 }
 0x181   : > { %v1079_v37 = vsel %vm1046_vm3, %v1076_v56, %v9546_v2  ;;  %v1239_v53 = vsel %vm1206_vm7, %v1236_v61, %v9547_v18  ;;  %v996_v34 = vsel %vm820_vm5, %v917_v33, -3.4028235e+38  ;;  %v9550_v2 = vld [vmem:[#allocation6_spill] sm:$0xff]  ;;  %5434 = vmatmul.mubr.msk.f32.gmra.mxu0 %vm3269_vm4, %v6359_v60  ;;  %v9554_v60 = vld [vmem:[#allocation19_spill] sm:$0xff] }
 0x182   : > { %9548 = vst [vmem:[#allocation3_spill] sm:$0xff] %v6993_v58  ;;  %v1158_v11 = vsel %vm828_vm8, %v1079_v37, -3.4028235e+38  ;;  %v7001_v46 = vsel %vm839_vm6, %v1239_v53, -3.4028235e+38  ;;  %v1028_v32 = vmax.f32 %v9534_v55, %v996_v34  ;;  %v1401_v54 = vsel %vm1368_vm9, %v1398_v40, %v9549_v43  ;;  %5436 = vmatprep.mubr.msk.f32.mxu0 %vm3269_vm4, %v6448_v27 }
 0x183   : > { %v9551_v36 = vrot.slane %v9550_v2, 6  ;;  %v9552_v24 = vrot.slane %v9550_v2, 7  ;;  %v1558_v37 = vmax.f32 %v6993_v58, %v6762_v48  ;;  %v7021_v55 = vsel %vm847_vm10, %v1401_v54, -3.4028235e+38 }
 0x184   : > { %9553 = vst [vmem:[#allocation4_spill] sm:$0xff] %v7021_v55  ;;  %v7029_v34 = vmax.f32 %v1028_v32, %v1158_v11  ;;  %v912_v54 = vrot.slane %v6872_v23, 6  ;;  %v9557_v27 = vrot.slane %v6869_v57, 2 }
 0x185   : > { %v979_v16 = vsel %vm884_vm2, %v9366_v38, %v9551_v36  ;;  %v1141_v33 = vsel %vm1046_vm3, %v9365_v15, %v9552_v24  ;;  %v1268_v36 = vrot.slane %v6869_v57, 1  ;;  %v1396_v15 = vrot.slane %v6872_v23, 2  ;;  %5437 = vmatmul.mubr.msk.f32.gmra.mxu0 %vm3269_vm4, %v6362_v22 }
 0x186   : > { %v980_v18 = vsel %vm820_vm5, %v979_v16, -3.4028235e+38  ;;  %v1142_v53 = vsel %vm828_vm8, %v1141_v33, -3.4028235e+38  ;;  %v1074_v16 = vrot.slane %v6872_v23, 7  ;;  %v1234_v33 = vrot.slane %v6872_v23, 1  ;;  %5439 = vmatprep.mubr.msk.f32.mxu0 %vm3269_vm4, %v6681_v17 }
 0x187   : > { %v1012_v43 = vmax.f32 %v9550_v2, %v980_v18  ;;  %v9555_v18 = vrot.slane %v9550_v2, 1  ;;  %v9556_v24 = vrot.slane %v9550_v2, 2  ;;  %v9560_v22 = vrot.slane %v6746_v62, 1 }
 0x189   : > { %v7042_v32 = vmax.f32 %v1012_v43, %v1142_v53  ;;  %v1303_v38 = vsel %vm1206_vm7, %v1268_v36, %v9555_v18  ;;  %v1465_v55 = vsel %vm1368_vm9, %v9557_v27, %v9556_v24  ;;  %v9558_v53 = vrot.slane %v6746_v62, 6  ;;  %5440 = vmatmul.mubr.msk.f32.gmra.mxu0 %vm3269_vm4, %v6650_v7 }
 0x18a   : > { %v7054_v1 = vsel %vm839_vm6, %v1303_v38, -3.4028235e+38  ;;  %v7058_v0 = vsel %vm847_vm10, %v1465_v55, -3.4028235e+38  ;;  %v915_v18 = vsel %vm884_vm2, %v912_v54, %v914_v39  ;;  %v9559_v38 = vrot.slane %v6746_v62, 7  ;;  %5442 = vmatprep.mubr.msk.f32.mxu0 %vm3269_vm4, %v6743_v21 }
 0x18b   : > { %v913_v43 = vsel %vm884_vm2, %v9558_v53, %v912_v54  ;;  %v1027_v24 = vmax.f32 %v6862_v10, %v915_v18  ;;  %v1077_v55 = vsel %vm1046_vm3, %v1074_v16, %v1076_v56  ;;  %v1235_v54 = vsel %vm1206_vm7, %v9560_v22, %v1234_v33 }
 0x18c   : > { %v994_v2 = vsel %vm820_vm5, %v913_v43, -3.4028235e+38  ;;  %v1075_v27 = vsel %vm1046_vm3, %v9559_v38, %v1074_v16  ;;  %v1237_v10 = vsel %vm1206_vm7, %v1234_v33, %v1236_v61  ;;  %v1317_v18 = vsel %vm839_vm6, %v1235_v54, -3.4028235e+38 }
 0x18d   : > { %v1026_v53 = vmax.f32 %v6872_v23, %v994_v2  ;;  %v1156_v39 = vsel %vm828_vm8, %v1075_v27, -3.4028235e+38  ;;  %v7082_v43 = vmax.f32 %v1027_v24, %v1077_v55  ;;  %v9561_v56 = vrot.slane %v6746_v62, 2  ;;  %v9562_v27 = vld [vmem:[#allocation14_spill] sm:$0xff]  ;;  %5443 = vmatmul.mubr.msk.f32.gmra.mxu0 %vm3269_vm4, %v6734_v4 }
 0x18e   : > { %v1399_v23 = vsel %vm1368_vm9, %v1396_v15, %v1398_v40  ;;  %v1349_v2 = vmax.f32 %v6917_v13, %v1317_v18  ;;  %v813_v61 = vmul.f32 %v6795_v20, %v9562_v27  ;;  %v1556_v62 = vmax.f32 %v6866_v9, %v6665_v19  ;;  %5445 = vmatprep.mubr.msk.f32.mxu0 %vm3269_vm4, %v6859_v63 }
 0x18f   : > { %v1397_v17 = vsel %vm1368_vm9, %v9561_v56, %v1396_v15  ;;  %v1188_v16 = vmax.f32 %v1026_v53, %v1156_v39  ;;  %v1557_v40 = vmax.f32 %v6975_v52, %v6740_v31  ;;  %v7104_v13 = vmax.f32 %v1558_v37, %v6866_v9 }
 0x190   : > { %v1479_v38 = vsel %vm847_vm10, %v1397_v17, -3.4028235e+38  ;;  %v944_v24 = vrot.slane %v813_v61, 6  ;;  %v1106_v7 = vrot.slane %v813_v61, 7  ;;  %v1266_v55 = vrot.slane %v813_v61, 1 }
 0x191   : > { %v1350_v15 = vmax.f32 %v1188_v16, %v1237_v10  ;;  %v7108_v20 = vmax.f32 %v1349_v2, %v1479_v38  ;;  %v1428_v53 = vrot.slane %v813_v61, 2  ;;  %v1588_v39 = vmax.f32 %v1556_v62, %v6762_v48  ;;  %5446 = vmatmul.mubr.msk.f32.gmra.mxu0 %vm3269_vm4, %v6854_v3 }
 0x192   : > { %v1589_v22 = vmax.f32 %v1557_v40, %v6864_v41  ;;  %v9563_v18 = vrot.slane %v6854_v3, 6  ;;  %v9564_v56 = vrot.slane %v6869_v57, 6  ;;  %v9565_v10 = vrot.slane %v6854_v3, 7  ;;  %5448 = vmatprep.mubr.msk.f32.mxu0 %vm3269_vm4, %v813_v61 }
 0x193   : > { %v7112_v54 = vmax.f32 %v1350_v15, %v1399_v23  ;;  %v9566_v2 = vrot.slane %v6869_v57, 7  ;;  %v9567_v40 = vrot.slane %v6854_v3, 1  ;;  %v1269_v15 = vsel %vm1206_vm7, %v1266_v55, %v1268_v36 }
 0x194   : > { %v945_v37 = vsel %vm884_vm2, %v9563_v18, %v944_v24  ;;  %v946_v21 = vsel %vm884_vm2, %v944_v24, %v9564_v56  ;;  %v1107_v17 = vsel %vm1046_vm3, %v9565_v10, %v1106_v7  ;;  %v9568_v24 = vrot.slane %v6854_v3, 2 }
 0x195   : > { %v1010_v16 = vsel %vm820_vm5, %v945_v37, -3.4028235e+38  ;;  %v1043_v23 = vmax.f32 %v6869_v57, %v946_v21  ;;  %v1108_v38 = vsel %vm1046_vm3, %v1106_v7, %v9566_v2  ;;  %v1172_v27 = vsel %vm828_vm8, %v1107_v17, -3.4028235e+38  ;;  %5449 = vmatmul.mubr.msk.f32.gmra.mxu0 %vm3269_vm4, %v6869_v57 }
 0x196   : > { %v1042_v62 = vmax.f32 %v813_v61, %v1010_v16  ;;  %v1267_v4 = vsel %vm1206_vm7, %v9567_v40, %v1266_v55  ;;  %v1429_v18 = vsel %vm1368_vm9, %v9568_v24, %v1428_v53  ;;  %v9569_v56 = vrot.slane %v6869_v57, 2  ;;  %v9570_v55 = vld [vmem:[#allocation17_spill] sm:$0xff] }
 0x197   : > { %v1205_v37 = vmax.f32 %v1043_v23, %v1108_v38  ;;  %v1333_v7 = vsel %vm839_vm6, %v1267_v4, -3.4028235e+38  ;;  %v1495_v63 = vsel %vm847_vm10, %v1429_v18, -3.4028235e+38  ;;  %v1620_v36 = vmax.f32 %v1588_v39, %v6993_v58 }
 0x198   : > { %v1431_v21 = vsel %vm1368_vm9, %v1428_v53, %v9569_v56  ;;  %v1204_v10 = vmax.f32 %v1042_v62, %v1172_v27  ;;  %v1365_v17 = vmax.f32 %v6952_v51, %v1333_v7  ;;  %v1336_v16 = vmax.f32 %v7042_v32, %v9570_v55 }
 0x199   : > { %v1367_v23 = vmax.f32 %v1205_v37, %v7054_v1  ;;  %v9571_v53 = vmax.f32 %v6495_v29, %v6647_v14  ;;  %v9572_v51 = vmax.f32 %v6505_v30, %v6658_v49  ;;  %v9574_v1 = vld [vmem:[#allocation18_spill] sm:$0xff] }
 0x19a   : > { %v1366_v3 = vmax.f32 %v1204_v10, %v1269_v15  ;;  %v7171_v39 = vmax.f32 %v1365_v17, %v1495_v63  ;;  %v7174_v27 = vmax.f32 %v1336_v16, %v9574_v1 }
 0x19b   : > { %v7160_v2 = vmax.f32 %v9571_v53, %v6814_v35  ;;  %v7166_v38 = vmax.f32 %v9572_v51, %v6831_v45  ;;  %v1529_v62 = vmax.f32 %v1367_v23, %v7058_v0  ;;  %v9575_v0 = vmax.f32 %v6226_v59, -3.4028235e+38 }
 0x19c   : > { %9573 = vst [vmem:[#allocation5_spill] sm:$0xff] %v7171_v39  ;;  %v1528_v4 = vmax.f32 %v1366_v3, %v1431_v21  ;;  %v1559_v15 = vmax.f32 %v7171_v39, %v6864_v41  ;;  %v1621_v24 = vmax.f32 %v1589_v22, %v7171_v39  ;;  %v1530_v18 = vmax.f32 %v7174_v27, -3.4028235e+38 }
 0x19d   : > { %v1561_v37 = vmax.f32 %v1529_v62, %v6975_v52  ;;  %v7192_v7 = vmax.f32 %v9575_v0, %v7174_v27 }
 0x19e   : > { %v1560_v63 = vmax.f32 %v1528_v4, %v6866_v9  ;;  %v1591_v22 = vmax.f32 %v1559_v15, %v6975_v52  ;;  %v1622_v10 = vmax.f32 %v7104_v13, %v1528_v4  ;;  %v7200_v17 = vmax.f32 %v1620_v36, %v1528_v4 }
 0x19f   : > { %v1593_v57 = vmax.f32 %v1561_v37, %v7171_v39  ;;  %v7203_v55 = vmax.f32 %v1621_v24, %v1529_v62  ;;  %v1562_v16 = vmax.f32 %v1530_v18, -3.4028235e+38 }
 0x1a0   : > { %9576 = vst [vmem:[#allocation7_spill] sm:$0xff] %v7200_v17  ;;  %v1592_v53 = vmax.f32 %v1560_v63, %v6993_v58  ;;  %v1623_v51 = vmax.f32 %v1591_v22, %v1529_v62  ;;  %v7208_v3 = vmax.f32 %v1622_v10, -3.4028235e+38  ;;  %v9369_v1 = vrot.slane %v7200_v17, 6 }
 0x1a1   : > { %9577 = vst [vmem:[#allocation8_spill] sm:$0xff] %v7203_v55  ;;  %v1625_v15 = vmax.f32 %v1593_v57, -3.4028235e+38  ;;  %v1745_v13 = vrot.slane %v7203_v55, 6  ;;  %v9370_v36 = vrot.slane %v7200_v17, 7  ;;  %v1906_v4 = vrot.slane %v7203_v55, 7 }
 0x1a2   : > { %9578 = vst [vmem:[#allocation9_spill] sm:$0xff] %v7208_v3  ;;  %v1624_v24 = vmax.f32 %v1592_v53, -3.4028235e+38  ;;  %v7214_v37 = vmax.f32 %v1623_v51, -3.4028235e+38  ;;  %v1747_v18 = vrot.slane %v7208_v3, 6 }
 0x1a3   : > { %v1908_v0 = vrot.slane %v7208_v3, 7  ;;  %v7218_v63 = vmax.f32 %v1625_v15, -3.4028235e+38  ;;  %v1746_v62 = vsel %vm884_vm2, %v9369_v1, %v1745_v13  ;;  %v1907_v22 = vsel %vm1046_vm3, %v9370_v36, %v1906_v4 }
 0x1a4   : > { %v9371_v10 = vrot.slane %v7203_v55, 1  ;;  %v7227_v57 = vmax.f32 %v1624_v24, -3.4028235e+38  ;;  %v1748_v53 = vsel %vm884_vm2, %v1745_v13, %v1747_v18  ;;  %v1749_v51 = vrot.slane %v7214_v37, 6 }
 0x1a5   : > { %9579 = vst [vmem:[#allocation10_spill] sm:$0xff] %v7218_v63  ;;  %v1846_v11 = vmax.f32 %v7203_v55, %v1746_v62  ;;  %v1815_v15 = vsel %vm820_vm5, %v1748_v53, -3.4028235e+38  ;;  %v1909_v33 = vsel %vm1046_vm3, %v1906_v4, %v1908_v0  ;;  %v1910_v1 = vrot.slane %v7214_v37, 7 }
 0x1a6   : > { %v2067_v29 = vrot.slane %v7208_v3, 1  ;;  %v1750_v36 = vsel %vm884_vm2, %v1747_v18, %v1749_v51  ;;  %v1847_v24 = vmax.f32 %v7208_v3, %v1815_v15  ;;  %v1976_v13 = vsel %vm828_vm8, %v1909_v33, -3.4028235e+38 }
 0x1a7   : > { %v2007_v32 = vmax.f32 %v1846_v11, %v1907_v22  ;;  %v1848_v21 = vmax.f32 %v7214_v37, %v1750_v36  ;;  %v1911_v62 = vsel %vm1046_vm3, %v1908_v0, %v1910_v1  ;;  %v2069_v53 = vrot.slane %v7214_v37, 1 }
 0x1a8   : > { %v2068_v4 = vsel %vm1206_vm7, %v9371_v10, %v2067_v29  ;;  %v7247_v61 = vmax.f32 %v1847_v24, %v1976_v13  ;;  %v2071_v18 = vrot.slane %v7227_v57, 1  ;;  %v9373_v33 = vrot.slane %v7203_v55, 2 }
 0x1a9   : > { %v2136_v15 = vsel %vm839_vm6, %v2068_v4, -3.4028235e+38  ;;  %v7253_v11 = vmax.f32 %v1848_v21, %v1911_v62  ;;  %v7256_v36 = vsel %vm1206_vm7, %v2067_v29, %v2069_v53  ;;  %v9372_v22 = vrot.slane %v7208_v3, 2 }
 0x1aa   : > { %9580 = vst [vmem:[#allocation11_spill] sm:$0xff] %v7247_v61  ;;  %9581 = vst [vmem:[#allocation12_spill] sm:$0xff] %v7256_v36  ;;  %v2168_v0 = vmax.f32 %v2007_v32, %v2136_v15  ;;  %v7260_v10 = vsel %vm1206_vm7, %v2069_v53, %v2071_v18  ;;  %v1594_v32 = vmax.f32 %v1562_v16, %v6226_v59  ;;  %v1659_v21 = vrot.slane %v7218_v63, 6 }
 0x1ab   : > { %v2229_v29 = vsel %vm1368_vm9, %v9373_v33, %v9372_v22  ;;  %v1751_v62 = vrot.slane %v7227_v57, 6  ;;  %v1851_v15 = vrot.slane %v7218_v63, 7  ;;  %v1912_v24 = vrot.slane %v7227_v57, 7 }
 0x1ac   : > { %v2297_v53 = vsel %vm847_vm10, %v2229_v29, -3.4028235e+38  ;;  %v2073_v13 = vrot.slane %v7218_v63, 1  ;;  %v1626_v30 = vmax.f32 %v1594_v32, %v6339_v26  ;;  %v9588_v3 = vrot.slane %v6528_v50, 7 }
 0x1ad   : > { %v7279_v40 = vmax.f32 %v2168_v0, %v2297_v53  ;;  %v1752_v22 = vsel %vm884_vm2, %v1749_v51, %v1751_v62  ;;  %v1753_v16 = vsel %vm884_vm2, %v1751_v62, %v1659_v21  ;;  %v1913_v29 = vsel %vm1046_vm3, %v1910_v1, %v1912_v24 }
 0x1ae   : > { %v1817_v33 = vsel %vm820_vm5, %v1752_v22, -3.4028235e+38  ;;  %v1850_v56 = vmax.f32 %v7218_v63, %v1753_v16  ;;  %v1914_v23 = vsel %vm1046_vm3, %v1912_v24, %v1851_v15  ;;  %v1692_v4 = vrot.slane %v1626_v30, 6  ;;  %5353 = vmatprep.mubr.msk.f32.mxu1 %vm3269_vm4, %v1626_v30 }
 0x1af   : > { %9582 = vst [vmem:[#allocation13_spill] sm:$0xff] %v7279_v40  ;;  %v1849_v36 = vmax.f32 %v7227_v57, %v1817_v33  ;;  %v1853_v0 = vrot.slane %v1626_v30, 7  ;;  %v1978_v32 = vsel %vm828_vm8, %v1913_v29, -3.4028235e+38  ;;  %v2012_v62 = vrot.slane %v1626_v30, 1  ;;  %5354 = vmatmul.mubr.msk.f32.vlgmr.msra.gmra.mxu1 %vm3269_vm4, %v6528_v50 }
 0x1b0   : > { %v2011_v51 = vmax.f32 %v1850_v56, %v1914_v23  ;;  %v7294_v53 = vsel %vm1206_vm7, %v2071_v18, %v2073_v13  ;;  %v2173_v22 = vrot.slane %v1626_v30, 2  ;;  %v1786_v1 = vsel %vm884_vm2, %v1659_v21, %v1692_v4  ;;  %v5817_v56 = vld [vmem:[%s9319_s3 + $0x4] sm:$0x3] }
 0x1b1   : > { %9583 = vst [vmem:[#allocation15_spill] sm:$0xff] %v7294_v53  ;;  %v1947_v24 = vsel %vm1046_vm3, %v1851_v15, %v1853_v0  ;;  %v7300_v33 = vmax.f32 %v1849_v36, %v1978_v32  ;;  %v2234_v16 = vrot.slane %v7218_v63, 2  ;;  %5452 = vmatpush3.msk.msra.mxu1 %vm884_vm2, %v5817_v56  ;;  %v1787_v23 = vsel %vm820_vm5, %v1786_v1, -3.4028235e+38 }
 0x1b2   : > { %v1948_v18 = vsel %vm828_vm8, %v1947_v24, -3.4028235e+38  ;;  %v2108_v21 = vsel %vm1206_vm7, %v2073_v13, %v2012_v62  ;;  %v9585_v15 = vrot.slane %v6528_v50, 6  ;;  %v1819_v29 = vmax.f32 %v1626_v30, %v1787_v23 }
 0x1b3   : > { %9584 = vst [vmem:[#allocation16_spill] sm:$0xff] %v7300_v33  ;;  %v2140_v32 = vsel %vm839_vm6, %v2108_v21, -3.4028235e+38  ;;  %v9586_v56 = vrot.slane %v7227_v57, 2  ;;  %v2269_v24 = vsel %vm1368_vm9, %v2234_v16, %v2173_v22  ;;  %v1855_v30 = vsel %vm1046_vm3, %v1853_v0, %v9588_v3 }
 0x1b4   : > { %v1694_v36 = vsel %vm884_vm2, %v1692_v4, %v9585_v15  ;;  %v2172_v63 = vmax.f32 %v2011_v51, %v2140_v32  ;;  %v1980_v4 = vmax.f32 %v1819_v29, %v1948_v18  ;;  %v2301_v23 = vsel %vm847_vm10, %v2269_v24, -3.4028235e+38 }
 0x1b5   : > { %v7322_v1 = vsel %vm1368_vm9, %v9586_v56, %v2234_v16  ;;  %v1820_v13 = vmax.f32 %v6528_v50, %v1694_v36  ;;  %v9589_v21 = vrot.slane %v6528_v50, 1  ;;  %v9590_v56 = vrot.slane %v6528_v50, 2 }
 0x1b6   : > { %9587 = vst [vmem:[#allocation6_spill] sm:$0xff] %v7322_v1  ;;  %v7337_v32 = vmax.f32 %v2172_v63, %v2301_v23  ;;  %v9592_v36 = vmax.f32 %v7192_v7, %v6339_v26  ;;  %v9593_v0 = vmax.f32 %v6339_v26, %v7174_v27  ;;  %v9594_v26 = vrot.slane %v7160_v2, 6 }
 0x1b7   : > { %v2014_v15 = vsel %vm1206_vm7, %v2012_v62, %v9589_v21  ;;  %v2175_v51 = vsel %vm1368_vm9, %v2173_v22, %v9590_v56  ;;  %v1981_v16 = vmax.f32 %v1820_v13, %v1855_v30  ;;  %v9379_v62 = vrot.slane %v7166_v38, 6 }
 0x1b8   : > { %9591 = vst [vmem:[#allocation19_spill] sm:$0xff] %v7337_v32  ;;  %v1628_v3 = vmax.f32 %v9592_v36, %v6466_v25  ;;  %v1566_v18 = vmax.f32 %v9593_v0, %v6226_v59  ;;  %v2141_v29 = vmax.f32 %v1980_v4, %v2014_v15  ;;  %v9595_v4 = vrot.slane %v6528_v50, 6 }
 0x1b9   : > { %v1704_v27 = vsel %vm884_vm2, %v9594_v26, %v9379_v62  ;;  %v9596_v56 = vrot.slane %v6528_v50, 7  ;;  %v9597_v36 = vrot.slane %v6528_v50, 1  ;;  %v9599_v63 = vrot.slane %v6528_v50, 2 }
 0x1ba   : > { %v1695_v13 = vrot.slane %v1628_v3, 6  ;;  %v1856_v30 = vrot.slane %v1628_v3, 7  ;;  %v2015_v23 = vrot.slane %v1628_v3, 1  ;;  %5356 = vmatprep.mubr.msk.f32.mxu1 %vm3269_vm4, %v1628_v3  ;;  %v7353_v7 = vmax.f32 %v2141_v29, %v2175_v51 }
 0x1bb   : > { %v2176_v21 = vrot.slane %v1628_v3, 2  ;;  %5357 = vmatmul.mubr.msk.f32.gmra.mxu1 %vm3269_vm4, %v6656_v47  ;;  %v1598_v59 = vmax.f32 %v1566_v18, %v6466_v25  ;;  %v9598_v18 = vrot.slane %v6656_v47, 6 }
 0x1bc   : > { %v1696_v15 = vsel %vm884_vm2, %v9595_v4, %v1695_v13  ;;  %v1857_v51 = vsel %vm1046_vm3, %v9596_v56, %v1856_v30  ;;  %v2016_v0 = vsel %vm1206_vm7, %v9597_v36, %v2015_v23 }
 0x1bd   : > { %v1698_v29 = vsel %vm884_vm2, %v1695_v13, %v9598_v18  ;;  %v1789_v61 = vsel %vm820_vm5, %v1696_v15, -3.4028235e+38  ;;  %v1950_v26 = vsel %vm828_vm8, %v1857_v51, -3.4028235e+38  ;;  %v2110_v4 = vsel %vm839_vm6, %v2016_v0, -3.4028235e+38 }
 0x1be   : > { %v2177_v56 = vsel %vm1368_vm9, %v9599_v63, %v2176_v21  ;;  %v1821_v62 = vmax.f32 %v1628_v3, %v1789_v61  ;;  %v2142_v22 = vmax.f32 %v1981_v16, %v2110_v4  ;;  %v1822_v13 = vmax.f32 %v6656_v47, %v1698_v29 }
 0x1bf   : > { %v2271_v36 = vsel %vm847_vm10, %v2177_v56, -3.4028235e+38  ;;  %v9600_v18 = vrot.slane %v6656_v47, 7  ;;  %v9601_v51 = vrot.slane %v6656_v47, 1  ;;  %v9602_v0 = vrot.slane %v6656_v47, 2 }
 0x1c0   : > { %v1630_v61 = vmax.f32 %v1598_v59, %v6658_v49  ;;  %v1982_v16 = vmax.f32 %v1821_v62, %v1950_v26  ;;  %v7397_v3 = vmax.f32 %v2142_v22, %v2271_v36  ;;  %v1793_v29 = vsel %vm820_vm5, %v1704_v27, -3.4028235e+38 }
 0x1c1   : > { %v1859_v15 = vsel %vm1046_vm3, %v1856_v30, %v9600_v18  ;;  %v2018_v24 = vsel %vm1206_vm7, %v2015_v23, %v9601_v51  ;;  %v2179_v50 = vsel %vm1368_vm9, %v2176_v21, %v9602_v0  ;;  %v1825_v21 = vmax.f32 %v7166_v38, %v1793_v29 }
 0x1c2   : > { %v1983_v63 = vmax.f32 %v1822_v13, %v1859_v15  ;;  %v1699_v4 = vrot.slane %v1630_v61, 6  ;;  %v1860_v56 = vrot.slane %v1630_v61, 7  ;;  %v2019_v30 = vrot.slane %v1630_v61, 1  ;;  %5359 = vmatprep.mubr.msk.f32.mxu1 %vm3269_vm4, %v1630_v61 }
 0x1c3   : > { %v2180_v18 = vrot.slane %v1630_v61, 2  ;;  %v2143_v23 = vmax.f32 %v1982_v16, %v2018_v24  ;;  %5360 = vmatmul.mubr.msk.f32.gmra.mxu1 %vm3269_vm4, %v7160_v2  ;;  %v9603_v62 = vrot.slane %v7166_v38, 7  ;;  %v9604_v22 = vrot.slane %v7160_v2, 7 }
 0x1c4   : > { %v9605_v27 = vrot.slane %v7166_v38, 1  ;;  %v9606_v26 = vrot.slane %v7160_v2, 1  ;;  %v9607_v13 = vrot.slane %v6656_v47, 6  ;;  %v9608_v15 = vrot.slane %v6656_v47, 7  ;;  %5362 = vmatprep.mubr.msk.f32.mxu1 %vm3269_vm4, %v7166_v38 }
 0x1c5   : > { %v1865_v59 = vsel %vm1046_vm3, %v9604_v22, %v9603_v62  ;;  %v9609_v0 = vrot.slane %v6656_v47, 1  ;;  %v9610_v29 = vrot.slane %v6656_v47, 2  ;;  %v7429_v22 = vmax.f32 %v2143_v23, %v2179_v50 }
 0x1c6   : > { %v2024_v36 = vsel %vm1206_vm7, %v9606_v26, %v9605_v27  ;;  %v1700_v24 = vsel %vm884_vm2, %v9607_v13, %v1699_v4  ;;  %v1861_v51 = vsel %vm1046_vm3, %v9608_v15, %v1860_v56  ;;  %v9612_v23 = vrot.slane %v7160_v2, 7 }
 0x1c7   : > { %v2020_v16 = vsel %vm1206_vm7, %v9609_v0, %v2019_v30  ;;  %v2181_v62 = vsel %vm1368_vm9, %v9610_v29, %v2180_v18  ;;  %v1791_v27 = vsel %vm820_vm5, %v1700_v24, -3.4028235e+38  ;;  %v1952_v26 = vsel %vm828_vm8, %v1861_v51, -3.4028235e+38 }
 0x1c8   : > { %v2112_v13 = vsel %vm839_vm6, %v2020_v16, -3.4028235e+38  ;;  %v1823_v15 = vmax.f32 %v1630_v61, %v1791_v27  ;;  %v2273_v47 = vsel %vm847_vm10, %v2181_v62, -3.4028235e+38  ;;  %v9611_v29 = vrot.slane %v7160_v2, 6 }
 0x1c9   : > { %v2144_v0 = vmax.f32 %v1983_v63, %v2112_v13  ;;  %v1863_v24 = vsel %vm1046_vm3, %v1860_v56, %v9612_v23  ;;  %v9613_v51 = vrot.slane %v7160_v2, 1  ;;  %v9614_v61 = vrot.slane %v7160_v2, 2 }
 0x1ca   : > { %v1702_v53 = vsel %vm884_vm2, %v1699_v4, %v9611_v29  ;;  %v1984_v16 = vmax.f32 %v1823_v15, %v1952_v26  ;;  %v1954_v4 = vsel %vm828_vm8, %v1865_v59, -3.4028235e+38  ;;  %v2184_v56 = vrot.slane %v7166_v38, 2  ;;  %v9618_v59 = vld [vmem:[#allocation21_spill] sm:$0xff] }
 0x1cb   : > { %v1824_v50 = vmax.f32 %v7160_v2, %v1702_v53  ;;  %v2022_v33 = vsel %vm1206_vm7, %v2019_v30, %v9613_v51  ;;  %v2183_v63 = vsel %vm1368_vm9, %v2180_v18, %v9614_v61  ;;  %v7452_v62 = vmax.f32 %v2144_v0, %v2273_v47  ;;  %v9616_v18 = vld [vmem:[#allocation2_spill] sm:$0xff] }
 0x1cc   : > { %v2114_v53 = vsel %vm839_vm6, %v2024_v36, -3.4028235e+38  ;;  %v1986_v13 = vmax.f32 %v1825_v21, %v1954_v4  ;;  %v9615_v30 = vmax.f32 %v6672_v12, %v6814_v35  ;;  %v2145_v23 = vmax.f32 %v1984_v16, %v2022_v33 }
 0x1cd   : > { %v1985_v27 = vmax.f32 %v1824_v50, %v1863_v24  ;;  %v9617_v26 = vmax.f32 %v6684_v28, %v6831_v45  ;;  %v1539_v0 = vmax.f32 %v6814_v35, %v9618_v59  ;;  %v1540_v21 = vmax.f32 %v6831_v45, %v6466_v25 }
 0x1ce   : > { %v1633_v29 = vmax.f32 %v9615_v30, %v6936_v42  ;;  %v9619_v47 = vmov %v9614_v61  ;;  %v7477_v33 = vmax.f32 %v2145_v23, %v2183_v63  ;;  %v9620_v2 = vrot.slane %v7166_v38, 6 }
 0x1cf   : > { %v7467_v15 = vmax.f32 %v9617_v26, %v9616_v18  ;;  %v2146_v36 = vmax.f32 %v1985_v27, %v2114_v53  ;;  %v2185_v50 = vsel %vm1368_vm9, %v9619_v47, %v2184_v56  ;;  %v9621_v4 = vrot.slane %v7166_v38, 7 }
 0x1d0   : > { %v1705_v12 = vrot.slane %v1633_v29, 6  ;;  %v1866_v24 = vrot.slane %v1633_v29, 7  ;;  %5363 = vmatmul.mubr.msk.f32.gmra.mxu1 %vm3269_vm4, %v1633_v29  ;;  %v2275_v28 = vsel %vm847_vm10, %v2185_v50, -3.4028235e+38  ;;  %v2025_v51 = vrot.slane %v1633_v29, 1 }
 0x1d1   : > { %v2186_v61 = vrot.slane %v1633_v29, 2  ;;  %5365 = vmatprep.mubr.msk.f32.mxu1 %vm3269_vm4, %v7467_v15  ;;  %v7483_v25 = vmax.f32 %v2146_v36, %v2275_v28  ;;  %v1707_v63 = vrot.slane %v7467_v15, 6  ;;  %v9622_v30 = vrot.slane %v7166_v38, 1 }
 0x1d2   : > { %v1706_v16 = vsel %vm884_vm2, %v9620_v2, %v1705_v12  ;;  %v1867_v53 = vsel %vm1046_vm3, %v9621_v4, %v1866_v24  ;;  %v1868_v59 = vrot.slane %v7467_v15, 7  ;;  %v2027_v50 = vrot.slane %v7467_v15, 1 }
 0x1d3   : > { %v1826_v27 = vmax.f32 %v1633_v29, %v1706_v16  ;;  %v2026_v23 = vsel %vm1206_vm7, %v9622_v30, %v2025_v51  ;;  %v2187_v26 = vsel %vm1368_vm9, %v2184_v56, %v2186_v61  ;;  %v1708_v47 = vsel %vm884_vm2, %v1705_v12, %v1707_v63 }
 0x1d4   : > { %v2147_v36 = vmax.f32 %v1986_v13, %v2026_v23  ;;  %v2188_v28 = vrot.slane %v7467_v15, 2  ;;  %v1795_v4 = vsel %vm820_vm5, %v1708_v47, -3.4028235e+38  ;;  %v1869_v29 = vsel %vm1046_vm3, %v1866_v24, %v1868_v59  ;;  %v9623_v47 = vld [vmem:[#allocation4_spill] sm:$0xff] }
 0x1d5   : > { %v1987_v2 = vmax.f32 %v1826_v27, %v1867_v53  ;;  %v1571_v38 = vmax.f32 %v1539_v0, %v6647_v14  ;;  %v1827_v56 = vmax.f32 %v7467_v15, %v1795_v4  ;;  %v1956_v13 = vsel %vm828_vm8, %v1869_v29, -3.4028235e+38 }
 0x1d6   : > { %v7504_v16 = vmax.f32 %v2147_v36, %v2187_v26  ;;  %v2028_v12 = vsel %vm1206_vm7, %v2025_v51, %v2027_v50  ;;  %v2189_v53 = vsel %vm1368_vm9, %v2186_v61, %v2188_v28  ;;  %v1572_v24 = vmax.f32 %v1540_v21, %v6658_v49 }
 0x1d7   : > { %v2116_v30 = vsel %vm839_vm6, %v2028_v12, -3.4028235e+38  ;;  %v1603_v27 = vmax.f32 %v1571_v38, %v6936_v42  ;;  %v1988_v23 = vmax.f32 %v1827_v56, %v1956_v13  ;;  %v2277_v15 = vsel %vm847_vm10, %v2189_v53, -3.4028235e+38  ;;  %v9625_v38 = vld [vmem:[#allocation20_spill] sm:$0xff] }
 0x1d8   : > { %v2340_v0 = vmax.f32 %v7504_v16, %v7429_v22  ;;  %v2148_v26 = vmax.f32 %v1987_v2, %v2116_v30  ;;  %v1604_v51 = vmax.f32 %v1572_v24, %v9616_v18  ;;  %v9624_v61 = vmax.f32 %v7082_v43, %v7001_v46 }
 0x1d9   : > { %v1635_v36 = vmax.f32 %v1603_v27, %v7108_v20  ;;  %v1541_v21 = vmax.f32 %v6936_v42, %v6647_v14  ;;  %v9626_v56 = vmax.f32 %v7029_v34, %v9554_v60  ;;  %v1542_v12 = vmax.f32 %v9616_v18, %v6658_v49 }
 0x1da   : > { %v7525_v4 = vmax.f32 %v9624_v61, %v9623_v47  ;;  %v7529_v29 = vmax.f32 %v2148_v26, %v2277_v15  ;;  %v7532_v2 = vmax.f32 %v2340_v0, %v7477_v33  ;;  %v1636_v14 = vmax.f32 %v1604_v51, %v7112_v54 }
 0x1db   : > { %v7538_v13 = vmax.f32 %v9626_v56, %v9625_v38  ;;  %v1709_v46 = vrot.slane %v1635_v36, 6  ;;  %v1870_v43 = vrot.slane %v1635_v36, 7  ;;  %v2029_v30 = vrot.slane %v1635_v36, 1  ;;  %5366 = vmatmul.mubr.msk.f32.gmra.mxu1 %vm3269_vm4, %v1635_v36 }
 0x1dc   : > { %v2190_v53 = vrot.slane %v1635_v36, 2  ;;  %v1573_v27 = vmax.f32 %v1541_v21, %v6814_v35  ;;  %v1574_v24 = vmax.f32 %v1542_v12, %v6831_v45  ;;  %v1543_v34 = vmax.f32 %v7108_v20, %v6814_v35  ;;  %5368 = vmatprep.mubr.msk.f32.mxu1 %vm3269_vm4, %v1636_v14 }
 0x1dd   : > { %v1710_v60 = vsel %vm884_vm2, %v1707_v63, %v1709_v46  ;;  %v1871_v0 = vsel %vm1046_vm3, %v1868_v59, %v1870_v43  ;;  %v2030_v49 = vsel %vm1206_vm7, %v2027_v50, %v2029_v30  ;;  %v1711_v61 = vrot.slane %v1636_v14, 6 }
 0x1de   : > { %v2191_v26 = vsel %vm1368_vm9, %v2188_v28, %v2190_v53  ;;  %v1828_v15 = vmax.f32 %v1635_v36, %v1710_v60  ;;  %v2149_v47 = vmax.f32 %v1988_v23, %v2030_v49  ;;  %v1872_v38 = vrot.slane %v1636_v14, 7 }
 0x1df   : > { %v2031_v51 = vrot.slane %v1636_v14, 1  ;;  %v2192_v21 = vrot.slane %v1636_v14, 2  ;;  %v1605_v56 = vmax.f32 %v1573_v27, %v7108_v20  ;;  %v1606_v35 = vmax.f32 %v1574_v24, %v7112_v54 }
 0x1e0   : > { %v1989_v12 = vmax.f32 %v1828_v15, %v1871_v0  ;;  %v7555_v63 = vmax.f32 %v2149_v47, %v2191_v26  ;;  %v1712_v59 = vsel %vm884_vm2, %v1709_v46, %v1711_v61  ;;  %v1873_v50 = vsel %vm1046_vm3, %v1870_v43, %v1872_v38 }
 0x1e1   : > { %v1797_v28 = vsel %vm820_vm5, %v1712_v59, -3.4028235e+38  ;;  %v1958_v23 = vsel %vm828_vm8, %v1873_v50, -3.4028235e+38  ;;  %v2032_v36 = vsel %vm1206_vm7, %v2029_v30, %v2031_v51  ;;  %v2193_v60 = vsel %vm1368_vm9, %v2190_v53, %v2192_v21 }
 0x1e2   : > { %v1829_v24 = vmax.f32 %v1636_v14, %v1797_v28  ;;  %v2118_v0 = vsel %vm839_vm6, %v2032_v36, -3.4028235e+38  ;;  %v2279_v46 = vsel %vm847_vm10, %v2193_v60, -3.4028235e+38  ;;  %v1637_v49 = vmax.f32 %v1605_v56, %v7525_v4 }
 0x1e3   : > { %v2150_v43 = vmax.f32 %v1989_v12, %v2118_v0  ;;  %v1638_v26 = vmax.f32 %v1606_v35, %v7538_v13  ;;  %v1575_v15 = vmax.f32 %v1543_v34, %v6936_v42  ;;  %v1544_v53 = vmax.f32 %v7112_v54, %v6831_v45 }
 0x1e4   : > { %v1990_v30 = vmax.f32 %v1829_v24, %v1958_v23  ;;  %v1545_v14 = vmax.f32 %v7525_v4, %v6936_v42  ;;  %v1546_v47 = vmax.f32 %v7538_v13, %v9616_v18  ;;  %v1713_v50 = vrot.slane %v1637_v49, 6  ;;  %5369 = vmatmul.mubr.msk.f32.gmra.mxu1 %vm3269_vm4, %v1637_v49 }
 0x1e5   : > { %v7580_v59 = vmax.f32 %v2150_v43, %v2279_v46  ;;  %v1874_v12 = vrot.slane %v1637_v49, 7  ;;  %v2033_v28 = vrot.slane %v1637_v49, 1  ;;  %v2194_v56 = vrot.slane %v1637_v49, 2  ;;  %5371 = vmatprep.mubr.msk.f32.mxu1 %vm3269_vm4, %v1638_v26 }
 0x1e6   : > { %v1715_v35 = vrot.slane %v1638_v26, 6  ;;  %v1876_v34 = vrot.slane %v1638_v26, 7  ;;  %v2035_v23 = vrot.slane %v1638_v26, 1  ;;  %v1714_v45 = vsel %vm884_vm2, %v1711_v61, %v1713_v50 }
 0x1e7   : > { %v1875_v42 = vsel %vm1046_vm3, %v1872_v38, %v1874_v12  ;;  %v2034_v36 = vsel %vm1206_vm7, %v2031_v51, %v2033_v28  ;;  %v2196_v60 = vrot.slane %v1638_v26, 2  ;;  %v1830_v24 = vmax.f32 %v1637_v49, %v1714_v45 }
 0x1e8   : > { %v2151_v0 = vmax.f32 %v1990_v30, %v2034_v36  ;;  %v2195_v46 = vsel %vm1368_vm9, %v2192_v21, %v2194_v56  ;;  %v1716_v43 = vsel %vm884_vm2, %v1713_v50, %v1715_v35  ;;  %v1877_v1 = vsel %vm1046_vm3, %v1874_v12, %v1876_v34  ;;  %v9628_v36 = vld [vmem:[#allocation23_spill] sm:$0xff] }
 0x1e9   : > { %v1799_v27 = vsel %vm820_vm5, %v1716_v43, -3.4028235e+38  ;;  %v2036_v39 = vsel %vm1206_vm7, %v2033_v28, %v2035_v23  ;;  %v2197_v61 = vsel %vm1368_vm9, %v2194_v56, %v2196_v60  ;;  %v1991_v55 = vmax.f32 %v1830_v24, %v1875_v42 }
 0x1ea   : > { %v7594_v38 = vmax.f32 %v2151_v0, %v2195_v46  ;;  %v1831_v51 = vmax.f32 %v1638_v26, %v1799_v27  ;;  %v1960_v49 = vsel %vm828_vm8, %v1877_v1, -3.4028235e+38  ;;  %v2120_v21 = vsel %vm839_vm6, %v2036_v39, -3.4028235e+38  ;;  %v9627_v27 = vld [vmem:[#allocation22_spill] sm:$0xff] }
 0x1eb   : > { %v2281_v30 = vsel %vm847_vm10, %v2197_v61, -3.4028235e+38  ;;  %v1607_v50 = vmax.f32 %v1575_v15, %v7525_v4  ;;  %v1576_v12 = vmax.f32 %v1544_v53, %v9616_v18  ;;  %v2152_v45 = vmax.f32 %v1991_v55, %v2120_v21  ;;  %v9629_v15 = vld [vmem:[#allocation24_spill] sm:$0xff] }
 0x1ec   : > { %v1992_v28 = vmax.f32 %v1831_v51, %v1960_v49  ;;  %v1577_v56 = vmax.f32 %v1545_v14, %v7108_v20  ;;  %v1578_v42 = vmax.f32 %v1546_v47, %v7112_v54  ;;  %v1547_v39 = vmax.f32 %v9627_v27, %v7108_v20  ;;  %v9630_v51 = vld [vmem:[#allocation25_spill] sm:$0xff] }
 0x1ed   : > { %v1639_v26 = vmax.f32 %v1607_v50, %v9627_v27  ;;  %v1608_v1 = vmax.f32 %v1576_v12, %v7538_v13  ;;  %v7612_v0 = vmax.f32 %v2152_v45, %v2281_v30 }
 0x1ee   : > { %v1609_v18 = vmax.f32 %v1577_v56, %v9627_v27  ;;  %v1610_v55 = vmax.f32 %v1578_v42, %v9628_v36  ;;  %v1579_v21 = vmax.f32 %v1547_v39, %v7525_v4 }
 0x1ef   : > { %v1717_v14 = vrot.slane %v1639_v26, 6  ;;  %v1878_v47 = vrot.slane %v1639_v26, 7  ;;  %v2037_v46 = vrot.slane %v1639_v26, 1  ;;  %v2198_v43 = vrot.slane %v1639_v26, 2  ;;  %5372 = vmatmul.mubr.msk.f32.gmra.mxu1 %vm3269_vm4, %v1639_v26 }
 0x1f0   : > { %v1640_v20 = vmax.f32 %v1608_v1, %v9628_v36  ;;  %v1641_v61 = vmax.f32 %v1609_v18, %v9629_v15  ;;  %v7622_v49 = vmax.f32 %v1610_v55, %v9630_v51 }
 0x1f1   : > { %v1718_v30 = vsel %vm884_vm2, %v1715_v35, %v1717_v14  ;;  %v1879_v50 = vsel %vm1046_vm3, %v1876_v34, %v1878_v47  ;;  %v2038_v12 = vsel %vm1206_vm7, %v2035_v23, %v2037_v46  ;;  %v2199_v45 = vsel %vm1368_vm9, %v2196_v60, %v2198_v43 }
 0x1f2   : > { %v1832_v56 = vmax.f32 %v1639_v26, %v1718_v30  ;;  %v2153_v42 = vmax.f32 %v1992_v28, %v2038_v12  ;;  %v1719_v53 = vrot.slane %v1640_v20, 6  ;;  %v1880_v24 = vrot.slane %v1640_v20, 7  ;;  %5374 = vmatprep.mubr.msk.f32.mxu1 %vm3269_vm4, %v1640_v20 }
 0x1f3   : > { %v2039_v1 = vrot.slane %v1640_v20, 1  ;;  %v2200_v18 = vrot.slane %v1640_v20, 2  ;;  %v1721_v55 = vrot.slane %v1641_v61, 6  ;;  %v1882_v17 = vrot.slane %v1641_v61, 7  ;;  %5375 = vmatmul.mubr.msk.f32.gmra.mxu1 %vm3269_vm4, %v1641_v61 }
 0x1f4   : > { %v1993_v39 = vmax.f32 %v1832_v56, %v1879_v50  ;;  %v7631_v35 = vmax.f32 %v2153_v42, %v2199_v45  ;;  %v1720_v34 = vsel %vm884_vm2, %v1717_v14, %v1719_v53  ;;  %v1881_v23 = vsel %vm1046_vm3, %v1878_v47, %v1880_v24  ;;  %5377 = vmatprep.mubr.msk.f32.mxu1 %vm3269_vm4, %v7622_v49 }
 0x1f5   : > { %v1801_v60 = vsel %vm820_vm5, %v1720_v34, -3.4028235e+38  ;;  %v1962_v28 = vsel %vm828_vm8, %v1881_v23, -3.4028235e+38  ;;  %v2040_v26 = vsel %vm1206_vm7, %v2037_v46, %v2039_v1  ;;  %v2201_v30 = vsel %vm1368_vm9, %v2198_v43, %v2200_v18 }
 0x1f6   : > { %9631 = vst [vmem:[#allocation14_spill] sm:$0xff] %v7631_v35  ;;  %v1833_v50 = vmax.f32 %v1640_v20, %v1801_v60  ;;  %v2122_v12 = vsel %vm839_vm6, %v2040_v26, -3.4028235e+38  ;;  %v2283_v14 = vsel %vm847_vm10, %v2201_v30, -3.4028235e+38  ;;  %v1722_v47 = vsel %vm884_vm2, %v1719_v53, %v1721_v55 }
 0x1f7   : > { %v2154_v45 = vmax.f32 %v1993_v39, %v2122_v12  ;;  %v1834_v56 = vmax.f32 %v1641_v61, %v1722_v47  ;;  %v1883_v42 = vsel %vm1046_vm3, %v1880_v24, %v1882_v17  ;;  %v2041_v34 = vrot.slane %v1641_v61, 1 }
 0x1f8   : > { %v1994_v35 = vmax.f32 %v1833_v50, %v1962_v28  ;;  %v2202_v23 = vrot.slane %v1641_v61, 2  ;;  %v1723_v46 = vrot.slane %v7622_v49, 6  ;;  %v1884_v43 = vrot.slane %v7622_v49, 7 }
 0x1f9   : > { %v7651_v20 = vmax.f32 %v2154_v45, %v2283_v14  ;;  %v1995_v60 = vmax.f32 %v1834_v56, %v1883_v42  ;;  %v2042_v26 = vsel %vm1206_vm7, %v2039_v1, %v2041_v34  ;;  %v2043_v30 = vrot.slane %v7622_v49, 1 }
 0x1fa   : > { %v2155_v58 = vmax.f32 %v1994_v35, %v2042_v26  ;;  %v2203_v53 = vsel %vm1368_vm9, %v2200_v18, %v2202_v23  ;;  %v1724_v39 = vsel %vm884_vm2, %v1721_v55, %v1723_v46  ;;  %v1885_v24 = vsel %vm1046_vm3, %v1882_v17, %v1884_v43 }
 0x1fb   : > { %v1803_v61 = vsel %vm820_vm5, %v1724_v39, -3.4028235e+38  ;;  %v1964_v28 = vsel %vm828_vm8, %v1885_v24, -3.4028235e+38  ;;  %v2044_v50 = vsel %vm1206_vm7, %v2041_v34, %v2043_v30  ;;  %v2204_v12 = vrot.slane %v7622_v49, 2  ;;  %v9634_v34 = vld [vmem:[#allocation26_spill] sm:$0xff] }
 0x1fc   : > { %v7664_v1 = vmax.f32 %v2155_v58, %v2203_v53  ;;  %v1835_v35 = vmax.f32 %v7622_v49, %v1803_v61  ;;  %v2124_v18 = vsel %vm839_vm6, %v2044_v50, -3.4028235e+38  ;;  %v1611_v55 = vmax.f32 %v1579_v21, %v9629_v15 }
 0x1fd   : > { %v2156_v17 = vmax.f32 %v1995_v60, %v2124_v18  ;;  %v2205_v14 = vsel %vm1368_vm9, %v2202_v23, %v2204_v12  ;;  %v9632_v47 = vmax.f32 %v9628_v36, %v7112_v54  ;;  %v9633_v58 = vmax.f32 %v9629_v15, %v7525_v4 }
 0x1fe   : > { %v1996_v42 = vmax.f32 %v1835_v35, %v1964_v28  ;;  %v2285_v49 = vsel %vm847_vm10, %v2205_v14, -3.4028235e+38  ;;  %v1643_v26 = vmax.f32 %v1611_v55, %v9634_v34  ;;  %v1550_v21 = vmax.f32 %v9630_v51, %v7538_v13 }
 0x1ff   : > { %v1580_v45 = vmax.f32 %v9632_v47, %v7538_v13  ;;  %v1581_v56 = vmax.f32 %v9633_v58, %v9627_v27  ;;  %v7684_v23 = vmax.f32 %v2156_v17, %v2285_v49  ;;  %v1551_v53 = vmax.f32 %v9634_v34, %v9627_v27 }
 0x200   : > { %v1725_v4 = vrot.slane %v1643_v26, 6  ;;  %v1886_v39 = vrot.slane %v1643_v26, 7  ;;  %v2045_v24 = vrot.slane %v1643_v26, 1  ;;  %v2206_v61 = vrot.slane %v1643_v26, 2  ;;  %5378 = vmatmul.mubr.msk.f32.gmra.mxu1 %vm3269_vm4, %v1643_v26 }
 0x201   : > { %v1612_v60 = vmax.f32 %v1580_v45, %v9630_v51  ;;  %v1613_v54 = vmax.f32 %v1581_v56, %v9634_v34  ;;  %v1582_v13 = vmax.f32 %v1550_v21, %v9628_v36  ;;  %v1583_v35 = vmax.f32 %v1551_v53, %v9629_v15 }
 0x202   : > { %v1726_v18 = vsel %vm884_vm2, %v1723_v46, %v1725_v4  ;;  %v1887_v55 = vsel %vm1046_vm3, %v1884_v43, %v1886_v39  ;;  %v2046_v27 = vsel %vm1206_vm7, %v2043_v30, %v2045_v24  ;;  %v2207_v17 = vsel %vm1368_vm9, %v2204_v12, %v2206_v61 }
 0x203   : > { %v1644_v28 = vmax.f32 %v1612_v60, %v6665_v19  ;;  %v7693_v50 = vmax.f32 %v1613_v54, %v6740_v31  ;;  %v1836_v14 = vmax.f32 %v1643_v26, %v1726_v18  ;;  %v2157_v47 = vmax.f32 %v1996_v42, %v2046_v27 }
 0x205   : > { %v1727_v45 = vrot.slane %v1644_v28, 6  ;;  %v1888_v58 = vrot.slane %v1644_v28, 7  ;;  %5380 = vmatprep.mubr.msk.f32.mxu1 %vm3269_vm4, %v1644_v28  ;;  %v2047_v56 = vrot.slane %v1644_v28, 1  ;;  %v2208_v49 = vrot.slane %v1644_v28, 2 }
 0x206   : > { %v1729_v21 = vrot.slane %v7693_v50, 6  ;;  %v1890_v60 = vrot.slane %v7693_v50, 7  ;;  %5381 = vmatmul.mubr.msk.f32.gmra.mxu1 %vm3269_vm4, %v7693_v50  ;;  %v1997_v46 = vmax.f32 %v1836_v14, %v1887_v55  ;;  %v7706_v43 = vmax.f32 %v2157_v47, %v2207_v17 }
 0x207   : > { %v1728_v30 = vsel %vm884_vm2, %v1725_v4, %v1727_v45  ;;  %v1889_v12 = vsel %vm1046_vm3, %v1886_v39, %v1888_v58  ;;  %v2048_v54 = vsel %vm1206_vm7, %v2045_v24, %v2047_v56  ;;  %v2209_v53 = vsel %vm1368_vm9, %v2206_v61, %v2208_v49 }
 0x208   : > { %9635 = vst [vmem:[#allocation17_spill] sm:$0xff] %v7706_v43  ;;  %v1805_v42 = vsel %vm820_vm5, %v1728_v30, -3.4028235e+38  ;;  %v1966_v26 = vsel %vm828_vm8, %v1889_v12, -3.4028235e+38  ;;  %v1730_v4 = vsel %vm884_vm2, %v1727_v45, %v1729_v21  ;;  %v1891_v14 = vsel %vm1046_vm3, %v1888_v58, %v1890_v60 }
 0x209   : > { %v1837_v18 = vmax.f32 %v1644_v28, %v1805_v42  ;;  %v2126_v55 = vsel %vm839_vm6, %v2048_v54, -3.4028235e+38  ;;  %v2287_v27 = vsel %vm847_vm10, %v2209_v53, -3.4028235e+38  ;;  %v1838_v17 = vmax.f32 %v7693_v50, %v1730_v4 }
 0x20a   : > { %v2158_v39 = vmax.f32 %v1997_v46, %v2126_v55  ;;  %v2049_v47 = vrot.slane %v7693_v50, 1  ;;  %v2210_v24 = vrot.slane %v7693_v50, 2  ;;  %v1614_v61 = vmax.f32 %v1582_v13, %v6665_v19 }
 0x20b   : > { %v1998_v30 = vmax.f32 %v1837_v18, %v1966_v26  ;;  %v1615_v28 = vmax.f32 %v1583_v35, %v6740_v31  ;;  %v1999_v42 = vmax.f32 %v1838_v17, %v1891_v14  ;;  %v2138_v45 = vsel %vm839_vm6, %v7260_v10, -3.4028235e+38 }
 0x20c   : > { %v7727_v12 = vmax.f32 %v2158_v39, %v2287_v27  ;;  %v2050_v54 = vsel %vm1206_vm7, %v2047_v56, %v2049_v47  ;;  %v2211_v58 = vsel %vm1368_vm9, %v2208_v49, %v2210_v24  ;;  %v1646_v26 = vmax.f32 %v1614_v61, %v6762_v48 }
 0x20d   : > { %v2159_v46 = vmax.f32 %v1998_v30, %v2050_v54  ;;  %v7736_v50 = vmax.f32 %v1615_v28, %v6864_v41  ;;  %v2170_v13 = vmax.f32 %v7253_v11, %v2138_v45  ;;  %v9637_v35 = vrot.slane %v7227_v57, 2 }
 0x20e   : > { %9636 = vst [vmem:[#allocation18_spill] sm:$0xff] %v7727_v12  ;;  %v9638_v53 = vrot.slane %v7214_v37, 2  ;;  %v2334_v18 = vmax.f32 %v7353_v7, -3.4028235e+38  ;;  %v2335_v10 = vmax.f32 %v7397_v3, -3.4028235e+38  ;;  %5383 = vmatprep.mubr.msk.f32.mxu1 %vm3269_vm4, %v1646_v26 }
 0x20f   : > { %v7746_v55 = vmax.f32 %v2159_v46, %v2211_v58  ;;  %v1731_v49 = vrot.slane %v1646_v26, 6  ;;  %v1892_v27 = vrot.slane %v1646_v26, 7  ;;  %v2051_v4 = vrot.slane %v1646_v26, 1  ;;  %5384 = vmatmul.mubr.msk.f32.gmra.mxu1 %vm3269_vm4, %v7736_v50 }
 0x210   : > { %v2233_v56 = vsel %vm1368_vm9, %v9638_v53, %v9637_v35  ;;  %v2212_v39 = vrot.slane %v1646_v26, 2  ;;  %v9391_v11 = vrot.slane %v7736_v50, 6  ;;  %v9390_v17 = vrot.slane %v7736_v50, 7 }
 0x211   : > { %9639 = vst [vmem:[#allocation2_spill] sm:$0xff] %v7746_v55  ;;  %v1732_v30 = vsel %vm884_vm2, %v1729_v21, %v1731_v49  ;;  %v1893_v61 = vsel %vm1046_vm3, %v1890_v60, %v1892_v27  ;;  %v2052_v28 = vsel %vm1206_vm7, %v2049_v47, %v2051_v4  ;;  %v9389_v54 = vrot.slane %v7736_v50, 2 }
 0x212   : > { %v1807_v45 = vsel %vm820_vm5, %v1732_v30, -3.4028235e+38  ;;  %v1968_v46 = vsel %vm828_vm8, %v1893_v61, -3.4028235e+38  ;;  %v2128_v58 = vsel %vm839_vm6, %v2052_v28, -3.4028235e+38  ;;  %v2213_v35 = vsel %vm1368_vm9, %v2210_v24, %v2212_v39 }
 0x213   : > { %v1839_v53 = vmax.f32 %v1646_v26, %v1807_v45  ;;  %v2160_v14 = vmax.f32 %v1999_v42, %v2128_v58  ;;  %v2289_v21 = vsel %vm847_vm10, %v2213_v35, -3.4028235e+38  ;;  %v1734_v60 = vsel %vm884_vm2, %v1731_v49, %v9391_v11 }
 0x214   : > { %v1840_v47 = vmax.f32 %v7736_v50, %v1734_v60  ;;  %v1895_v30 = vsel %vm1046_vm3, %v1892_v27, %v9390_v17  ;;  %v9640_v61 = vrot.slane %v7736_v50, 1  ;;  %v2215_v24 = vsel %vm1368_vm9, %v2212_v39, %v9389_v54 }
 0x215   : > { %v2000_v42 = vmax.f32 %v1839_v53, %v1968_v46  ;;  %v7780_v26 = vmax.f32 %v2160_v14, %v2289_v21  ;;  %v2299_v49 = vsel %vm847_vm10, %v2233_v56, -3.4028235e+38  ;;  %v2336_v45 = vmax.f32 %v7429_v22, -3.4028235e+38 }
 0x216   : > { %v2054_v28 = vsel %vm1206_vm7, %v2051_v4, %v9640_v61  ;;  %v7785_v58 = vmax.f32 %v1840_v47, %v1895_v30  ;;  %v7787_v35 = vmax.f32 %v2170_v13, %v2299_v49  ;;  %v2337_v27 = vmax.f32 %v7452_v62, -3.4028235e+38 }
 0x217   : > { %9641 = vst [vmem:[#allocation21_spill] sm:$0xff] %v7780_v26  ;;  %v2338_v4 = vmax.f32 %v7477_v33, %v7353_v7  ;;  %v2161_v60 = vmax.f32 %v2000_v42, %v2054_v28  ;;  %v2339_v39 = vmax.f32 %v7483_v25, %v7397_v3  ;;  %v2366_v14 = vmax.f32 %v2334_v18, -3.4028235e+38 }
 0x218   : > { %9642 = vst [vmem:[#allocation4_spill] sm:$0xff] %v7787_v35  ;;  %v2367_v46 = vmax.f32 %v2335_v10, -3.4028235e+38  ;;  %v2368_v53 = vmax.f32 %v2336_v45, %v7353_v7  ;;  %v2369_v56 = vmax.f32 %v2337_v27, %v7397_v3  ;;  %v9643_v13 = vmax.f32 %v7337_v32, %v7279_v40 }
 0x219   : > { %v2370_v21 = vmax.f32 %v2338_v4, %v7429_v22  ;;  %v7801_v30 = vmax.f32 %v2161_v60, %v2215_v24  ;;  %v2371_v61 = vmax.f32 %v2339_v39, %v7452_v62  ;;  %v2398_v28 = vmax.f32 %v2366_v14, %v7429_v22 }
 0x21a   : > { %v2397_v47 = vmax.f32 %v9643_v13, %v7787_v35  ;;  %v2399_v18 = vmax.f32 %v2367_v46, %v7452_v62  ;;  %v2400_v10 = vmax.f32 %v2368_v53, %v7477_v33  ;;  %v2401_v7 = vmax.f32 %v2369_v56, %v7483_v25 }
 0x21b   : > { %9644 = vst [vmem:[#allocation20_spill] sm:$0xff] %v7801_v30  ;;  %v2402_v3 = vmax.f32 %v2370_v21, %v7504_v16  ;;  %v2403_v49 = vmax.f32 %v2371_v61, %v7529_v29  ;;  %v7811_v45 = vmax.f32 %v2398_v28, %v7477_v33  ;;  %v9645_v22 = vmax.f32 %v7532_v2, %v7555_v63 }
 0x21c   : > { %v2429_v42 = vmax.f32 %v2397_v47, -3.4028235e+38  ;;  %v7814_v24 = vmax.f32 %v2399_v18, %v7483_v25  ;;  %v7823_v4 = vmax.f32 %v2400_v10, %v7504_v16  ;;  %v7826_v60 = vmax.f32 %v2401_v7, %v7529_v29 }
 0x21d   : > { %v7820_v27 = vmax.f32 %v9645_v22, %v7594_v38  ;;  %v7829_v39 = vmax.f32 %v2402_v3, %v7555_v63  ;;  %v7834_v46 = vmax.f32 %v2403_v49, %v7580_v59  ;;  %v9395_v53 = vrot.slane %v7811_v45, 6 }
 0x21e   : > { %9646 = vst [vmem:[#allocation22_spill] sm:$0xff] %v7826_v60  ;;  %v7831_v14 = vmax.f32 %v2429_v42, -3.4028235e+38  ;;  %v9400_v2 = vrot.slane %v7814_v24, 6  ;;  %v9402_v56 = vrot.slane %v7811_v45, 7  ;;  %v9393_v13 = vrot.slane %v7823_v4, 6 }
 0x21f   : > { %v2501_v47 = vrot.slane %v7826_v60, 6  ;;  %v9392_v61 = vrot.slane %v7829_v39, 6  ;;  %v9397_v18 = vrot.slane %v7814_v24, 7  ;;  %v9396_v10 = vrot.slane %v7823_v4, 7 }
 0x220   : > { %9647 = vst [vmem:[#allocation23_spill] sm:$0xff] %v7831_v14  ;;  %v9394_v21 = vrot.slane %v7831_v14, 6  ;;  %v9401_v28 = vrot.slane %v7831_v14, 7  ;;  %v9399_v7 = vrot.slane %v7826_v60, 7  ;;  %v2500_v3 = vsel %vm884_vm2, %v9400_v2, %v9393_v13 }
 0x221   : > { %v2504_v42 = vsel %vm884_vm2, %v2501_v47, %v9392_v61  ;;  %v9398_v22 = vrot.slane %v7829_v39, 7  ;;  %v2593_v17 = vsel %vm820_vm5, %v2500_v3, -3.4028235e+38  ;;  %v2661_v61 = vsel %vm1046_vm3, %v9397_v18, %v9396_v10 }
 0x222   : > { %v2590_v49 = vsel %vm884_vm2, %v9394_v21, %v9395_v53  ;;  %v2595_v11 = vsel %vm820_vm5, %v2504_v42, -3.4028235e+38  ;;  %v2625_v21 = vmax.f32 %v7823_v4, %v2593_v17  ;;  %v2751_v42 = vsel %vm1046_vm3, %v9401_v28, %v9402_v56 }
 0x223   : > { %v2591_v54 = vsel %vm820_vm5, %v2590_v49, -3.4028235e+38  ;;  %v2627_v53 = vmax.f32 %v7829_v39, %v2595_v11  ;;  %v2665_v3 = vsel %vm1046_vm3, %v9399_v7, %v9398_v22  ;;  %v2754_v49 = vsel %vm828_vm8, %v2661_v61, -3.4028235e+38 }
 0x224   : > { %v2623_v13 = vmax.f32 %v7811_v45, %v2591_v54  ;;  %v2756_v17 = vsel %vm828_vm8, %v2665_v3, -3.4028235e+38  ;;  %v9405_v11 = vrot.slane %v7811_v45, 1  ;;  %v2752_v54 = vsel %vm828_vm8, %v2751_v42, -3.4028235e+38 }
 0x225   : > { %v2786_v10 = vmax.f32 %v2625_v21, %v2754_v49  ;;  %v2788_v18 = vmax.f32 %v2627_v53, %v2756_v17  ;;  %v2817_v22 = vrot.slane %v7814_v24, 1  ;;  %v2819_v2 = vrot.slane %v7823_v4, 1 }
 0x226   : > { %v2784_v7 = vmax.f32 %v2623_v13, %v2752_v54  ;;  %v2821_v28 = vrot.slane %v7826_v60, 1  ;;  %v2823_v56 = vrot.slane %v7829_v39, 1  ;;  %v2825_v3 = vrot.slane %v7834_v46, 1 }
 0x227   : > { %v2818_v61 = vsel %vm1206_vm7, %v9405_v11, %v2817_v22  ;;  %v9412_v14 = vrot.slane %v7820_v27, 1  ;;  %v2820_v53 = vsel %vm1206_vm7, %v2817_v22, %v2819_v2  ;;  %v2978_v32 = vrot.slane %v7814_v24, 2 }
 0x228   : > { %v2822_v13 = vsel %vm1206_vm7, %v2819_v2, %v2821_v28  ;;  %v2824_v42 = vsel %vm1206_vm7, %v2821_v28, %v2823_v56  ;;  %v2945_v49 = vmax.f32 %v2784_v7, %v2818_v61  ;;  %v2826_v17 = vsel %vm1206_vm7, %v2823_v56, %v2825_v3 }
 0x229   : > { %v2828_v54 = vsel %vm1206_vm7, %v2825_v3, %v9412_v14  ;;  %v2947_v11 = vmax.f32 %v2786_v10, %v2822_v13  ;;  %v2949_v35 = vmax.f32 %v2788_v18, %v2826_v17  ;;  %v2980_v40 = vrot.slane %v7823_v4, 2 }
 0x22a   : > { %v2982_v21 = vrot.slane %v7826_v60, 2  ;;  %v2984_v22 = vrot.slane %v7829_v39, 2  ;;  %v9648_v2 = vrot.slane %v7811_v45, 2  ;;  %v2986_v56 = vrot.slane %v7834_v46, 2 }
 0x22b   : > { %v9415_v7 = vrot.slane %v7820_v27, 2  ;;  %v1552_v10 = vmax.f32 %v6665_v19, %v9628_v36  ;;  %v2981_v61 = vsel %vm1368_vm9, %v2978_v32, %v2980_v40  ;;  %v9650_v36 = vrot.slane %v7811_v45, 6 }
 0x22c   : > { %v2979_v28 = vsel %vm1368_vm9, %v9648_v2, %v2978_v32  ;;  %v2983_v18 = vsel %vm1368_vm9, %v2980_v40, %v2982_v21  ;;  %v2985_v3 = vsel %vm1368_vm9, %v2982_v21, %v2984_v22  ;;  %v2987_v17 = vsel %vm1368_vm9, %v2984_v22, %v2986_v56 }
 0x22d   : > { %v7923_v13 = vmax.f32 %v2945_v49, %v2979_v28  ;;  %v2989_v2 = vsel %vm1368_vm9, %v2986_v56, %v9415_v7  ;;  %v7929_v14 = vmax.f32 %v2947_v11, %v2983_v18  ;;  %v1584_v30 = vmax.f32 %v1552_v10, %v9630_v51 }
 0x22e   : > { %v7932_v26 = vmax.f32 %v2949_v35, %v2987_v17  ;;  %v9649_v40 = vrot.slane %v7814_v24, 6  ;;  %v9651_v49 = vrot.slane %v7823_v4, 6  ;;  %v2505_v11 = vrot.slane %v7834_v46, 6 }
 0x22f   : > { %v3138_v32 = vmax.f32 %v7923_v13, -3.4028235e+38  ;;  %v1616_v28 = vmax.f32 %v1584_v30, %v6762_v48  ;;  %v9652_v18 = vrot.slane %v7814_v24, 7  ;;  %v9653_v17 = vrot.slane %v7811_v45, 7 }
 0x230   : > { %v2498_v21 = vsel %vm884_vm2, %v9650_v36, %v9649_v40  ;;  %v2502_v22 = vsel %vm884_vm2, %v9651_v49, %v2501_v47  ;;  %v9654_v40 = vrot.slane %v7826_v60, 7  ;;  %v9655_v36 = vrot.slane %v7823_v4, 7 }
 0x231   : > { %v2624_v56 = vmax.f32 %v7814_v24, %v2498_v21  ;;  %v2626_v35 = vmax.f32 %v7826_v60, %v2502_v22  ;;  %v3170_v10 = vmax.f32 %v3138_v32, -3.4028235e+38  ;;  %v2659_v7 = vsel %vm1046_vm3, %v9653_v17, %v9652_v18 }
 0x232   : > { %v2663_v47 = vsel %vm1046_vm3, %v9655_v36, %v9654_v40  ;;  %v2666_v30 = vrot.slane %v7834_v46, 7  ;;  %v7959_v49 = vmax.f32 %v1616_v28, %v6866_v9  ;;  %v9656_v21 = vrot.slane %v7829_v39, 6 }
 0x233   : > { %v2785_v22 = vmax.f32 %v2624_v56, %v2659_v7  ;;  %v2787_v55 = vmax.f32 %v2626_v35, %v2663_v47  ;;  %v3202_v12 = vmax.f32 %v3170_v10, %v7929_v14  ;;  %v9657_v17 = vrot.slane %v7829_v39, 7 }
 0x234   : > { %v2506_v32 = vsel %vm884_vm2, %v9656_v21, %v2505_v11  ;;  %v2914_v40 = vsel %vm839_vm6, %v2820_v53, -3.4028235e+38  ;;  %v1735_v28 = vrot.slane %v7959_v49, 6  ;;  %v9420_v36 = vrot.slane %v7959_v49, 7  ;;  %5386 = vmatprep.mubr.msk.f32.mxu1 %vm3269_vm4, %v7959_v49 }
 0x235   : > { %v2628_v18 = vmax.f32 %v7834_v46, %v2506_v32  ;;  %v2667_v60 = vsel %vm1046_vm3, %v9657_v17, %v2666_v30  ;;  %v9421_v43 = vrot.slane %v7959_v49, 1  ;;  %v9422_v7 = vrot.slane %v7959_v49, 2 }
 0x236   : > { %v3234_v56 = vmax.f32 %v3202_v12, %v7932_v26  ;;  %v2916_v10 = vsel %vm839_vm6, %v2824_v42, -3.4028235e+38  ;;  %v2918_v53 = vsel %vm839_vm6, %v2828_v54, -3.4028235e+38  ;;  %v9658_v47 = vrot.slane %v7736_v50, 6 }
 0x237   : > { %v2789_v35 = vmax.f32 %v2628_v18, %v2667_v60  ;;  %v9659_v32 = vrot.slane %v7736_v50, 7  ;;  %v9660_v12 = vrot.slane %v7736_v50, 1  ;;  %v9661_v42 = vrot.slane %v7736_v50, 2 }
 0x238   : > { %v1736_v21 = vsel %vm884_vm2, %v9658_v47, %v1735_v28  ;;  %5503 = vmatprep.mubr.msk.f32.mxu0 %vm3269_vm4, %v3234_v56  ;;  %v3075_v56 = vsel %vm847_vm10, %v2981_v61, -3.4028235e+38  ;;  %v9424_v61 = vrot.slane %v7820_v27, 6 }
 0x239   : > { %v1897_v17 = vsel %vm1046_vm3, %v9659_v32, %v9420_v36  ;;  %v2056_v60 = vsel %vm1206_vm7, %v9660_v12, %v9421_v43  ;;  %v2217_v54 = vsel %vm1368_vm9, %v9661_v42, %v9422_v7  ;;  %v1809_v18 = vsel %vm820_vm5, %v1736_v21, -3.4028235e+38 }
 0x23a   : > { %v1970_v47 = vsel %vm828_vm8, %v1897_v17, -3.4028235e+38  ;;  %v2130_v32 = vsel %vm839_vm6, %v2056_v60, -3.4028235e+38  ;;  %v2946_v36 = vmax.f32 %v2785_v22, %v2914_v40  ;;  %v1841_v12 = vmax.f32 %v7959_v49, %v1809_v18 }
 0x23b   : > { %v2162_v43 = vmax.f32 %v7785_v58, %v2130_v32  ;;  %v2291_v50 = vsel %vm847_vm10, %v2217_v54, -3.4028235e+38  ;;  %v2948_v42 = vmax.f32 %v2787_v55, %v2916_v10  ;;  %v2950_v7 = vmax.f32 %v2789_v35, %v2918_v53 }
 0x23c   : > { %v3077_v21 = vsel %vm847_vm10, %v2985_v3, -3.4028235e+38  ;;  %v3079_v17 = vsel %vm847_vm10, %v2989_v2, -3.4028235e+38  ;;  %v8019_v60 = vmax.f32 %v1841_v12, %v1970_v47  ;;  %v8023_v40 = vmax.f32 %v2946_v36, %v3075_v56 }
 0x23d   : > { %v8021_v22 = vmax.f32 %v2162_v43, %v2291_v50  ;;  %v8025_v58 = vmax.f32 %v2948_v42, %v3077_v21  ;;  %v8027_v54 = vmax.f32 %v2950_v7, %v3079_v17  ;;  %v2341_v55 = vmax.f32 %v7529_v29, %v7452_v62 }
 0x23e   : > { %v9423_v3 = vrot.slane %v7820_v27, 7  ;;  %v3139_v35 = vmax.f32 %v8023_v40, -3.4028235e+38  ;;  %v3140_v2 = vmax.f32 %v7929_v14, -3.4028235e+38  ;;  %v1553_v43 = vmax.f32 %v6740_v31, %v9629_v15 }
 0x23f   : > { %9662 = vst [vmem:[#allocation24_spill] sm:$0xff] %v8021_v22  ;;  %v1554_v36 = vmax.f32 %v6762_v48, %v9630_v51  ;;  %v2373_v7 = vmax.f32 %v2341_v55, %v7483_v25  ;;  %v2508_v62 = vsel %vm884_vm2, %v2505_v11, %v9424_v61  ;;  %v2342_v53 = vmax.f32 %v7555_v63, %v7477_v33 }
 0x240   : > { %v2669_v10 = vsel %vm1046_vm3, %v2666_v30, %v9423_v3  ;;  %v3171_v18 = vmax.f32 %v3139_v35, -3.4028235e+38  ;;  %v2597_v15 = vsel %vm820_vm5, %v2508_v62, -3.4028235e+38  ;;  %v3172_v51 = vmax.f32 %v3140_v2, %v7923_v13 }
 0x241   : > { %v2758_v48 = vsel %vm828_vm8, %v2669_v10, -3.4028235e+38  ;;  %v2405_v47 = vmax.f32 %v2373_v7, %v7580_v59  ;;  %v2629_v11 = vmax.f32 %v7820_v27, %v2597_v15  ;;  %v1585_v32 = vmax.f32 %v1553_v43, %v9634_v34  ;;  %v9663_v10 = vld [vmem:[#allocation3_spill] sm:$0xff] }
 0x242   : > { %v1586_v30 = vmax.f32 %v1554_v36, %v6665_v19  ;;  %v3203_v12 = vmax.f32 %v3171_v18, %v8025_v58  ;;  %v3204_v33 = vmax.f32 %v3172_v51, %v7932_v26  ;;  %v2374_v50 = vmax.f32 %v2342_v53, %v7504_v16 }
 0x243   : > { %v3141_v42 = vmax.f32 %v8025_v58, -3.4028235e+38  ;;  %v8062_v56 = vmax.f32 %v2405_v47, %v7612_v0  ;;  %v2790_v21 = vmax.f32 %v2629_v11, %v2758_v48  ;;  %v1617_v17 = vmax.f32 %v1585_v32, %v6864_v41 }
 0x244   : > { %v1618_v55 = vmax.f32 %v1586_v30, %v6866_v9  ;;  %v3235_v35 = vmax.f32 %v3203_v12, %v8027_v54  ;;  %v2406_v19 = vmax.f32 %v2374_v50, %v7594_v38  ;;  %v2343_v43 = vmax.f32 %v7580_v59, %v7483_v25  ;;  %v9664_v9 = vld [vmem:[#allocation14_spill] sm:$0xff] }
 0x245   : > { %v8069_v2 = vmax.f32 %v3141_v42, %v8023_v40  ;;  %v2829_v36 = vrot.slane %v8062_v56, 1  ;;  %v2990_v7 = vrot.slane %v8062_v56, 2  ;;  %v1649_v62 = vmax.f32 %v1617_v17, %v6975_v52 }
 0x246   : > { %v8077_v53 = vmax.f32 %v1618_v55, %v9663_v10  ;;  %5504 = vmatmul.mubr.msk.f32.vlgmr.msra.gmra.mxu0 %vm3269_vm4, %v3235_v35  ;;  %v8081_v18 = vmax.f32 %v2406_v19, %v9664_v9  ;;  %v2509_v15 = vrot.slane %v8062_v56, 6  ;;  %v2670_v48 = vrot.slane %v8062_v56, 7 }
 0x247   : > { %v9665_v51 = vrot.slane %v7820_v27, 1  ;;  %v9666_v11 = vrot.slane %v7820_v27, 2  ;;  %v1737_v30 = vrot.slane %v1649_v62, 6  ;;  %v1898_v12 = vrot.slane %v1649_v62, 7  ;;  %5387 = vmatmul.mubr.msk.f32.gmra.mxu1 %vm3269_vm4, %v1649_v62 }
 0x248   : > { %v2057_v42 = vrot.slane %v1649_v62, 1  ;;  %v2218_v17 = vrot.slane %v1649_v62, 2  ;;  %5389 = vmatprep.mubr.msk.f32.mxu1 %vm3269_vm4, %v8077_v53  ;;  %v9667_v19 = vrot.slane %v7959_v49, 7  ;;  %v9668_v25 = vrot.slane %v7959_v49, 1 }
 0x249   : > { %v2830_v47 = vsel %vm1206_vm7, %v9665_v51, %v2829_v36  ;;  %v2991_v32 = vsel %vm1368_vm9, %v9666_v11, %v2990_v7  ;;  %v1738_v35 = vsel %vm884_vm2, %v1735_v28, %v1737_v30  ;;  %v1900_v51 = vrot.slane %v8077_v53, 7 }
 0x24a   : > { %v2951_v50 = vmax.f32 %v2790_v21, %v2830_v47  ;;  %v1899_v10 = vsel %vm1046_vm3, %v9667_v19, %v1898_v12  ;;  %v2059_v11 = vrot.slane %v8077_v53, 1  ;;  %v1842_v47 = vmax.f32 %v1649_v62, %v1738_v35 }
 0x24b   : > { %v2058_v3 = vsel %vm1206_vm7, %v9668_v25, %v2057_v42  ;;  %v9669_v61 = vrot.slane %v7959_v49, 2  ;;  %v9670_v22 = vrot.slane %v8077_v53, 6  ;;  %v9672_v35 = vrot.slane %v7820_v27, 7 }
 0x24c   : > { %v8105_v21 = vmax.f32 %v2951_v50, %v2991_v32  ;;  %v2163_v28 = vmax.f32 %v8019_v60, %v2058_v3  ;;  %v1901_v32 = vsel %vm1046_vm3, %v1898_v12, %v1900_v51  ;;  %v2060_v62 = vsel %vm1206_vm7, %v2057_v42, %v2059_v11 }
 0x24d   : > { %v2219_v55 = vsel %vm1368_vm9, %v9669_v61, %v2218_v17  ;;  %v1740_v19 = vsel %vm884_vm2, %v1737_v30, %v9670_v22  ;;  %v2003_v50 = vmax.f32 %v1842_v47, %v1899_v10  ;;  %v1972_v60 = vsel %vm828_vm8, %v1901_v32, -3.4028235e+38 }
 0x24e   : > { %v3236_v25 = vmax.f32 %v3204_v33, %v8105_v21  ;;  %v1811_v49 = vsel %vm820_vm5, %v1740_v19, -3.4028235e+38  ;;  %v8128_v61 = vmax.f32 %v2163_v28, %v2219_v55  ;;  %v2132_v3 = vsel %vm839_vm6, %v2060_v62, -3.4028235e+38 }
 0x24f   : > { %v1843_v22 = vmax.f32 %v8077_v53, %v1811_v49  ;;  %v9428_v30 = vrot.slane %v8077_v53, 2  ;;  %v2164_v12 = vmax.f32 %v2003_v50, %v2132_v3  ;;  %v9671_v33 = vrot.slane %v7820_v27, 6 }
 0x250   : > { %5506 = vmatprep.mubr.msk.f32.mxu0 %vm3269_vm4, %v3236_v25  ;;  %v2671_v10 = vsel %vm1046_vm3, %v9672_v35, %v2670_v48  ;;  %v2831_v55 = vrot.slane %v8081_v18, 1  ;;  %v2992_v32 = vrot.slane %v8081_v18, 2  ;;  %v2375_v50 = vmax.f32 %v2343_v43, %v7529_v29 }
 0x251   : > { %v2510_v42 = vsel %vm884_vm2, %v9671_v33, %v2509_v15  ;;  %v8142_v47 = vmax.f32 %v1843_v22, %v1972_v60  ;;  %v2221_v28 = vsel %vm1368_vm9, %v2218_v17, %v9428_v30  ;;  %v2511_v49 = vrot.slane %v8081_v18, 6 }
 0x252   : > { %v2630_v19 = vmax.f32 %v8062_v56, %v2510_v42  ;;  %v2293_v62 = vsel %vm847_vm10, %v2221_v28, -3.4028235e+38  ;;  %v2832_v25 = vsel %vm1206_vm7, %v2829_v36, %v2831_v55  ;;  %v2993_v17 = vsel %vm1368_vm9, %v2990_v7, %v2992_v32 }
 0x253   : > { %v8154_v3 = vmax.f32 %v2164_v12, %v2293_v62  ;;  %v2920_v22 = vsel %vm839_vm6, %v2832_v25, -3.4028235e+38  ;;  %v3081_v33 = vsel %vm847_vm10, %v2993_v17, -3.4028235e+38  ;;  %v2407_v42 = vmax.f32 %v2375_v50, %v7612_v0 }
 0x254   : > { %v2791_v60 = vmax.f32 %v2630_v19, %v2671_v10  ;;  %v2512_v35 = vsel %vm884_vm2, %v2509_v15, %v2511_v49  ;;  %v2672_v36 = vrot.slane %v8081_v18, 7  ;;  %v3142_v10 = vmax.f32 %v7932_v26, %v7923_v13  ;;  %v9673_v15 = vld [vmem:[#allocation7_spill] sm:$0xff] }
 0x255   : > { %v2599_v12 = vsel %vm820_vm5, %v2512_v35, -3.4028235e+38  ;;  %v1555_v28 = vmax.f32 %v6864_v41, %v9634_v34  ;;  %v8171_v7 = vmax.f32 %v2407_v42, %v7651_v20  ;;  %v2063_v25 = vrot.slane %v9673_v15, 1  ;;  %v9674_v42 = vld [vmem:[#allocation8_spill] sm:$0xff] }
 0x256   : > { %v2952_v43 = vmax.f32 %v2791_v60, %v2920_v22  ;;  %v2631_v19 = vmax.f32 %v8081_v18, %v2599_v12  ;;  %v2673_v62 = vsel %vm1046_vm3, %v2670_v48, %v2672_v36  ;;  %v3174_v22 = vmax.f32 %v3142_v10, %v7929_v14 }
 0x257   : > { %v2760_v60 = vsel %vm828_vm8, %v2673_v62, -3.4028235e+38  ;;  %v1587_v13 = vmax.f32 %v1555_v28, %v6740_v31  ;;  %v9427_v41 = vrot.slane %v8171_v7, 1  ;;  %v9426_v34 = vrot.slane %v8171_v7, 2 }
 0x258   : > { %v8176_v50 = vmax.f32 %v2952_v43, %v3081_v33  ;;  %v2792_v17 = vmax.f32 %v2631_v19, %v2760_v60  ;;  %v9675_v35 = vrot.slane %v9674_v42, 1  ;;  %v9676_v33 = vmax.f32 %v8069_v2, %v8027_v54 }
 0x259   : > { %v3206_v12 = vmax.f32 %v3174_v22, %v8105_v21  ;;  %v1619_v10 = vmax.f32 %v1587_v13, %v6975_v52  ;;  %v2224_v31 = vrot.slane %v9673_v15, 2  ;;  %v2834_v28 = vsel %vm1206_vm7, %v2831_v55, %v9427_v41  ;;  %v9677_v22 = vld [vmem:[#allocation5_spill] sm:$0xff] }
 0x25a   : > { %v8187_v48 = vsel %vm1206_vm7, %v2063_v25, %v9675_v35  ;;  %v3237_v43 = vmax.f32 %v9676_v33, %v8176_v50  ;;  %v2995_v19 = vsel %vm1368_vm9, %v2992_v32, %v9426_v34  ;;  %v2344_v62 = vmax.f32 %v7594_v38, %v7504_v16 }
 0x25b   : > { %v2513_v2 = vrot.slane %v8171_v7, 6  ;;  %v2953_v60 = vmax.f32 %v2792_v17, %v2834_v28  ;;  %v1651_v52 = vmax.f32 %v1619_v10, %v9677_v22  ;;  %v9678_v13 = vrot.slane %v9674_v42, 2 }
 0x25c   : > { %5507 = vmatmul.mubr.msk.f32.gmra.mxu0 %vm3269_vm4, %v3237_v43  ;;  %v2674_v55 = vrot.slane %v8171_v7, 7  ;;  %v2376_v33 = vmax.f32 %v2344_v62, %v7555_v63  ;;  %v3143_v16 = vmax.f32 %v8027_v54, %v8023_v40  ;;  %v2345_v34 = vmax.f32 %v7612_v0, %v7529_v29 }
 0x25d   : > { %v2227_v35 = vsel %vm1368_vm9, %v2224_v31, %v9678_v13  ;;  %v2514_v32 = vsel %vm884_vm2, %v2511_v49, %v2513_v2  ;;  %v8217_v43 = vmax.f32 %v2953_v60, %v2995_v19  ;;  %v1741_v17 = vrot.slane %v1651_v52, 6  ;;  %5390 = vmatmul.mubr.msk.f32.gmra.mxu1 %vm3269_vm4, %v1651_v52 }
 0x25e   : > { %v1902_v10 = vrot.slane %v1651_v52, 7  ;;  %v2061_v28 = vrot.slane %v1651_v52, 1  ;;  %v2222_v22 = vrot.slane %v1651_v52, 2  ;;  %5392 = vmatprep.mubr.msk.f32.mxu1 %vm3269_vm4, %v9673_v15  ;;  %v2408_v62 = vmax.f32 %v2376_v33, %v9664_v9 }
 0x25f   : > { %v2632_v49 = vmax.f32 %v8171_v7, %v2514_v32  ;;  %v2675_v40 = vsel %vm1046_vm3, %v2672_v36, %v2674_v55  ;;  %v3238_v29 = vmax.f32 %v3206_v12, %v8217_v43  ;;  %v9679_v19 = vrot.slane %v8077_v53, 6 }
 0x260   : > { %v9680_v13 = vrot.slane %v9673_v15, 6  ;;  %v1903_v33 = vsel %vm1046_vm3, %v1900_v51, %v1902_v10  ;;  %v9681_v36 = vrot.slane %v9673_v15, 7  ;;  %v2064_v51 = vsel %vm1206_vm7, %v2061_v28, %v2063_v25 }
 0x261   : > { %v1742_v60 = vsel %vm884_vm2, %v9679_v19, %v1741_v17  ;;  %v2062_v19 = vsel %vm1206_vm7, %v2059_v11, %v2061_v28  ;;  %5509 = vmatprep.mubr.msk.f32.mxu0 %vm3269_vm4, %v3238_v29  ;;  %5393 = vmatmul.mubr.msk.f32.gmra.mxu1 %vm3269_vm4, %v9674_v42  ;;  %v9682_v11 = vrot.slane %v8077_v53, 2  ;;  %v2793_v28 = vmax.f32 %v2632_v49, %v2675_v40 }
 0x262   : > { %v1744_v41 = vsel %vm884_vm2, %v1741_v17, %v9680_v13  ;;  %v1844_v30 = vmax.f32 %v1651_v52, %v1742_v60  ;;  %v1905_v12 = vsel %vm1046_vm3, %v1902_v10, %v9681_v36  ;;  %v2134_v10 = vsel %vm839_vm6, %v2064_v51, -3.4028235e+38  ;;  %v9683_v60 = vld [vmem:[#allocation9_spill] sm:$0xff] }
 0x263   : > { %v1813_v32 = vsel %vm820_vm5, %v1744_v41, -3.4028235e+38  ;;  %v1974_v13 = vsel %vm828_vm8, %v1905_v12, -3.4028235e+38  ;;  %v2165_v41 = vmax.f32 %v8142_v47, %v2062_v19  ;;  %v2223_v29 = vsel %vm1368_vm9, %v9682_v11, %v2222_v22  ;;  %5395 = vmatprep.mubr.msk.f32.mxu1 %vm3269_vm4, %v9683_v60 }
 0x264   : > { %v1845_v17 = vmax.f32 %v9673_v15, %v1813_v32  ;;  %v2005_v52 = vmax.f32 %v1844_v30, %v1903_v33  ;;  %v2225_v15 = vsel %vm1368_vm9, %v2222_v22, %v2224_v31  ;;  %v8266_v30 = vmax.f32 %v2408_v62, %v7664_v1 }
 0x265   : > { %v2295_v47 = vsel %vm847_vm10, %v2225_v15, -3.4028235e+38  ;;  %v8263_v25 = vmax.f32 %v2165_v41, %v2223_v29  ;;  %v3175_v53 = vmax.f32 %v3143_v16, %v8025_v58  ;;  %v2377_v33 = vmax.f32 %v2345_v34, %v7580_v59  ;;  %5396 = vmatmul.mubr.msk.f32.gmra.mxu1 %vm3269_vm4, %v7214_v37  ;;  %v9686_v15 = vld [vmem:[#allocation10_spill] sm:$0xff] }
 0x266   : > { %v2006_v32 = vmax.f32 %v1845_v17, %v1974_v13  ;;  %v2166_v42 = vmax.f32 %v2005_v52, %v2134_v10  ;;  %v2835_v22 = vrot.slane %v8266_v30, 1  ;;  %v2996_v36 = vrot.slane %v8266_v30, 2  ;;  %5398 = vmatprep.mubr.msk.f32.mxu1 %vm3269_vm4, %v7227_v57 }
 0x267   : > { %v2515_v12 = vrot.slane %v8266_v30, 6  ;;  %v3207_v62 = vmax.f32 %v3175_v53, %v8176_v50  ;;  %v2409_v49 = vmax.f32 %v2377_v33, %v7651_v20  ;;  %v2676_v16 = vrot.slane %v8266_v30, 7 }
 0x268   : > { %v2167_v31 = vmax.f32 %v2006_v32, %v8187_v48  ;;  %v8276_v19 = vmax.f32 %v2166_v42, %v2295_v47  ;;  %v9684_v48 = vrot.slane %v8171_v7, 1  ;;  %v9685_v17 = vrot.slane %v8171_v7, 2 }
 0x269   : > { %v2516_v51 = vsel %vm884_vm2, %v2513_v2, %v2515_v12  ;;  %v8297_v57 = vmax.f32 %v2409_v49, %v7684_v23  ;;  %v2677_v29 = vsel %vm1046_vm3, %v2674_v55, %v2676_v16  ;;  %v3144_v2 = vmax.f32 %v8105_v21, %v7929_v14  ;;  %5399 = vmatmul.mubr.msk.f32.gmra.mxu1 %vm3269_vm4, %v9686_v15  ;;  %v9688_v15 = vld [vmem:[#allocation22_spill] sm:$0xff] }
 0x26a   : > { %v8283_v34 = vmax.f32 %v2167_v31, %v2227_v35  ;;  %v2836_v40 = vsel %vm1206_vm7, %v9684_v48, %v2835_v22  ;;  %v2997_v13 = vsel %vm1368_vm9, %v9685_v17, %v2996_v36  ;;  %v2601_v35 = vsel %vm820_vm5, %v2516_v51, -3.4028235e+38  ;;  %5453 = vmatprep.mubr.msk.f32.mxu1 %vm3269_vm4, %v7811_v45 }
 0x26b   : > { %v2922_v41 = vsel %vm839_vm6, %v2836_v40, -3.4028235e+38  ;;  %v3083_v52 = vsel %vm847_vm10, %v2997_v13, -3.4028235e+38  ;;  %v2633_v11 = vmax.f32 %v8266_v30, %v2601_v35  ;;  %v2762_v32 = vsel %vm828_vm8, %v2677_v29, -3.4028235e+38 }
 0x26c   : > { %v2954_v10 = vmax.f32 %v2793_v28, %v2922_v41  ;;  %v2837_v47 = vrot.slane %v8297_v57, 1  ;;  %v2998_v42 = vrot.slane %v8297_v57, 2  ;;  %v2346_v28 = vmax.f32 %v9664_v9, %v7555_v63 }
 0x26d   : > { %v2794_v53 = vmax.f32 %v2633_v11, %v2762_v32  ;;  %v3176_v14 = vmax.f32 %v3144_v2, %v7932_v26  ;;  %v2517_v33 = vrot.slane %v8297_v57, 6  ;;  %v2678_v40 = vrot.slane %v8297_v57, 7  ;;  %5454 = vmatmul.mubr.msk.f32.vlgmr.msra.gmra.mxu1 %vm3269_vm4, %v7814_v24 }
 0x26e   : > { %v8317_v55 = vmax.f32 %v2954_v10, %v3083_v52  ;;  %v2838_v31 = vsel %vm1206_vm7, %v2835_v22, %v2837_v47  ;;  %v2999_v49 = vsel %vm1368_vm9, %v2996_v36, %v2998_v42  ;;  %v2378_v48 = vmax.f32 %v2346_v28, %v7594_v38  ;;  %5456 = vmatprep.mubr.msk.f32.mxu1 %vm3269_vm4, %v7823_v4 }
 0x26f   : > { %v2955_v17 = vmax.f32 %v2794_v53, %v2838_v31  ;;  %v3208_v13 = vmax.f32 %v3176_v14, %v8217_v43  ;;  %v2518_v51 = vsel %vm884_vm2, %v2515_v12, %v2517_v33  ;;  %v2679_v36 = vsel %vm1046_vm3, %v2676_v16, %v2678_v40  ;;  %v9687_v16 = vld [vmem:[#allocation17_spill] sm:$0xff] }
 0x270   : > { %v3239_v63 = vmax.f32 %v3207_v62, %v8317_v55  ;;  %v2410_v41 = vmax.f32 %v2378_v48, %v7664_v1  ;;  %v2634_v22 = vmax.f32 %v8297_v57, %v2518_v51  ;;  %v3145_v52 = vmax.f32 %v8176_v50, %v8025_v58 }
 0x271   : > { %v8338_v62 = vmax.f32 %v2955_v17, %v2999_v49  ;;  %v2347_v12 = vmax.f32 %v7651_v20, %v7580_v59  ;;  %v3146_v24 = vmax.f32 %v8217_v43, %v7932_v26  ;;  %v2348_v35 = vmax.f32 %v7664_v1, %v7594_v38  ;;  %5457 = vmatmul.mubr.msk.f32.gmra.mxu1 %vm3269_vm4, %v9688_v15 }
 0x272   : > { %5510 = vmatmul.mubr.msk.f32.gmra.mxu0 %vm3269_vm4, %v3239_v63  ;;  %v8347_v10 = vmax.f32 %v2410_v41, %v9687_v16  ;;  %v2795_v58 = vmax.f32 %v2634_v22, %v2679_v36  ;;  %v3177_v11 = vmax.f32 %v3145_v52, %v8027_v54  ;;  %v3147_v4 = vmax.f32 %v8317_v55, %v8027_v54  ;;  %v9689_v41 = vld [vmem:[#allocation18_spill] sm:$0xff] }
 0x273   : > { %v3240_v29 = vmax.f32 %v3208_v13, %v8338_v62  ;;  %v2379_v2 = vmax.f32 %v2347_v12, %v7612_v0  ;;  %v3178_v59 = vmax.f32 %v3146_v24, %v8105_v21  ;;  %v2380_v26 = vmax.f32 %v2348_v35, %v9664_v9  ;;  %5459 = vmatprep.mubr.msk.f32.mxu1 %vm3269_vm4, %v7829_v39  ;;  %v9690_v52 = vld [vmem:[#allocation2_spill] sm:$0xff] }
 0x274   : > { %v2839_v38 = vrot.slane %v8347_v10, 1  ;;  %v3000_v32 = vrot.slane %v8347_v10, 2  ;;  %v3209_v28 = vmax.f32 %v3177_v11, %v8317_v55  ;;  %v2519_v53 = vrot.slane %v8347_v10, 6 }
 0x275   : > { %5512 = vmatprep.mubr.msk.f32.mxu0 %vm3269_vm4, %v3240_v29  ;;  %v2411_v54 = vmax.f32 %v2379_v2, %v7684_v23  ;;  %v2680_v14 = vrot.slane %v8347_v10, 7  ;;  %v3210_v31 = vmax.f32 %v3178_v59, %v8338_v62  ;;  %v2412_v49 = vmax.f32 %v2380_v26, %v9687_v16  ;;  %5460 = vmatmul.mubr.msk.f32.gmra.mxu1 %vm3269_vm4, %v7834_v46 }
 0x276   : > { %v2840_v48 = vsel %vm1206_vm7, %v2837_v47, %v2839_v38  ;;  %v3001_v63 = vsel %vm1368_vm9, %v2998_v42, %v3000_v32  ;;  %v2520_v17 = vsel %vm884_vm2, %v2517_v33, %v2519_v53  ;;  %v8373_v13 = vmax.f32 %v3147_v4, %v8176_v50  ;;  %5462 = vmatprep.mubr.msk.f32.mxu1 %vm3269_vm4, %v7820_v27 }
 0x277   : > { %v2924_v39 = vsel %vm839_vm6, %v2840_v48, -3.4028235e+38  ;;  %v3085_v51 = vsel %vm847_vm10, %v3001_v63, -3.4028235e+38  ;;  %v8380_v22 = vmax.f32 %v2411_v54, %v9689_v41  ;;  %v2603_v36 = vsel %vm820_vm5, %v2520_v17, -3.4028235e+38 }
 0x278   : > { %v2956_v47 = vmax.f32 %v2795_v58, %v2924_v39  ;;  %v2635_v42 = vmax.f32 %v8347_v10, %v2603_v36  ;;  %v2681_v33 = vsel %vm1046_vm3, %v2678_v40, %v2680_v14  ;;  %v8389_v12 = vmax.f32 %v2412_v49, %v9690_v52 }
 0x279   : > { %v2764_v24 = vsel %vm828_vm8, %v2681_v33, -3.4028235e+38  ;;  %v2841_v35 = vrot.slane %v8380_v22, 1  ;;  %v3002_v11 = vrot.slane %v8380_v22, 2  ;;  %v2521_v46 = vrot.slane %v8380_v22, 6  ;;  %5463 = vmatmul.mubr.msk.f32.gmra.mxu1 %vm3269_vm4, %v8062_v56 }
 0x27a   : > { %v8398_v58 = vmax.f32 %v2956_v47, %v3085_v51  ;;  %v2796_v4 = vmax.f32 %v2635_v42, %v2764_v24  ;;  %v2682_v40 = vrot.slane %v8380_v22, 7  ;;  %v2843_v29 = vrot.slane %v8389_v12, 1  ;;  %5465 = vmatprep.mubr.msk.f32.mxu1 %vm3269_vm4, %v8081_v18 }
 0x27b   : > { %v2842_v2 = vsel %vm1206_vm7, %v2839_v38, %v2841_v35  ;;  %v3003_v27 = vsel %vm1368_vm9, %v3000_v32, %v3002_v11  ;;  %v2522_v59 = vsel %vm884_vm2, %v2519_v53, %v2521_v46  ;;  %v3004_v26 = vrot.slane %v8389_v12, 2 }
 0x27c   : > { %v3241_v15 = vmax.f32 %v3209_v28, %v8398_v58  ;;  %v2957_v54 = vmax.f32 %v2796_v4, %v2842_v2  ;;  %v2636_v49 = vmax.f32 %v8380_v22, %v2522_v59  ;;  %v2683_v48 = vsel %vm1046_vm3, %v2680_v14, %v2682_v40 }
 0x27d   : > { %v2844_v38 = vsel %vm1206_vm7, %v2841_v35, %v2843_v29  ;;  %v3005_v32 = vsel %vm1368_vm9, %v3002_v11, %v3004_v26  ;;  %v3211_v53 = vmax.f32 %v8373_v13, %v8398_v58  ;;  %v2349_v56 = vmax.f32 %v7684_v23, %v7612_v0  ;;  %5466 = vmatmul.mubr.msk.f32.gmra.mxu1 %vm3269_vm4, %v8171_v7  ;;  %v9691_v35 = vld [vmem:[#allocation21_spill] sm:$0xff] }
 0x27e   : > { %5513 = vmatmul.mubr.msk.f32.gmra.mxu0 %vm3269_vm4, %v3241_v15  ;;  %v8420_v28 = vmax.f32 %v2957_v54, %v3003_v27  ;;  %v2797_v63 = vmax.f32 %v2636_v49, %v2683_v48  ;;  %v2926_v14 = vsel %vm839_vm6, %v2844_v38, -3.4028235e+38  ;;  %v3087_v18 = vsel %vm847_vm10, %v3005_v32, -3.4028235e+38  ;;  %5468 = vmatprep.mubr.msk.f32.mxu1 %vm3269_vm4, %v8266_v30 }
 0x27f   : > { %v2381_v17 = vmax.f32 %v2349_v56, %v7651_v20  ;;  %v2523_v39 = vrot.slane %v8389_v12, 6  ;;  %v2684_v13 = vrot.slane %v8389_v12, 7  ;;  %v3148_v0 = vmax.f32 %v8338_v62, %v8105_v21 }
 0x280   : > { %v3242_v51 = vmax.f32 %v3210_v31, %v8420_v28  ;;  %v2958_v36 = vmax.f32 %v2797_v63, %v2926_v14  ;;  %v2350_v47 = vmax.f32 %v9687_v16, %v9664_v9  ;;  %v3149_v42 = vmax.f32 %v8398_v58, %v8176_v50 }
 0x281   : > { %v2413_v33 = vmax.f32 %v2381_v17, %v9689_v41  ;;  %v2524_v24 = vsel %vm884_vm2, %v2521_v46, %v2523_v39  ;;  %v2685_v21 = vsel %vm1046_vm3, %v2682_v40, %v2684_v13  ;;  %v3180_v7 = vmax.f32 %v3148_v0, %v8217_v43  ;;  %5469 = vmatmul.mubr.msk.f32.gmra.mxu1 %vm3269_vm4, %v8297_v57  ;;  %v9692_v57 = vld [vmem:[#allocation20_spill] sm:$0xff] }
 0x282   : > { %5515 = vmatprep.mubr.msk.f32.mxu0 %vm3269_vm4, %v3242_v51  ;;  %v8445_v31 = vmax.f32 %v2958_v36, %v3087_v18  ;;  %v2605_v9 = vsel %vm820_vm5, %v2524_v24, -3.4028235e+38  ;;  %v2766_v50 = vsel %vm828_vm8, %v2685_v21, -3.4028235e+38  ;;  %v2382_v30 = vmax.f32 %v2350_v47, %v7664_v1  ;;  %5471 = vmatprep.mubr.msk.f32.mxu1 %vm3269_vm4, %v8347_v10  ;;  %v9693_v21 = vld [vmem:[#allocation24_spill] sm:$0xff] }
 0x283   : > { %v2445_v11 = vmax.f32 %v2413_v33, %v9691_v35  ;;  %v2637_v46 = vmax.f32 %v8389_v12, %v2605_v9  ;;  %v3212_v4 = vmax.f32 %v3180_v7, %v8420_v28  ;;  %v3181_v40 = vmax.f32 %v3149_v42, %v8317_v55 }
 0x284   : > { %v3243_v2 = vmax.f32 %v3211_v53, %v8445_v31  ;;  %v2414_v27 = vmax.f32 %v2382_v30, %v9690_v52  ;;  %v2351_v59 = vmax.f32 %v9689_v41, %v7651_v20  ;;  %v3150_v15 = vmax.f32 %v8420_v28, %v8217_v43 }
 0x285   : > { %v2798_v54 = vmax.f32 %v2637_v46, %v2766_v50  ;;  %v2845_v49 = vrot.slane %v2445_v11, 1  ;;  %v3006_v48 = vrot.slane %v2445_v11, 2  ;;  %v2525_v38 = vrot.slane %v2445_v11, 6  ;;  %5472 = vmatmul.mubr.msk.f32.gmra.mxu1 %vm3269_vm4, %v8380_v22 }
 0x286   : > { %5516 = vmatmul.mubr.msk.f32.gmra.mxu0 %vm3269_vm4, %v3243_v2  ;;  %v2446_v32 = vmax.f32 %v2414_v27, %v9692_v57  ;;  %v2686_v53 = vrot.slane %v2445_v11, 7  ;;  %v3213_v56 = vmax.f32 %v3181_v40, %v8445_v31  ;;  %v2383_v63 = vmax.f32 %v2351_v59, %v7684_v23  ;;  %5474 = vmatprep.mubr.msk.f32.mxu1 %vm3269_vm4, %v8389_v12 }
 0x287   : > { %v2846_v20 = vsel %vm1206_vm7, %v2843_v29, %v2845_v49  ;;  %v3007_v43 = vsel %vm1368_vm9, %v3004_v26, %v3006_v48  ;;  %v2526_v14 = vsel %vm884_vm2, %v2523_v39, %v2525_v38  ;;  %v3182_v10 = vmax.f32 %v3150_v15, %v8338_v62 }
 0x288   : > { %v2959_v18 = vmax.f32 %v2798_v54, %v2846_v20  ;;  %v2638_v17 = vmax.f32 %v2445_v11, %v2526_v14  ;;  %v2687_v0 = vsel %vm1046_vm3, %v2684_v13, %v2686_v53  ;;  %v2847_v51 = vrot.slane %v2446_v32, 1 }
 0x289   : > { %v3008_v36 = vrot.slane %v2446_v32, 2  ;;  %v2415_v29 = vmax.f32 %v2383_v63, %v9691_v35  ;;  %v2527_v47 = vrot.slane %v2446_v32, 6  ;;  %v2688_v26 = vrot.slane %v2446_v32, 7  ;;  %5475 = vmatmul.mubr.msk.f32.gmra.mxu1 %vm3269_vm4, %v2445_v11 }
 0x28a   : > { %v8480_v42 = vmax.f32 %v2959_v18, %v3007_v43  ;;  %v2799_v39 = vmax.f32 %v2638_v17, %v2687_v0  ;;  %v2848_v33 = vsel %vm1206_vm7, %v2845_v49, %v2847_v51  ;;  %v2352_v22 = vmax.f32 %v9690_v52, %v7664_v1  ;;  %5477 = vmatprep.mubr.msk.f32.mxu1 %vm3269_vm4, %v2446_v32 }
 0x28b   : > { %v2928_v13 = vsel %vm839_vm6, %v2848_v33, -3.4028235e+38  ;;  %v3009_v24 = vsel %vm1368_vm9, %v3006_v48, %v3008_v36  ;;  %v2447_v12 = vmax.f32 %v2415_v29, %v9693_v21  ;;  %v2528_v7 = vsel %vm884_vm2, %v2525_v38, %v2527_v47 }
 0x28c   : > { %v3244_v9 = vmax.f32 %v3212_v4, %v8480_v42  ;;  %v2960_v50 = vmax.f32 %v2799_v39, %v2928_v13  ;;  %v3089_v30 = vsel %vm847_vm10, %v3009_v24, -3.4028235e+38  ;;  %v2607_v1 = vsel %vm820_vm5, %v2528_v7, -3.4028235e+38 }
 0x28d   : > { %v2639_v46 = vmax.f32 %v2446_v32, %v2607_v1  ;;  %v2689_v40 = vsel %vm1046_vm3, %v2686_v53, %v2688_v26  ;;  %v2849_v2 = vrot.slane %v2447_v12, 1  ;;  %v3010_v27 = vrot.slane %v2447_v12, 2  ;;  %5478 = vmatmul.mubr.msk.f32.gmra.mxu1 %vm3269_vm4, %v2447_v12 }
 0x28e   : > { %5518 = vmatprep.mubr.msk.f32.mxu0 %vm3269_vm4, %v3244_v9  ;;  %v8499_v59 = vmax.f32 %v2960_v50, %v3089_v30  ;;  %v2768_v11 = vsel %vm828_vm8, %v2689_v40, -3.4028235e+38  ;;  %v3214_v4 = vmax.f32 %v3182_v10, %v8480_v42  ;;  %v2384_v15 = vmax.f32 %v2352_v22, %v9687_v16 }
 0x28f   : > { %v2800_v54 = vmax.f32 %v2639_v46, %v2768_v11  ;;  %v2850_v49 = vsel %vm1206_vm7, %v2847_v51, %v2849_v2  ;;  %v3011_v48 = vsel %vm1368_vm9, %v3008_v36, %v3010_v27  ;;  %v2529_v38 = vrot.slane %v2447_v12, 6 }
 0x290   : > { %v3245_v32 = vmax.f32 %v3213_v56, %v8499_v59  ;;  %v2416_v53 = vmax.f32 %v2384_v15, %v9692_v57  ;;  %v2690_v63 = vrot.slane %v2447_v12, 7  ;;  %v3151_v20 = vmax.f32 %v8445_v31, %v8317_v55 }
 0x291   : > { %v2961_v43 = vmax.f32 %v2800_v54, %v2850_v49  ;;  %v2530_v14 = vsel %vm884_vm2, %v2527_v47, %v2529_v38  ;;  %v2353_v10 = vmax.f32 %v9691_v35, %v7684_v23  ;;  %v3152_v18 = vmax.f32 %v8480_v42, %v8338_v62 }
 0x292   : > { %5519 = vmatmul.mubr.msk.f32.gmra.mxu0 %vm3269_vm4, %v3245_v32  ;;  %v2448_v17 = vmax.f32 %v2416_v53, %v8128_v61  ;;  %v2640_v56 = vmax.f32 %v2447_v12, %v2530_v14  ;;  %v2691_v0 = vsel %vm1046_vm3, %v2688_v26, %v2690_v63  ;;  %v3183_v51 = vmax.f32 %v3151_v20, %v8398_v58 }
 0x293   : > { %v8521_v36 = vmax.f32 %v2961_v43, %v3011_v48  ;;  %v2385_v55 = vmax.f32 %v2353_v10, %v9689_v41  ;;  %v3184_v29 = vmax.f32 %v3152_v18, %v8420_v28  ;;  %v2354_v23 = vmax.f32 %v9692_v57, %v9687_v16 }
 0x294   : > { %v2801_v47 = vmax.f32 %v2640_v56, %v2691_v0  ;;  %v2851_v62 = vrot.slane %v2448_v17, 1  ;;  %v3012_v39 = vrot.slane %v2448_v17, 2  ;;  %v3215_v33 = vmax.f32 %v3183_v51, %v8499_v59  ;;  %5480 = vmatprep.mubr.msk.f32.mxu1 %vm3269_vm4, %v2448_v17 }
 0x295   : > { %v3246_v26 = vmax.f32 %v3214_v4, %v8521_v36  ;;  %v2417_v22 = vmax.f32 %v2385_v55, %v9693_v21  ;;  %v2531_v13 = vrot.slane %v2448_v17, 6  ;;  %v2692_v24 = vrot.slane %v2448_v17, 7 }
 0x296   : > { %v2852_v12 = vsel %vm1206_vm7, %v2849_v2, %v2851_v62  ;;  %v3013_v7 = vsel %vm1368_vm9, %v3010_v27, %v3012_v39  ;;  %v3216_v9 = vmax.f32 %v3184_v29, %v8521_v36  ;;  %v2386_v16 = vmax.f32 %v2354_v23, %v9690_v52 }
 0x297   : > { %5521 = vmatprep.mubr.msk.f32.mxu0 %vm3269_vm4, %v3246_v26  ;;  %v2930_v50 = vsel %vm839_vm6, %v2852_v12, -3.4028235e+38  ;;  %v3091_v30 = vsel %vm847_vm10, %v3013_v7, -3.4028235e+38  ;;  %v2449_v1 = vmax.f32 %v2417_v22, %v8154_v3  ;;  %v2532_v46 = vsel %vm884_vm2, %v2529_v38, %v2531_v13 }
 0x298   : > { %v2962_v40 = vmax.f32 %v2801_v47, %v2930_v50  ;;  %v2609_v2 = vsel %vm820_vm5, %v2532_v46, -3.4028235e+38  ;;  %v2693_v27 = vsel %vm1046_vm3, %v2690_v63, %v2692_v24  ;;  %v2418_v11 = vmax.f32 %v2386_v16, %v8128_v61 }
 0x299   : > { %v2641_v4 = vmax.f32 %v2448_v17, %v2609_v2  ;;  %v2770_v15 = vsel %vm828_vm8, %v2693_v27, -3.4028235e+38  ;;  %v2853_v54 = vrot.slane %v2449_v1, 1  ;;  %v3014_v49 = vrot.slane %v2449_v1, 2  ;;  %5481 = vmatmul.mubr.msk.f32.gmra.mxu1 %vm3269_vm4, %v2449_v1 }
 0x29a   : > { %v8549_v48 = vmax.f32 %v2962_v40, %v3091_v30  ;;  %v8552_v38 = vmax.f32 %v2418_v11, %v8263_v25  ;;  %v2533_v32 = vrot.slane %v2449_v1, 6  ;;  %v2694_v53 = vrot.slane %v2449_v1, 7 }
 0x29b   : > { %v2802_v20 = vmax.f32 %v2641_v4, %v2770_v15  ;;  %v2854_v63 = vsel %vm1206_vm7, %v2851_v62, %v2853_v54  ;;  %v3015_v43 = vsel %vm1368_vm9, %v3012_v39, %v3014_v49  ;;  %v3153_v14 = vmax.f32 %v8499_v59, %v8398_v58 }
 0x29c   : > { %v3247_v10 = vmax.f32 %v3215_v33, %v8549_v48  ;;  %v2534_v18 = vsel %vm884_vm2, %v2531_v13, %v2533_v32  ;;  %v2695_v17 = vsel %vm1046_vm3, %v2692_v24, %v2694_v53  ;;  %v2855_v56 = vrot.slane %v8552_v38, 1  ;;  %5483 = vmatprep.mubr.msk.f32.mxu1 %vm3269_vm4, %v8552_v38 }
 0x29d   : > { %v2963_v0 = vmax.f32 %v2802_v20, %v2854_v63  ;;  %v2642_v51 = vmax.f32 %v2449_v1, %v2534_v18  ;;  %v3016_v55 = vrot.slane %v8552_v38, 2  ;;  %v3185_v29 = vmax.f32 %v3153_v14, %v8445_v31 }
 0x29e   : > { %5522 = vmatmul.mubr.msk.f32.gmra.mxu0 %vm3269_vm4, %v3247_v10  ;;  %v2856_v58 = vsel %vm1206_vm7, %v2853_v54, %v2855_v56  ;;  %v2355_v23 = vmax.f32 %v9693_v21, %v9689_v41  ;;  %v2535_v47 = vrot.slane %v8552_v38, 6  ;;  %v2696_v62 = vrot.slane %v8552_v38, 7 }
 0x29f   : > { %v8572_v39 = vmax.f32 %v2963_v0, %v3015_v43  ;;  %v2803_v33 = vmax.f32 %v2642_v51, %v2695_v17  ;;  %v2932_v26 = vsel %vm839_vm6, %v2856_v58, -3.4028235e+38  ;;  %v3017_v22 = vsel %vm1368_vm9, %v3014_v49, %v3016_v55 }
 0x2a0   : > { %v3093_v13 = vsel %vm847_vm10, %v3017_v22, -3.4028235e+38  ;;  %v3217_v24 = vmax.f32 %v3185_v29, %v8549_v48  ;;  %v2387_v12 = vmax.f32 %v2355_v23, %v9691_v35  ;;  %v2536_v41 = vsel %vm884_vm2, %v2533_v32, %v2535_v47  ;;  %v8624_v29 = vpop.f32.mrf.mxu0  ;;  %v9694_v22 = vld [vmem:[#allocation13_spill] sm:$0xff] }
 0x2a1   : > { %v3248_v7 = vmax.f32 %v3216_v9, %v8572_v39  ;;  %v2964_v16 = vmax.f32 %v2803_v33, %v2932_v26  ;;  %v2611_v50 = vsel %vm820_vm5, %v2536_v41, -3.4028235e+38  ;;  %v2697_v30 = vsel %vm1046_vm3, %v2694_v53, %v2696_v62 }
 0x2a2   : > { %v2419_v1 = vmax.f32 %v2387_v12, %v8154_v3  ;;  %v2643_v46 = vmax.f32 %v8552_v38, %v2611_v50  ;;  %v2772_v40 = vsel %vm828_vm8, %v2697_v30, -3.4028235e+38  ;;  %v3154_v2 = vmax.f32 %v8521_v36, %v8420_v28 }
 0x2a3   : > { %5524 = vmatprep.mubr.msk.f32.mxu0 %vm3269_vm4, %v3248_v7  ;;  %v8593_v27 = vmax.f32 %v2964_v16, %v3093_v13  ;;  %v2356_v9 = vmax.f32 %v8128_v61, %v9690_v52  ;;  %v3155_v11 = vmax.f32 %v8549_v48, %v8445_v31  ;;  %v2357_v4 = vmax.f32 %v8154_v3, %v9691_v35 }
 0x2a4   : > { %v2451_v15 = vmax.f32 %v2419_v1, %v8276_v19  ;;  %v2804_v54 = vmax.f32 %v2643_v46, %v2772_v40  ;;  %v3186_v49 = vmax.f32 %v3154_v2, %v8480_v42  ;;  %v3156_v28 = vmax.f32 %v8572_v39, %v8480_v42 }
 0x2a5   : > { %v3249_v38 = vmax.f32 %v3217_v24, %v8593_v27  ;;  %v2388_v32 = vmax.f32 %v2356_v9, %v9692_v57  ;;  %v8608_v52 = vmax.f32 %v3155_v11, %v8499_v59  ;;  %v2389_v31 = vmax.f32 %v2357_v4, %v9693_v21 }
 0x2a6   : > { %v2857_v53 = vrot.slane %v2451_v15, 1  ;;  %v3018_v20 = vrot.slane %v2451_v15, 2  ;;  %v3218_v35 = vmax.f32 %v3186_v49, %v8572_v39  ;;  %v2537_v63 = vrot.slane %v2451_v15, 6  ;;  %5484 = vmatmul.mubr.msk.f32.gmra.mxu1 %vm3269_vm4, %v2451_v15 }
 0x2a7   : > { %5525 = vmatmul.mubr.msk.f32.gmra.mxu0 %vm3269_vm4, %v3249_v38  ;;  %v2420_v42 = vmax.f32 %v2388_v32, %v8263_v25  ;;  %v2698_v43 = vrot.slane %v2451_v15, 7  ;;  %v3219_v14 = vmax.f32 %v8608_v52, %v8593_v27  ;;  %v2421_v10 = vmax.f32 %v2389_v31, %v8276_v19  ;;  %v9697_v52 = vld [vmem:[#allocation11_spill] sm:$0xff]  ;;  %v9698_v31 = vld [vmem:[#allocation12_spill] sm:$0xff] }
 0x2a8   : > { %v2858_v18 = vsel %vm1206_vm7, %v2855_v56, %v2857_v53  ;;  %v3019_v17 = vsel %vm1368_vm9, %v3016_v55, %v3018_v20  ;;  %v2538_v0 = vsel %vm884_vm2, %v2535_v47, %v2537_v63  ;;  %v8622_v51 = vmax.f32 %v3156_v28, %v8521_v36 }
 0x2a9   : > { %v2965_v58 = vmax.f32 %v2804_v54, %v2858_v18  ;;  %v2452_v23 = vmax.f32 %v2420_v42, %v8283_v34  ;;  %v2644_v33 = vmax.f32 %v2451_v15, %v2538_v0  ;;  %v2699_v26 = vsel %vm1046_vm3, %v2696_v62, %v2698_v43 }
 0x2aa   : > { %v8629_v13 = vmax.f32 %v2421_v10, %v9694_v22  ;;  %v9695_v56 = vrot.slane %v7214_v37, 2  ;;  %v9696_v55 = vrot.slane %v9683_v60, 2  ;;  %v2358_v24 = vmax.f32 %v8263_v25, %v9692_v57  ;;  %v8647_v57 = vpop.f32.mrf.mxu0 }
 0x2ab   : > { %v3157_v12 = vmax.f32 %v8593_v27, %v8499_v59  ;;  %v8640_v41 = vmax.f32 %v2965_v58, %v3019_v17  ;;  %v2805_v7 = vmax.f32 %v2644_v33, %v2699_v26  ;;  %v2859_v16 = vrot.slane %v2452_v23, 1  ;;  %5486 = vmatprep.mubr.msk.f32.mxu1 %vm3269_vm4, %v2452_v23 }
 0x2ac   : > { %v2231_v47 = vsel %vm1368_vm9, %v9696_v55, %v9695_v56  ;;  %v3020_v62 = vrot.slane %v2452_v23, 2  ;;  %v2539_v50 = vrot.slane %v2452_v23, 6  ;;  %v2700_v30 = vrot.slane %v2452_v23, 7  ;;  %5487 = vmatmul.mubr.msk.f32.gmra.mxu1 %vm3269_vm4, %v8629_v13 }
 0x2ad   : > { %v2861_v37 = vrot.slane %v8629_v13, 1  ;;  %v3022_v60 = vrot.slane %v8629_v13, 2  ;;  %v3250_v59 = vmax.f32 %v3218_v35, %v8640_v41  ;;  %v2860_v1 = vsel %vm1206_vm7, %v2857_v53, %v2859_v16 }
 0x2ae   : > { %v3021_v46 = vsel %vm1368_vm9, %v3018_v20, %v3020_v62  ;;  %v3220_v40 = vmax.f32 %v8622_v51, %v8640_v41  ;;  %v2934_v2 = vsel %vm839_vm6, %v2860_v1, -3.4028235e+38  ;;  %v2540_v11 = vsel %vm884_vm2, %v2537_v63, %v2539_v50  ;;  %v8673_v63 = vpop.f32.mrf.mxu0 }
 0x2af   : > { %v3095_v9 = vsel %vm847_vm10, %v3021_v46, -3.4028235e+38  ;;  %v2701_v4 = vsel %vm1046_vm3, %v2698_v43, %v2700_v30  ;;  %5527 = vmatprep.mubr.msk.f32.mxu0 %vm3269_vm4, %v3250_v59  ;;  %v2966_v15 = vmax.f32 %v2805_v7, %v2934_v2  ;;  %v2613_v54 = vsel %vm820_vm5, %v2540_v11, -3.4028235e+38 }
 0x2b0   : > { %v2774_v49 = vsel %vm828_vm8, %v2701_v4, -3.4028235e+38  ;;  %v2862_v28 = vsel %vm1206_vm7, %v2859_v16, %v2861_v37  ;;  %v2645_v38 = vmax.f32 %v2452_v23, %v2613_v54  ;;  %v3023_v32 = vsel %vm1368_vm9, %v3020_v62, %v3022_v60  ;;  %v8692_v7 = vpop.f32.mrf.mxu0  ;;  %v9702_v16 = vld [vmem:[#allocation15_spill] sm:$0xff] }
 0x2b1   : > { %v9699_v53 = vmax.f32 %v9697_v52, %v9698_v31  ;;  %v2390_v35 = vmax.f32 %v2358_v24, %v8128_v61  ;;  %v8675_v42 = vmax.f32 %v2966_v15, %v3095_v9  ;;  %v2541_v43 = vrot.slane %v8629_v13, 6  ;;  %v9704_v52 = vld [vmem:[#allocation4_spill] sm:$0xff] }
 0x2b2   : > { %v2702_v10 = vrot.slane %v8629_v13, 7  ;;  %v3189_v18 = vmax.f32 %v3157_v12, %v8549_v48  ;;  %v2806_v17 = vmax.f32 %v2645_v38, %v2774_v49  ;;  %v2359_v51 = vmax.f32 %v8276_v19, %v9693_v21 }
 0x2b3   : > { %v8670_v20 = vmax.f32 %v9699_v53, %v2231_v47  ;;  %v2422_v0 = vmax.f32 %v2390_v35, %v8283_v34  ;;  %v3158_v58 = vmax.f32 %v8640_v41, %v8521_v36  ;;  %v3251_v23 = vmax.f32 %v3219_v14, %v8675_v42  ;;  %v9700_v36 = vld [vmem:[#allocation6_spill] sm:$0xff]  ;;  %v9701_v14 = vld [vmem:[#allocation16_spill] sm:$0xff] }
 0x2b4   : > { %v2542_v33 = vsel %vm884_vm2, %v2539_v50, %v2541_v43  ;;  %v2703_v26 = vsel %vm1046_vm3, %v2700_v30, %v2702_v10  ;;  %v3221_v56 = vmax.f32 %v3189_v18, %v8675_v42  ;;  %v2967_v55 = vmax.f32 %v2806_v17, %v2862_v28  ;;  %v8718_v28 = vpop.f32.mrf.mxu0 }
 0x2b5   : > { %v2454_v47 = vmax.f32 %v2422_v0, %v8670_v20  ;;  %v2646_v24 = vmax.f32 %v8629_v13, %v2542_v33  ;;  %v2391_v12 = vmax.f32 %v2359_v51, %v8154_v3  ;;  %5528 = vmatmul.mubr.msk.f32.gmra.mxu0 %vm3269_vm4, %v3251_v23  ;;  %v8696_v21 = vmax.f32 %v3158_v58, %v8572_v39 }
 0x2b6   : > { %v9703_v62 = vmax.f32 %v9701_v14, %v9702_v16  ;;  %v2360_v30 = vmax.f32 %v8283_v34, %v8128_v61  ;;  %v3159_v13 = vmax.f32 %v8675_v42, %v8549_v48  ;;  %v8708_v59 = vmax.f32 %v2967_v55, %v3023_v32 }
 0x2b7   : > { %v2807_v1 = vmax.f32 %v2646_v24, %v2703_v26  ;;  %v2863_v46 = vrot.slane %v2454_v47, 1  ;;  %v3024_v2 = vrot.slane %v2454_v47, 2  ;;  %5489 = vmatprep.mubr.msk.f32.mxu1 %vm3269_vm4, %v2454_v47  ;;  %v2423_v9 = vmax.f32 %v2391_v12, %v9694_v22  ;;  %v8739_v26 = vpop.f32.mrf.mxu0 }
 0x2b8   : > { %v8702_v50 = vmax.f32 %v9703_v62, %v9700_v36  ;;  %v2543_v11 = vrot.slane %v2454_v47, 6  ;;  %v2704_v4 = vrot.slane %v2454_v47, 7  ;;  %v2392_v15 = vmax.f32 %v2360_v30, %v8263_v25 }
 0x2b9   : > { %v3252_v54 = vmax.f32 %v3220_v40, %v8708_v59  ;;  %v2864_v61 = vsel %vm1206_vm7, %v2861_v37, %v2863_v46  ;;  %v3025_v49 = vsel %vm1368_vm9, %v3022_v60, %v3024_v2  ;;  %v3222_v48 = vmax.f32 %v8696_v21, %v8708_v59 }
 0x2ba   : > { %v2936_v38 = vsel %vm839_vm6, %v2864_v61, -3.4028235e+38  ;;  %v3097_v32 = vsel %vm847_vm10, %v3025_v49, -3.4028235e+38  ;;  %v2455_v31 = vmax.f32 %v2423_v9, %v9704_v52  ;;  %v2544_v53 = vsel %vm884_vm2, %v2541_v43, %v2543_v11 }
 0x2bb   : > { %5530 = vmatprep.mubr.msk.f32.mxu0 %vm3269_vm4, %v3252_v54  ;;  %v2968_v37 = vmax.f32 %v2807_v1, %v2936_v38  ;;  %v2615_v60 = vsel %vm820_vm5, %v2544_v53, -3.4028235e+38  ;;  %v2705_v40 = vsel %vm1046_vm3, %v2702_v10, %v2704_v4  ;;  %v2424_v35 = vmax.f32 %v2392_v15, %v8670_v20  ;;  %v8741_v10 = vpop.f32.mrf.mxu1 }
 0x2bc   : > { %v2647_v18 = vmax.f32 %v2454_v47, %v2615_v60  ;;  %v2776_v17 = vsel %vm828_vm8, %v2705_v40, -3.4028235e+38  ;;  %v2865_v0 = vrot.slane %v2455_v31, 1  ;;  %v3026_v51 = vrot.slane %v2455_v31, 2  ;;  %5490 = vmatmul.mubr.msk.f32.gmra.mxu1 %vm3269_vm4, %v2455_v31 }
 0x2bd   : > { %v8734_v58 = vmax.f32 %v2968_v37, %v3097_v32  ;;  %v8737_v43 = vmax.f32 %v2424_v35, %v8702_v50  ;;  %v2545_v23 = vrot.slane %v2455_v31, 6  ;;  %v2706_v33 = vrot.slane %v2455_v31, 7 }
 0x2be   : > { %v2808_v55 = vmax.f32 %v2647_v18, %v2776_v17  ;;  %v2866_v47 = vsel %vm1206_vm7, %v2863_v46, %v2865_v0  ;;  %v3027_v24 = vsel %vm1368_vm9, %v3024_v2, %v3026_v51  ;;  %v3191_v12 = vmax.f32 %v3159_v13, %v8593_v27 }
 0x2bf   : > { %v3253_v21 = vmax.f32 %v3221_v56, %v8734_v58  ;;  %v2546_v36 = vsel %vm884_vm2, %v2543_v11, %v2545_v23  ;;  %v2707_v14 = vsel %vm1046_vm3, %v2704_v4, %v2706_v33  ;;  %v2867_v16 = vrot.slane %v8737_v43, 1  ;;  %5492 = vmatprep.mubr.msk.f32.mxu1 %vm3269_vm4, %v8737_v43  ;;  %v8760_v11 = vpop.f32.mrf.mxu0  ;;  %v8762_v4 = vpop.f32.mrf.mxu1 }
 0x2c0   : > { %v2969_v62 = vmax.f32 %v2808_v55, %v2866_v47  ;;  %v2648_v30 = vmax.f32 %v2455_v31, %v2546_v36  ;;  %v3028_v1 = vrot.slane %v8737_v43, 2  ;;  %v3223_v46 = vmax.f32 %v3191_v12, %v8734_v58  ;;  %v9705_v55 = vld [vmem:[#allocation19_spill] sm:$0xff] }
 0x2c1   : > { %5531 = vmatmul.mubr.msk.f32.gmra.mxu0 %vm3269_vm4, %v3253_v21  ;;  %v2868_v13 = vsel %vm1206_vm7, %v2865_v0, %v2867_v16  ;;  %v2361_v56 = vmax.f32 %v9694_v22, %v8154_v3  ;;  %v2547_v2 = vrot.slane %v8737_v43, 6  ;;  %v2708_v9 = vrot.slane %v8737_v43, 7 }
 0x2c2   : > { %v8764_v15 = vmax.f32 %v2969_v62, %v3027_v24  ;;  %v2809_v54 = vmax.f32 %v2648_v30, %v2707_v14  ;;  %v2938_v61 = vsel %vm839_vm6, %v2868_v13, -3.4028235e+38  ;;  %v3029_v49 = vsel %vm1368_vm9, %v3026_v51, %v3028_v1  ;;  %v8785_v51 = vpop.f32.mrf.mxu0 }
 0x2c3   : > { %v3099_v38 = vsel %vm847_vm10, %v3029_v49, -3.4028235e+38  ;;  %v2393_v3 = vmax.f32 %v2361_v56, %v8276_v19  ;;  %v2548_v32 = vsel %vm884_vm2, %v2545_v23, %v2547_v2  ;;  %v2709_v31 = vsel %vm1046_vm3, %v2706_v33, %v2708_v9 }
 0x2c4   : > { %v3254_v53 = vmax.f32 %v3222_v48, %v8764_v15  ;;  %v2970_v37 = vmax.f32 %v2809_v54, %v2938_v61  ;;  %v2617_v60 = vsel %vm820_vm5, %v2548_v32, -3.4028235e+38  ;;  %v2778_v40 = vsel %vm828_vm8, %v2709_v31, -3.4028235e+38  ;;  %v8787_v48 = vpop.f32.mrf.mxu1 }
 0x2c5   : > { %v2425_v35 = vmax.f32 %v2393_v3, %v9704_v52  ;;  %v2649_v18 = vmax.f32 %v8737_v43, %v2617_v60  ;;  %v3160_v17 = vmax.f32 %v8708_v59, %v8572_v39  ;;  %v2362_v0 = vmax.f32 %v8670_v20, %v8263_v25 }
 0x2c6   : > { %5533 = vmatprep.mubr.msk.f32.mxu0 %vm3269_vm4, %v3254_v53  ;;  %v8790_v23 = vmax.f32 %v2970_v37, %v3099_v38  ;;  %v3161_v33 = vmax.f32 %v8734_v58, %v8593_v27  ;;  %v2363_v43 = vmax.f32 %v9704_v52, %v8276_v19  ;;  %v3162_v39 = vmax.f32 %v8764_v15, %v8640_v41  ;;  %v8812_v13 = vpop.f32.mrf.mxu1 }
 0x2c7   : > { %v2457_v47 = vmax.f32 %v2425_v35, %v9705_v55  ;;  %v2810_v25 = vmax.f32 %v2649_v18, %v2778_v40  ;;  %v3192_v24 = vmax.f32 %v3160_v17, %v8640_v41  ;;  %v2394_v12 = vmax.f32 %v2362_v0, %v8283_v34  ;;  %v8810_v41 = vpop.f32.mrf.mxu0 }
 0x2c8   : > { %v3255_v21 = vmax.f32 %v3223_v46, %v8790_v23  ;;  %v3193_v36 = vmax.f32 %v3161_v33, %v8675_v42  ;;  %v2395_v14 = vmax.f32 %v2363_v43, %v9694_v22  ;;  %v8805_v27 = vmax.f32 %v3162_v39, %v8708_v59 }
 0x2c9   : > { %v2869_v19 = vrot.slane %v2457_v47, 1  ;;  %v3030_v52 = vrot.slane %v2457_v47, 2  ;;  %v3224_v62 = vmax.f32 %v3192_v24, %v8764_v15  ;;  %v2426_v30 = vmax.f32 %v2394_v12, %v8702_v50  ;;  %5493 = vmatmul.mubr.msk.f32.gmra.mxu1 %vm3269_vm4, %v2457_v47 }
 0x2ca   : > { %5534 = vmatmul.mubr.msk.f32.gmra.mxu0 %vm3269_vm4, %v3255_v21  ;;  %v2549_v46 = vrot.slane %v2457_v47, 6  ;;  %v2710_v56 = vrot.slane %v2457_v47, 7  ;;  %v3225_v22 = vmax.f32 %v3193_v36, %v8790_v23  ;;  %v2427_v54 = vmax.f32 %v2395_v14, %v9705_v55 }
 0x2cb   : > { %v2870_v61 = vsel %vm1206_vm7, %v2867_v16, %v2869_v19  ;;  %v3031_v49 = vsel %vm1368_vm9, %v3028_v1, %v3030_v52  ;;  %v2458_v38 = vmax.f32 %v2426_v30, -3.4028235e+38  ;;  %v2364_v3 = vmax.f32 %v8702_v50, %v8283_v34  ;;  %v8826_v16 = vpop.f32.mrf.mxu0  ;;  %v8828_v1 = vpop.f32.mrf.mxu1 }
 0x2cc   : > { %v2971_v32 = vmax.f32 %v2810_v25, %v2870_v61  ;;  %v2550_v31 = vsel %vm884_vm2, %v2547_v2, %v2549_v46  ;;  %v2711_v53 = vsel %vm1046_vm3, %v2708_v9, %v2710_v56  ;;  %v8823_v37 = vmax.f32 %v2427_v54, -3.4028235e+38 }
 0x2cd   : > { %v2650_v60 = vmax.f32 %v2457_v47, %v2550_v31  ;;  %v2871_v40 = vrot.slane %v2458_v38, 1  ;;  %v3032_v35 = vrot.slane %v2458_v38, 2  ;;  %v2551_v18 = vrot.slane %v2458_v38, 6  ;;  %5495 = vmatprep.mubr.msk.f32.mxu1 %vm3269_vm4, %v2458_v38  ;;  %v8848_v14 = vpop.f32.mrf.mxu0 }
 0x2ce   : > { %v8830_v17 = vmax.f32 %v2971_v32, %v3031_v49  ;;  %v2712_v34 = vrot.slane %v2458_v38, 7  ;;  %v2873_v50 = vrot.slane %v8823_v37, 1  ;;  %v3034_v2 = vrot.slane %v8823_v37, 2  ;;  %5496 = vmatmul.mubr.msk.f32.gmra.mxu1 %vm3269_vm4, %v8823_v37 }
 0x2cf   : > { %v2811_v9 = vmax.f32 %v2650_v60, %v2711_v53  ;;  %v2872_v0 = vsel %vm1206_vm7, %v2869_v19, %v2871_v40  ;;  %v3033_v33 = vsel %vm1368_vm9, %v3030_v52, %v3032_v35  ;;  %v2552_v43 = vsel %vm884_vm2, %v2549_v46, %v2551_v18  ;;  %v8850_v19 = vpop.f32.mrf.mxu1 }
 0x2d0   : > { %v3256_v39 = vmax.f32 %v3224_v62, %v8830_v17  ;;  %v2940_v55 = vsel %vm839_vm6, %v2872_v0, -3.4028235e+38  ;;  %v3101_v47 = vsel %vm847_vm10, %v3033_v33, -3.4028235e+38  ;;  %v2619_v25 = vsel %vm820_vm5, %v2552_v43, -3.4028235e+38 }
 0x2d1   : > { %v2972_v24 = vmax.f32 %v2811_v9, %v2940_v55  ;;  %v2651_v12 = vmax.f32 %v2458_v38, %v2619_v25  ;;  %v2713_v21 = vsel %vm1046_vm3, %v2710_v56, %v2712_v34  ;;  %v2874_v36 = vsel %vm1206_vm7, %v2871_v40, %v2873_v50  ;;  %v8868_v40 = vpop.f32.mrf.mxu0 }
 0x2d2   : > { %5536 = vmatprep.mubr.msk.f32.mxu0 %vm3269_vm4, %v3256_v39  ;;  %v2780_v52 = vsel %vm828_vm8, %v2713_v21, -3.4028235e+38  ;;  %v3035_v62 = vsel %vm1368_vm9, %v3032_v35, %v3034_v2  ;;  %v3226_v30 = vmax.f32 %v8805_v27, %v8830_v17  ;;  %v2396_v46 = vmax.f32 %v2364_v3, %v8670_v20  ;;  %v8870_v20 = vpop.f32.mrf.mxu1 }
 0x2d3   : > { %v8859_v54 = vmax.f32 %v2972_v24, %v3101_v47  ;;  %v2812_v56 = vmax.f32 %v2651_v12, %v2780_v52  ;;  %v2553_v61 = vrot.slane %v8823_v37, 6  ;;  %v2714_v49 = vrot.slane %v8823_v37, 7  ;;  %v8889_v12 = vpop.f32.mrf.mxu0 }
 0x2d4   : > { %v2428_v38 = vmax.f32 %v2396_v46, -3.4028235e+38  ;;  %v3163_v32 = vmax.f32 %v8790_v23, %v8675_v42  ;;  %v3164_v0 = vmax.f32 %v8830_v17, %v8708_v59  ;;  %v8891_v21 = vpop.f32.mrf.mxu1 }
 0x2d5   : > { %v3257_v31 = vmax.f32 %v3225_v22, %v8859_v54  ;;  %v2973_v53 = vmax.f32 %v2812_v56, %v2874_v36  ;;  %v2554_v60 = vsel %vm884_vm2, %v2551_v18, %v2553_v61  ;;  %v2715_v27 = vsel %vm1046_vm3, %v2712_v34, %v2714_v49  ;;  %v9706_v22 = vld [vmem:[#allocation23_spill] sm:$0xff]  ;;  %v8914_v5 = vpop.f32.mrf.mxu0 }
 0x2d6   : > { %v2460_v3 = vmax.f32 %v2428_v38, -3.4028235e+38  ;;  %v2652_v35 = vmax.f32 %v8823_v37, %v2554_v60  ;;  %v3195_v9 = vmax.f32 %v3163_v32, %v8734_v58  ;;  %v2877_v18 = vrot.slane %v9706_v22, 1 }
 0x2d7   : > { %5537 = vmatmul.mubr.msk.f32.gmra.mxu0 %vm3269_vm4, %v3257_v31  ;;  %v8877_v42 = vmax.f32 %v2973_v53, %v3035_v62  ;;  %v3038_v34 = vrot.slane %v9706_v22, 2  ;;  %v3165_v33 = vmax.f32 %v8859_v54, %v8734_v58  ;;  %v3196_v24 = vmax.f32 %v3164_v0, %v8764_v15 }
 0x2d8   : > { %v2813_v43 = vmax.f32 %v2652_v35, %v2715_v27  ;;  %v2875_v39 = vrot.slane %v2460_v3, 1  ;;  %v3036_v55 = vrot.slane %v2460_v3, 2  ;;  %v3227_v37 = vmax.f32 %v3195_v9, %v8859_v54  ;;  %5498 = vmatprep.mubr.msk.f32.mxu1 %vm3269_vm4, %v2460_v3  ;;  %v5367_v27 = vpop.f32.mrf.mxu1 }
 0x2d9   : > { %v3258_v59 = vmax.f32 %v3226_v30, %v8877_v42  ;;  %v2555_v47 = vrot.slane %v2460_v3, 6  ;;  %v2716_v25 = vrot.slane %v2460_v3, 7  ;;  %5499 = vmatmul.mubr.msk.f32.gmra.mxu1 %vm3269_vm4, %v9706_v22  ;;  %v3228_v38 = vmax.f32 %v3196_v24, %v8877_v42 }
 0x2da   : > { %v2876_v58 = vsel %vm1206_vm7, %v2873_v50, %v2875_v39  ;;  %v3037_v36 = vsel %vm1368_vm9, %v3034_v2, %v3036_v55  ;;  %v9707_v32 = vrot.slane %v7811_v45, 1  ;;  %v9708_v53 = vrot.slane %v9706_v22, 6 }
 0x2db   : > { %5539 = vmatprep.mubr.msk.f32.mxu0 %vm3269_vm4, %v3258_v59  ;;  %v2942_v52 = vsel %vm839_vm6, %v2876_v58, -3.4028235e+38  ;;  %v2556_v62 = vsel %vm884_vm2, %v2553_v61, %v2555_v47  ;;  %v2717_v30 = vsel %vm1046_vm3, %v2714_v49, %v2716_v25  ;;  %v3103_v2 = vsel %vm847_vm10, %v3037_v36, -3.4028235e+38 }
 0x2dc   : > { %v2974_v46 = vmax.f32 %v2813_v43, %v2942_v52  ;;  %v2621_v56 = vsel %vm820_vm5, %v2556_v62, -3.4028235e+38  ;;  %v2912_v50 = vsel %vm1206_vm7, %v2877_v18, %v9707_v32  ;;  %v2557_v61 = vsel %vm884_vm2, %v2555_v47, %v9708_v53 }
 0x2dd   : > { %v2653_v31 = vmax.f32 %v2460_v3, %v2621_v56  ;;  %v9709_v49 = vrot.slane %v7811_v45, 2  ;;  %v2782_v9 = vsel %vm828_vm8, %v2717_v30, -3.4028235e+38  ;;  %v2654_v0 = vmax.f32 %v9706_v22, %v2557_v61 }
 0x2de   : > { %v3135_v35 = vmax.f32 %v2974_v46, %v3103_v2  ;;  %v3197_v43 = vmax.f32 %v3165_v33, %v8790_v23  ;;  %v2878_v59 = vsel %vm1206_vm7, %v2875_v39, %v2877_v18  ;;  %v9710_v47 = vrot.slane %v9706_v22, 7  ;;  %v8930_v46 = vpop.f32.mrf.mxu0  ;;  %v3443_v18 = vpop.f32.mrf.mxu1 }
 0x2df   : > { %v3073_v60 = vsel %vm1368_vm9, %v3038_v34, %v9709_v49  ;;  %v2814_v3 = vmax.f32 %v2653_v31, %v2782_v9  ;;  %v3166_v24 = vmax.f32 %v8877_v42, %v8764_v15  ;;  %v2944_v30 = vsel %vm839_vm6, %v2912_v50, -3.4028235e+38 }
 0x2e0   : > { %v2718_v45 = vsel %vm1046_vm3, %v2716_v25, %v9710_v47  ;;  %v3259_v58 = vmax.f32 %v3227_v37, %v3135_v35  ;;  %v3229_v52 = vmax.f32 %v3197_v43, %v3135_v35  ;;  %v3167_v6 = vmax.f32 %v3135_v35, %v8790_v23  ;;  %v8944_v31 = vpop.f32.mrf.mxu0 }
 0x2e1   : > { %v2815_v36 = vmax.f32 %v2654_v0, %v2718_v45  ;;  %v2975_v62 = vmax.f32 %v2814_v3, %v2878_v59  ;;  %v3198_v33 = vmax.f32 %v3166_v24, %v8830_v17  ;;  %v3039_v22 = vsel %vm1368_vm9, %v3036_v55, %v3038_v34 }
 0x2e2   : > { %5540 = vmatmul.mubr.msk.f32.gmra.mxu0 %vm3269_vm4, %v3259_v58  ;;  %v3199_v15 = vmax.f32 %v3167_v6, %v8859_v54  ;;  %v3105_v23 = vsel %vm847_vm10, %v3073_v60, -3.4028235e+38  ;;  %v8938_v25 = vadd.f32 %v8810_v41, %v5367_v27  ;;  %v8941_v56 = vadd.f32 %v8826_v16, %v3443_v18  ;;  %v8950_v16 = vpop.f32.mrf.mxu1 }
 0x2e3   : > { %v2976_v39 = vmax.f32 %v2815_v36, %v2944_v30  ;;  %v3136_v37 = vmax.f32 %v2975_v62, %v3039_v22 }
 0x2e5   : > { %v3137_v8 = vmax.f32 %v2976_v39, %v3105_v23  ;;  %v3260_v32 = vmax.f32 %v3228_v38, %v3136_v37  ;;  %v3230_v50 = vmax.f32 %v3198_v33, %v3136_v37  ;;  %v3168_v2 = vmax.f32 %v3136_v37, %v8830_v17  ;;  %v8953_v17 = vpop.f32.mrf.mxu0 }
 0x2e7   : > { %v3261_v34 = vmax.f32 %v3229_v52, %v3137_v8  ;;  %v3231_v55 = vmax.f32 %v3199_v15, %v3137_v8  ;;  %v3169_v53 = vmax.f32 %v3137_v8, %v8859_v54  ;;  %5542 = vmatprep.mubr.msk.f32.mxu0 %vm3269_vm4, %v3260_v32  ;;  %v3262_v44 = vmax.f32 %v3230_v50, -3.4028235e+38  ;;  %v8956_v54 = vpop.f32.mrf.mxu1 }
 0x2e8   : > { %v3200_v41 = vmax.f32 %v3168_v2, %v8877_v42  ;;  %v8959_v42 = vpop.f32.mrf.mxu0 }
 0x2e9   : > { %5543 = vmatmul.mubr.msk.f32.gmra.mxu0 %vm3269_vm4, %v3261_v34  ;;  %v3201_v61 = vmax.f32 %v3169_v53, %v3135_v35  ;;  %v3263_v49 = vmax.f32 %v3231_v55, -3.4028235e+38  ;;  %v8962_v35 = vpop.f32.mrf.mxu1 }
 0x2ea   : > { %5545 = vmatprep.mubr.msk.f32.mxu0 %vm3269_vm4, %v3262_v44  ;;  %v3232_v38 = vmax.f32 %v3200_v41, -3.4028235e+38  ;;  %v8964_v0 = vpop.f32.mrf.mxu0 }
 0x2eb   : > { %v3233_v60 = vmax.f32 %v3201_v61, -3.4028235e+38  ;;  %v8966_v43 = vpop.f32.mrf.mxu1 }
 0x2ec   : > { %v3264_v27 = vmax.f32 %v3232_v38, -3.4028235e+38  ;;  %v8968_v3 = vpop.f32.mrf.mxu0 }
 0x2ed   : > { %5546 = vmatmul.mubr.msk.f32.gmra.mxu0 %vm3269_vm4, %v3263_v49  ;;  %v3265_v9 = vmax.f32 %v3233_v60, -3.4028235e+38  ;;  %v8970_v59 = vpop.f32.mrf.mxu1 }
 0x2ee   : > { %5548 = vmatprep.mubr.msk.f32.mxu0 %vm3269_vm4, %v3264_v27  ;;  %v8972_v47 = vpop.f32.mrf.mxu0 }
 0x2ef   : > { %v8974_v45 = vpop.f32.mrf.mxu1 }
 0x2f0   : > { %v8976_v24 = vpop.f32.mrf.mxu0 }
 0x2f1   : > { %5549 = vmatmul.mubr.msk.f32.gmra.mxu0 %vm3269_vm4, %v3265_v9  ;;  %v8978_v58 = vpop.f32.mrf.mxu1 }
 0x2f2   : > { %v8980_v36 = vpop.f32.mrf.mxu0 }
 0x2f3   : > { %v8982_v52 = vpop.f32.mrf.mxu1 }
 0x2f4   : > { %v8984_v6 = vpop.f32.mrf.mxu0 }
 0x2f5   : > { %v8986_v62 = vpop.f32.mrf.mxu1 }
 0x2f6   : > { %v8988_v30 = vpop.f32.mrf.mxu0 }
 0x2f7   : > { %v8990_v33 = vpop.f32.mrf.mxu1 }
 0x2f8   : > { %v8992_v18 = vpop.f32.mrf.mxu0 }
 0x2f9   : > { %9711 = vst [vmem:[#allocation25_spill] sm:$0xff] %v8992_v18  ;;  %v8994_v22 = vpop.f32.mrf.mxu1 }
 0x2fa   : > { %v8996_v39 = vpop.f32.mrf.mxu0 }
 0x2fb   : > { %9712 = vst [vmem:[#allocation26_spill] sm:$0xff] %v8996_v39  ;;  %v8998_v15 = vpop.f32.mrf.mxu1  ;;  %v3696_v39 = vadd.f32 %v8647_v57, %v8762_v4 }
 0x2fc   : > { %v9000_v37 = vpop.f32.mrf.mxu0 }
 0x2fd   : > { %9713 = vst [vmem:[#allocation3_spill] sm:$0xff] %v9000_v37 }
 0x2fe   : > { %v9004_v8 = vpop.f32.mrf.mxu0 }
 0x2ff   : > { %9714 = vst [vmem:[#allocation14_spill] sm:$0xff] %v9004_v8 }
 0x300   : > { %v9008_v50 = vpop.f32.mrf.mxu0 }
 0x301   : > { %9715 = vst [vmem:[#allocation7_spill] sm:$0xff] %v9008_v50  ;;  %v3701_v50 = vadd.f32 %v8624_v29, %v8741_v10 }
 0x302   : > { %v9012_v34 = vpop.f32.mrf.mxu0 }
 0x303   : > { %9716 = vst [vmem:[#allocation8_spill] sm:$0xff] %v9012_v34 }
 0x304   : > { %v3845_v44 = vpop.f32.mrf.mxu0 }
 0x306   : > { %v5505_v61 = vpop.f32.mrf.mxu0 }
 0x307   : > { %v9002_v23 = vpop.f32.mrf.mxu1 }
 0x308   : > { %v4347_v60 = vpop.f32.mrf.mxu0 }
 0x309   : > { %v9006_v32 = vpop.f32.mrf.mxu1 }
 0x31c   : > { %v5508_v34 = vpop.f32.mrf.mxu0 }
 0x31d   : > { %v9010_v2 = vpop.f32.mrf.mxu1 }
 0x31f   : > { %v9014_v55 = vpop.f32.mrf.mxu1 }
 0x320   : > { %9717 = vst [vmem:[#allocation5_spill] sm:$0xff] %v9014_v55 }
 0x321   : > { %v9016_v53 = vpop.f32.mrf.mxu1 }
 0x322   : > { %9718 = vst [vmem:[#allocation9_spill] sm:$0xff] %v9016_v53  ;;  %v4357_v53 = vpop.f32.mrf.mxu0 }
 0x323   : > { %v9018_v41 = vpop.f32.mrf.mxu1 }
 0x324   : > { %9719 = vst [vmem:[#allocation10_spill] sm:$0xff] %v9018_v41 }
 0x325   : > { %v9020_v38 = vpop.f32.mrf.mxu1 }
 0x326   : > { %9720 = vst [vmem:[#allocation17_spill] sm:$0xff] %v9020_v38  ;;  %v9035_v38 = vld [vmem:[%s9320_s4] ss:$0 sm:$0xff] }
 0x327   : > { %v9022_v49 = vpop.f32.mrf.mxu1 }
 0x328   : > { %9721 = vst [vmem:[#allocation22_spill] sm:$0xff] %v9022_v49 }
 0x329   : > { %v9024_v27 = vpop.f32.mrf.mxu1 }
 0x32a   : > { %9722 = vst [vmem:[#allocation18_spill] sm:$0xff] %v9024_v27  ;;  %v3711_v27 = vadd.f32 %v8673_v63, %v8787_v48 }
 0x32b   : > { %v3553_v9 = vpop.f32.mrf.mxu1 }
 0x32c   : > { %v9028_v8 = vadd.f32 %v3845_v44, %v3553_v9  ;;  %v3706_v44 = vadd.f32 %v8692_v7, %v8812_v13  ;;  %v3716_v7 = vadd.f32 %v8739_v26, %v8850_v19  ;;  %v3726_v19 = vadd.f32 %v8785_v51, %v8891_v21 }
 0x32d   : > { %v5455_v37 = vpop.f32.mrf.mxu1 }
 0x32e   : > { %9723 = vst [vmem:[#allocation2_spill] sm:$0xff] %v9028_v8  ;;  %v4149_v41 = vadd.f32 %v5455_v37, %v3701_v50 }
 0x32f   : > { %v3989_v49 = vpop.f32.mrf.mxu1 }
 0x330   : > { %v4507_v18 = vadd.f32 %v5505_v61, %v4149_v41  ;;  %v4148_v29 = vadd.f32 %v3989_v49, %v3696_v39  ;;  %v3721_v39 = vadd.f32 %v8718_v28, %v8828_v1  ;;  %v3731_v49 = vadd.f32 %v8760_v11, %v8870_v20 }
 0x331   : > { %v5458_v10 = vpop.f32.mrf.mxu1 }
 0x332   : > { %v9042_v9 = vadd.f32 %v9035_v38, %v4507_v18  ;;  %v4506_v57 = vadd.f32 %v4347_v60, %v4148_v29  ;;  %v4151_v4 = vadd.f32 %v5458_v10, %v3711_v27  ;;  %v5511_v50 = vpop.f32.mrf.mxu0 }
 0x333   : > { %v3999_v37 = vpop.f32.mrf.mxu1 }
 0x334   : > { %v5101_v8 = vmul.f32 -1.442695, %v9042_v9  ;;  %v9046_v55 = vadd.f32 %v9035_v38, %v4506_v57  ;;  %v4509_v63 = vadd.f32 %v5508_v34, %v4151_v4  ;;  %v4150_v48 = vadd.f32 %v3999_v37, %v3706_v44  ;;  %v4367_v27 = vpop.f32.mrf.mxu0 }
 0x335   : > { %v5461_v13 = vpop.f32.mrf.mxu1 }
 0x336   : > { %5689 = vpow2.f32 %v5101_v8  ;;  %v5100_v18 = vmul.f32 -1.442695, %v9046_v55  ;;  %v9054_v41 = vadd.f32 %v9035_v38, %v4509_v63  ;;  %v4508_v61 = vadd.f32 %v4357_v53, %v4150_v48 }
 0x337   : > { %v4153_v60 = vadd.f32 %v5461_v13, %v3721_v39  ;;  %v4009_v34 = vpop.f32.mrf.mxu1 }
 0x338   : > { %5691 = vpow2.f32 %v5100_v18  ;;  %v5103_v28 = vmul.f32 -1.442695, %v9054_v41  ;;  %v9060_v1 = vadd.f32 %v9035_v38, %v4508_v61  ;;  %v4152_v26 = vadd.f32 %v4009_v34, %v3716_v7 }
 0x339   : > { %v4511_v8 = vadd.f32 %v5511_v50, %v4153_v60  ;;  %v5464_v29 = vpop.f32.mrf.mxu1 }
 0x33a   : > { %5693 = vpow2.f32 %v5103_v28  ;;  %v5102_v53 = vmul.f32 -1.442695, %v9060_v1  ;;  %v4510_v10 = vadd.f32 %v4367_v27, %v4152_v26  ;;  %v4155_v11 = vadd.f32 %v5464_v29, %v3731_v49 }
 0x33b   : > { %v9066_v20 = vadd.f32 %v9035_v38, %v4511_v8  ;;  %v4019_v44 = vpop.f32.mrf.mxu1 }
 0x33c   : > { %5695 = vpow2.f32 %v5102_v53  ;;  %v9069_v4 = vadd.f32 %v9035_v38, %v4510_v10  ;;  %v4154_v37 = vadd.f32 %v4019_v44, %v3726_v19 }
 0x33d   : > { %v5105_v63 = vmul.f32 -1.442695, %v9066_v20  ;;  %v5467_v21 = vpop.f32.mrf.mxu1 }
 0x33e   : > { %v5514_v57 = vpop.f32.mrf.mxu0  ;;  %v5104_v48 = vmul.f32 -1.442695, %v9069_v4  ;;  %v4157_v49 = vadd.f32 %v5467_v21, %v8938_v25  ;;  %v3751_v21 = vadd.f32 %v8848_v14, %v8950_v16 }
 0x33f   : > { %v4513_v51 = vadd.f32 %v5514_v57, %v4155_v11  ;;  %5697 = vpow2.f32 %v5105_v63  ;;  %v4029_v13 = vpop.f32.mrf.mxu1 }
 0x340   : > { %v4377_v50 = vpop.f32.mrf.mxu0  ;;  %5699 = vpow2.f32 %v5104_v48  ;;  %v4156_v27 = vadd.f32 %v4029_v13, %v8941_v56 }
 0x341   : > { %v9074_v39 = vadd.f32 %v9035_v38, %v4513_v51  ;;  %v4512_v7 = vadd.f32 %v4377_v50, %v4154_v37  ;;  %v5470_v57 = vpop.f32.mrf.mxu1 }
 0x343   : > { %v5107_v18 = vmul.f32 -1.442695, %v9074_v39  ;;  %v9078_v61 = vadd.f32 %v9035_v38, %v4512_v7  ;;  %v5690_v60 = vpop.eup %5689  ;;  %v4039_v7 = vpop.f32.mrf.mxu1 }
 0x344   : > { %v4674_v26 = vadd.f32 1.0, %v5690_v60  ;;  %v4159_v60 = vadd.f32 %v5470_v57, %v3751_v21  ;;  %v3761_v21 = vadd.f32 %v8889_v12, %v8962_v35 }
 0x345   : > { %5701 = vpow2.f32 %v5107_v18  ;;  %v5106_v34 = vmul.f32 -1.442695, %v9078_v61  ;;  %v5692_v19 = vpop.eup %5691  ;;  %v3746_v18 = vadd.f32 %v8868_v40, %v8956_v54 }
 0x346   : > { %v5517_v28 = vpop.f32.mrf.mxu0  ;;  %v4673_v53 = vadd.f32 1.0, %v5692_v19 }
 0x347   : > { %5703 = vpow2.f32 %v5106_v34  ;;  %v4515_v8 = vadd.f32 %v5517_v28, %v4157_v49  ;;  %v5694_v10 = vpop.eup %5693 }
 0x348   : > { %v4387_v29 = vpop.f32.mrf.mxu0  ;;  %5705 = vrcp.f32 %v4674_v26  ;;  %v4676_v25 = vadd.f32 1.0, %v5694_v10 }
 0x349   : > { %v9084_v11 = vadd.f32 %v9035_v38, %v4515_v8  ;;  %v4514_v44 = vadd.f32 %v4387_v29, %v4156_v27  ;;  %5707 = vrcp.f32 %v4673_v53  ;;  %v5696_v37 = vpop.eup %5695  ;;  %v4158_v27 = vadd.f32 %v4039_v7, %v3746_v18 }
 0x34a   : > { %5709 = vrcp.f32 %v4676_v25  ;;  %v4675_v51 = vadd.f32 1.0, %v5696_v37  ;;  %v3756_v18 = vadd.f32 %v8914_v5, %v8966_v43 }
 0x34b   : > { %v5109_v63 = vmul.f32 -1.442695, %v9084_v11  ;;  %v9088_v56 = vadd.f32 %v9035_v38, %v4514_v44  ;;  %v5473_v44 = vpop.f32.mrf.mxu1 }
 0x34c   : > { %v5698_v48 = vpop.eup %5697 }
 0x34d   : > { %5711 = vpow2.f32 %v5109_v63  ;;  %v5108_v50 = vmul.f32 -1.442695, %v9088_v56  ;;  %v5700_v13 = vpop.eup %5699  ;;  %v4678_v49 = vadd.f32 1.0, %v5698_v48  ;;  %v4049_v7 = vpop.f32.mrf.mxu1 }
 0x34e   : > { %5713 = vrcp.f32 %v4675_v51  ;;  %v4677_v34 = vadd.f32 1.0, %v5700_v13 }
 0x34f   : > { %5715 = vpow2.f32 %v5108_v50 }
 0x350   : > { %5717 = vrcp.f32 %v4678_v49 }
 0x351   : > { %5719 = vrcp.f32 %v4677_v34  ;;  %v4160_v34 = vadd.f32 %v4049_v7, %v3756_v18 }
 0x352   : > { %v5702_v28 = vpop.eup %5701  ;;  %v5520_v26 = vpop.f32.mrf.mxu0 }
 0x353   : > { %v4680_v14 = vadd.f32 1.0, %v5702_v28  ;;  %v4517_v16 = vadd.f32 %v5520_v26, %v4159_v60  ;;  %v5476_v26 = vpop.f32.mrf.mxu1 }
 0x354   : > { %v5704_v19 = vpop.eup %5703  ;;  %v4397_v8 = vpop.f32.mrf.mxu0 }
 0x355   : > { %v5706_v29 = vpop.eup %5705  ;;  %5721 = vrcp.f32 %v4680_v14  ;;  %v4679_v40 = vadd.f32 1.0, %v5704_v19  ;;  %v9103_v54 = vadd.f32 %v9035_v38, %v4517_v16  ;;  %v4516_v53 = vadd.f32 %v4397_v8, %v4158_v27 }
 0x356   : > { %v4770_v10 = vmul.f32 %v5706_v29, %v9042_v9  ;;  %v5708_v25 = vpop.eup %5707  ;;  %v3771_v29 = vadd.f32 %v8930_v46, %v8970_v59 }
 0x357   : > { %5723 = vrcp.f32 %v4679_v40  ;;  %v5111_v57 = vmul.f32 -1.442695, %v9103_v54  ;;  %v9108_v37 = vadd.f32 %v9035_v38, %v4516_v53  ;;  %v4769_v63 = vmul.f32 %v5708_v25, %v9046_v55  ;;  %v5710_v51 = vpop.eup %5709 }
 0x358   : > { %4803 = vst.msk [vmem:[%s9100_s17 + $0x8] sm:$0xff] %vm4801_vm11, %v4770_v10  ;;  %v4772_v48 = vmul.f32 %v5710_v51, %v9054_v41  ;;  %v4161_v55 = vadd.f32 %v5473_v44, %v3761_v21  ;;  %v3766_v44 = vadd.f32 %v8944_v31, %v8974_v45  ;;  %v4163_v25 = vadd.f32 %v5476_v26, %v3771_v29 }
 0x359   : > { %5725 = vpow2.f32 %v5111_v57  ;;  %v5110_v9 = vmul.f32 -1.442695, %v9108_v37  ;;  %4802 = vst.msk [vmem:[%s9100_s17] sm:$0xff] %vm4801_vm11, %v4769_v63 }
 0x35a   : > { %v5712_v50 = vpop.eup %5711  ;;  %4805 = vst.msk [vmem:[%s9100_s17 + $0x18] sm:$0xff] %vm4801_vm11, %v4772_v48 }
 0x35b   : > { %v5714_v13 = vpop.eup %5713  ;;  %v4682_v49 = vadd.f32 1.0, %v5712_v50  ;;  %5727 = vpow2.f32 %v5110_v9 }
 0x35c   : > { %v5716_v60 = vpop.eup %5715  ;;  %v4771_v12 = vmul.f32 %v5714_v13, %v9060_v1 }
 0x35d   : > { %5729 = vrcp.f32 %v4682_v49  ;;  %v4681_v35 = vadd.f32 1.0, %v5716_v60  ;;  %v5718_v27 = vpop.eup %5717 }
 0x35e   : > { %v5523_v41 = vpop.f32.mrf.mxu0  ;;  %4804 = vst.msk [vmem:[%s9100_s17 + $0x10] sm:$0xff] %vm4801_vm11, %v4771_v12  ;;  %v5720_v28 = vpop.eup %5719  ;;  %v4774_v5 = vmul.f32 %v5718_v27, %v9066_v20  ;;  %v3776_v27 = vadd.f32 %v8959_v42, %v8982_v52 }
 0x35f   : > { %5731 = vrcp.f32 %v4681_v35  ;;  %v4519_v43 = vadd.f32 %v5523_v41, %v4161_v55  ;;  %v4773_v16 = vmul.f32 %v5720_v28, %v9069_v4  ;;  %v4059_v4 = vpop.f32.mrf.mxu1 }
 0x360   : > { %v4407_v14 = vpop.f32.mrf.mxu0  ;;  %4807 = vst.msk [vmem:[%s9100_s17 + $0x28] sm:$0xff] %vm4801_vm11, %v4774_v5 }
 0x361   : > { %v9131_v1 = vadd.f32 %v9035_v38, %v4519_v43  ;;  %v4518_v19 = vadd.f32 %v4407_v14, %v4160_v34  ;;  %4806 = vst.msk [vmem:[%s9100_s17 + $0x20] sm:$0xff] %vm4801_vm11, %v4773_v16  ;;  %v5479_v60 = vpop.f32.mrf.mxu1 }
 0x362   : > { %v5722_v8 = vpop.eup %5721 }
 0x363   : > { %v4776_v20 = vmul.f32 %v5722_v8, %v9074_v39  ;;  %v5113_v40 = vmul.f32 -1.442695, %v9131_v1  ;;  %v9140_v53 = vadd.f32 %v9035_v38, %v4518_v19  ;;  %v4162_v39 = vadd.f32 %v4059_v4, %v3766_v44  ;;  %v4069_v35 = vpop.f32.mrf.mxu1 }
 0x364   : > { %v5724_v10 = vpop.eup %5723 }
 0x365   : > { %4809 = vst.msk [vmem:[%s9100_s17 + $0x38] sm:$0xff] %vm4801_vm11, %v4776_v20  ;;  %v4775_v46 = vmul.f32 %v5724_v10, %v9078_v61  ;;  %5733 = vpow2.f32 %v5113_v40  ;;  %v5112_v59 = vmul.f32 -1.442695, %v9140_v53  ;;  %v5482_v19 = vpop.f32.mrf.mxu1 }
 0x366   : > { %v5726_v57 = vpop.eup %5725 }
 0x367   : > { %v5526_v63 = vpop.f32.mrf.mxu0  ;;  %4808 = vst.msk [vmem:[%s9100_s17 + $0x30] sm:$0xff] %vm4801_vm11, %v4775_v46  ;;  %v4684_v51 = vadd.f32 1.0, %v5726_v57  ;;  %5735 = vpow2.f32 %v5112_v59  ;;  %v4079_v4 = vpop.f32.mrf.mxu1 }
 0x368   : > { %v5728_v21 = vpop.eup %5727  ;;  %v4521_v9 = vadd.f32 %v5526_v63, %v4163_v25 }
 0x369   : > { %v4417_v50 = vpop.f32.mrf.mxu0  ;;  %5737 = vrcp.f32 %v4684_v51  ;;  %v4683_v31 = vadd.f32 1.0, %v5728_v21 }
 0x36a   : > { %v5730_v45 = vpop.eup %5729  ;;  %v9151_v61 = vadd.f32 %v9035_v38, %v4521_v9  ;;  %v4520_v48 = vadd.f32 %v4417_v50, %v4162_v39  ;;  %v5485_v39 = vpop.f32.mrf.mxu1 }
 0x36b   : > { %v4778_v7 = vmul.f32 %v5730_v45, %v9084_v11  ;;  %5739 = vrcp.f32 %v4683_v31  ;;  %v3781_v11 = vadd.f32 %v8953_v17, %v8978_v58  ;;  %v3801_v45 = vadd.f32 %v8972_v47, %v8994_v22 }
 0x36c   : > { %v5732_v13 = vpop.eup %5731  ;;  %v5115_v18 = vmul.f32 -1.442695, %v9151_v61  ;;  %v9156_v49 = vadd.f32 %v9035_v38, %v4520_v48  ;;  %v4089_v9 = vpop.f32.mrf.mxu1 }
 0x36d   : > { %4811 = vst.msk [vmem:[%s9100_s17 + $0x48] sm:$0xff] %vm4801_vm11, %v4778_v7  ;;  %v4777_v55 = vmul.f32 %v5732_v13, %v9088_v56  ;;  %v4165_v41 = vadd.f32 %v5479_v60, %v3781_v11  ;;  %v4164_v56 = vadd.f32 %v4069_v35, %v3776_v27 }
 0x36e   : > { %5741 = vpow2.f32 %v5115_v18  ;;  %v5114_v12 = vmul.f32 -1.442695, %v9156_v49  ;;  %v4169_v18 = vadd.f32 %v5485_v39, %v3801_v45  ;;  %v3821_v39 = vadd.f32 %v8988_v30, %v9010_v2 }
 0x36f   : > { %4810 = vst.msk [vmem:[%s9100_s17 + $0x40] sm:$0xff] %vm4801_vm11, %v4777_v55  ;;  %v5488_v55 = vpop.f32.mrf.mxu1 }
 0x370   : > { %5743 = vpow2.f32 %v5114_v12 }
 0x371   : > { %v4099_v35 = vpop.f32.mrf.mxu1 }
 0x372   : > { %v5734_v34 = vpop.eup %5733 }
 0x373   : > { %v4686_v28 = vadd.f32 1.0, %v5734_v34 }
 0x374   : > { %v5736_v5 = vpop.eup %5735 }
 0x375   : > { %v5529_v43 = vpop.f32.mrf.mxu0  ;;  %5745 = vrcp.f32 %v4686_v28  ;;  %v4685_v26 = vadd.f32 1.0, %v5736_v5 }
 0x376   : > { %v5738_v14 = vpop.eup %5737  ;;  %v4523_v16 = vadd.f32 %v5529_v43, %v4165_v41 }
 0x377   : > { %v4427_v8 = vpop.f32.mrf.mxu0  ;;  %v4780_v17 = vmul.f32 %v5738_v14, %v9103_v54  ;;  %5747 = vrcp.f32 %v4685_v26  ;;  %v3791_v54 = vadd.f32 %v8964_v0, %v8986_v62 }
 0x378   : > { %v5740_v58 = vpop.eup %5739  ;;  %v9170_v29 = vadd.f32 %v9035_v38, %v4523_v16  ;;  %v4522_v42 = vadd.f32 %v4427_v8, %v4164_v56 }
 0x379   : > { %4813 = vst.msk [vmem:[%s9100_s17 + $0x58] sm:$0xff] %vm4801_vm11, %v4780_v17  ;;  %v4779_v52 = vmul.f32 %v5740_v58, %v9108_v37  ;;  %v3786_v37 = vadd.f32 %v8968_v3, %v8990_v33  ;;  %v4167_v59 = vadd.f32 %v5482_v19, %v3791_v54  ;;  %v3811_v19 = vadd.f32 %v8980_v36, %v9002_v23 }
 0x37a   : > { %v5117_v20 = vmul.f32 -1.442695, %v9170_v29  ;;  %v9177_v40 = vadd.f32 %v9035_v38, %v4522_v42 }
 0x37b   : > { %v5742_v10 = vpop.eup %5741  ;;  %4812 = vst.msk [vmem:[%s9100_s17 + $0x50] sm:$0xff] %vm4801_vm11, %v4779_v52  ;;  %v4166_v63 = vadd.f32 %v4079_v4, %v3786_v37  ;;  %v4171_v17 = vadd.f32 %v5488_v55, %v3811_v19 }
 0x37c   : > { %v4688_v44 = vadd.f32 1.0, %v5742_v10  ;;  %5749 = vpow2.f32 %v5117_v20  ;;  %v5116_v25 = vmul.f32 -1.442695, %v9177_v40  ;;  %v5491_v16 = vpop.f32.mrf.mxu1 }
 0x37d   : > { %v5744_v46 = vpop.eup %5743 }
 0x37e   : > { %5751 = vrcp.f32 %v4688_v44  ;;  %v4687_v57 = vadd.f32 1.0, %v5744_v46  ;;  %v4109_v8 = vpop.f32.mrf.mxu1 }
 0x37f   : > { %5753 = vpow2.f32 %v5116_v25 }
 0x380   : > { %5755 = vrcp.f32 %v4687_v57 }
 0x381   : > { %v5532_v51 = vpop.f32.mrf.mxu0 }
 0x382   : > { %v4525_v0 = vadd.f32 %v5532_v51, %v4167_v59  ;;  %v5746_v62 = vpop.eup %5745 }
 0x383   : > { %v4437_v21 = vpop.f32.mrf.mxu0  ;;  %v4782_v50 = vmul.f32 %v5746_v62, %v9131_v1  ;;  %v3796_v1 = vadd.f32 %v8976_v24, %v8998_v15  ;;  %v9725_v62 = vld [vmem:[#allocation25_spill] sm:$0xff] }
 0x384   : > { %v9188_v31 = vadd.f32 %v9035_v38, %v4525_v0  ;;  %v4524_v3 = vadd.f32 %v4437_v21, %v4166_v63  ;;  %v5748_v33 = vpop.eup %5747 }
 0x385   : > { %4815 = vst.msk [vmem:[%s9100_s17 + $0x68] sm:$0xff] %vm4801_vm11, %v4782_v50  ;;  %v4781_v48 = vmul.f32 %v5748_v33, %v9140_v53  ;;  %v4168_v47 = vadd.f32 %v4089_v9, %v3796_v1  ;;  %v4173_v50 = vadd.f32 %v5491_v16, %v3821_v39 }
 0x386   : > { %v5119_v7 = vmul.f32 -1.442695, %v9188_v31  ;;  %v9197_v13 = vadd.f32 %v9035_v38, %v4524_v3 }
 0x387   : > { %4814 = vst.msk [vmem:[%s9100_s17 + $0x60] sm:$0xff] %vm4801_vm11, %v4781_v48  ;;  %v9726_v48 = vld [vmem:[#allocation9_spill] sm:$0xff] }
 0x388   : > { %5757 = vpow2.f32 %v5119_v7  ;;  %v5118_v60 = vmul.f32 -1.442695, %v9197_v13  ;;  %v9727_v7 = vld [vmem:[#allocation26_spill] sm:$0xff] }
 0x389   : > { %v5750_v22 = vpop.eup %5749  ;;  %v5494_v10 = vpop.f32.mrf.mxu1 }
 0x38a   : > { %v5535_v12 = vpop.f32.mrf.mxu0  ;;  %5759 = vpow2.f32 %v5118_v60  ;;  %v4690_v53 = vadd.f32 1.0, %v5750_v22  ;;  %v9729_v22 = vld [vmem:[#allocation3_spill] sm:$0xff] }
 0x38b   : > { %v4527_v11 = vadd.f32 %v5535_v12, %v4169_v18  ;;  %v5752_v34 = vpop.eup %5751 }
 0x38c   : > { %v4447_v27 = vpop.f32.mrf.mxu0  ;;  %v5754_v41 = vpop.eup %5753  ;;  %v4784_v24 = vmul.f32 %v5752_v34, %v9151_v61  ;;  %5761 = vrcp.f32 %v4690_v53 }
 0x38d   : > { %v9206_v15 = vadd.f32 %v9035_v38, %v4527_v11  ;;  %v4526_v28 = vadd.f32 %v4447_v27, %v4168_v47  ;;  %v5756_v5 = vpop.eup %5755  ;;  %v4689_v56 = vadd.f32 1.0, %v5754_v41  ;;  %v9728_v47 = vld [vmem:[#allocation10_spill] sm:$0xff]  ;;  %v9730_v41 = vld [vmem:[#allocation17_spill] sm:$0xff] }
 0x38e   : > { %4817 = vst.msk [vmem:[%s9100_s17 + $0x78] sm:$0xff] %vm4801_vm11, %v4784_v24  ;;  %v4783_v43 = vmul.f32 %v5756_v5, %v9156_v49  ;;  %v3806_v49 = vadd.f32 %v8984_v6, %v9006_v32  ;;  %v4119_v32 = vpop.f32.mrf.mxu1  ;;  %v3826_v12 = vadd.f32 %v9729_v22, %v9728_v47  ;;  %v9731_v24 = vld [vmem:[#allocation14_spill] sm:$0xff] }
 0x38f   : > { %v5121_v26 = vmul.f32 -1.442695, %v9206_v15  ;;  %v9213_v14 = vadd.f32 %v9035_v38, %v4526_v28  ;;  %5763 = vrcp.f32 %v4689_v56  ;;  %v3841_v28 = vadd.f32 %v9731_v24, %v9730_v41 }
 0x390   : > { %4816 = vst.msk [vmem:[%s9100_s17 + $0x70] sm:$0xff] %vm4801_vm11, %v4783_v43  ;;  %v4170_v52 = vadd.f32 %v4099_v35, %v3806_v49  ;;  %v5497_v3 = vpop.f32.mrf.mxu1  ;;  %v4174_v43 = vadd.f32 %v4119_v32, %v3826_v12  ;;  %v9732_v49 = vld [vmem:[#allocation22_spill] sm:$0xff] }
 0x391   : > { %5765 = vpow2.f32 %v5121_v26  ;;  %v5120_v61 = vmul.f32 -1.442695, %v9213_v14 }
 0x392   : > { %v4129_v18 = vpop.f32.mrf.mxu1 }
 0x393   : > { %5767 = vpow2.f32 %v5120_v61 }
 0x395   : > { %v5758_v58 = vpop.eup %5757 }
 0x396   : > { %v4692_v42 = vadd.f32 1.0, %v5758_v58 }
 0x397   : > { %v5760_v20 = vpop.eup %5759  ;;  %v5538_v4 = vpop.f32.mrf.mxu0 }
 0x398   : > { %5769 = vrcp.f32 %v4692_v42  ;;  %v4691_v54 = vadd.f32 1.0, %v5760_v20  ;;  %v4529_v44 = vadd.f32 %v5538_v4, %v4171_v17  ;;  %v9733_v17 = vld [vmem:[#allocation7_spill] sm:$0xff]  ;;  %v9734_v20 = vld [vmem:[#allocation18_spill] sm:$0xff]  ;;  %v9735_v4 = vld [vmem:[#allocation8_spill] sm:$0xff] }
 0x399   : > { %v4457_v25 = vpop.f32.mrf.mxu0  ;;  %v5762_v46 = vpop.eup %5761  ;;  %v3836_v58 = vadd.f32 %v9733_v17, %v9732_v49 }
 0x39a   : > { %5771 = vrcp.f32 %v4691_v54  ;;  %v9223_v36 = vadd.f32 %v9035_v38, %v4529_v44  ;;  %v4528_v23 = vadd.f32 %v4457_v25, %v4170_v52  ;;  %v4786_v6 = vmul.f32 %v5762_v46, %v9170_v29  ;;  %v9724_v29 = vld [vmem:[#allocation5_spill] sm:$0xff]  ;;  %v5500_v26 = vpop.f32.mrf.mxu1 }
 0x39b   : > { %v3816_v21 = vadd.f32 %v9725_v62, %v9724_v29  ;;  %v9736_v29 = vld [vmem:[#allocation2_spill] sm:$0xff] }
 0x39c   : > { %v5123_v37 = vmul.f32 -1.442695, %v9223_v36  ;;  %v9228_v59 = vadd.f32 %v9035_v38, %v4528_v23  ;;  %v5764_v57 = vpop.eup %5763  ;;  %4819 = vst.msk [vmem:[%s9100_s17 + $0x88] sm:$0xff] %vm4801_vm11, %v4786_v6  ;;  %v4139_v44 = vpop.f32.mrf.mxu1  ;;  %v4176_v23 = vadd.f32 %v4129_v18, %v3836_v58 }
 0x39d   : > { %v4785_v51 = vmul.f32 %v5764_v57, %v9177_v40  ;;  %v4172_v2 = vadd.f32 %v4109_v8, %v3816_v21  ;;  %v3831_v40 = vadd.f32 %v9727_v7, %v9726_v48  ;;  %v4177_v8 = vadd.f32 %v5497_v3, %v3841_v28 }
 0x39e   : > { %v5766_v63 = vpop.eup %5765  ;;  %5773 = vpow2.f32 %v5123_v37  ;;  %v5122_v0 = vmul.f32 -1.442695, %v9228_v59  ;;  %v4178_v62 = vadd.f32 %v4139_v44, %v9736_v29 }
 0x39f   : > { %v4694_v9 = vadd.f32 1.0, %v5766_v63  ;;  %4818 = vst.msk [vmem:[%s9100_s17 + $0x80] sm:$0xff] %vm4801_vm11, %v4785_v51  ;;  %v4175_v35 = vadd.f32 %v5494_v10, %v3831_v40  ;;  %v3851_v10 = vadd.f32 %v9735_v4, %v9734_v20 }
 0x3a0   : > { %v5768_v33 = vpop.eup %5767  ;;  %5775 = vpow2.f32 %v5122_v0 }
 0x3a1   : > { %5777 = vrcp.f32 %v4694_v9  ;;  %v4693_v30 = vadd.f32 1.0, %v5768_v33  ;;  %v4179_v39 = vadd.f32 %v5500_v26, %v3851_v10 }
 0x3a2   : > { %v5541_v45 = vpop.f32.mrf.mxu0 }
 0x3a3   : > { %5779 = vrcp.f32 %v4693_v30  ;;  %v4531_v1 = vadd.f32 %v5541_v45, %v4173_v50 }
 0x3a4   : > { %v4467_v55 = vpop.f32.mrf.mxu0 }
 0x3a5   : > { %v5770_v60 = vpop.eup %5769  ;;  %v9245_v53 = vadd.f32 %v9035_v38, %v4531_v1  ;;  %v4530_v11 = vadd.f32 %v4467_v55, %v4172_v2 }
 0x3a6   : > { %v4788_v34 = vmul.f32 %v5770_v60, %v9188_v31 }
 0x3a7   : > { %v5772_v27 = vpop.eup %5771  ;;  %v5125_v5 = vmul.f32 -1.442695, %v9245_v53  ;;  %v9252_v56 = vadd.f32 %v9035_v38, %v4530_v11 }
 0x3a8   : > { %4821 = vst.msk [vmem:[%s9100_s17 + $0x98] sm:$0xff] %vm4801_vm11, %v4788_v34  ;;  %v4787_v61 = vmul.f32 %v5772_v27, %v9197_v13 }
 0x3a9   : > { %v5544_v16 = vpop.f32.mrf.mxu0  ;;  %5781 = vpow2.f32 %v5125_v5  ;;  %v5124_v31 = vmul.f32 -1.442695, %v9252_v56 }
 0x3aa   : > { %v4533_v19 = vadd.f32 %v5544_v16, %v4175_v35  ;;  %4820 = vst.msk [vmem:[%s9100_s17 + $0x90] sm:$0xff] %vm4801_vm11, %v4787_v61 }
 0x3ab   : > { %v4477_v42 = vpop.f32.mrf.mxu0  ;;  %v5774_v52 = vpop.eup %5773  ;;  %5783 = vpow2.f32 %v5124_v31 }
 0x3ac   : > { %v9265_v54 = vadd.f32 %v9035_v38, %v4533_v19  ;;  %v4532_v13 = vadd.f32 %v4477_v42, %v4174_v43  ;;  %v4696_v46 = vadd.f32 1.0, %v5774_v52 }
 0x3ad   : > { %v5547_v25 = vpop.f32.mrf.mxu0  ;;  %v5776_v6 = vpop.eup %5775 }
 0x3ae   : > { %v5127_v32 = vmul.f32 -1.442695, %v9265_v54  ;;  %v9269_v37 = vadd.f32 %v9035_v38, %v4532_v13  ;;  %v4535_v57 = vadd.f32 %v5547_v25, %v4177_v8  ;;  %v5778_v63 = vpop.eup %5777  ;;  %5785 = vrcp.f32 %v4696_v46 }
 0x3af   : > { %v4487_v51 = vpop.f32.mrf.mxu0  ;;  %v4695_v0 = vadd.f32 1.0, %v5776_v6  ;;  %v4790_v21 = vmul.f32 %v5778_v63, %v9206_v15 }
 0x3b0   : > { %5787 = vpow2.f32 %v5127_v32  ;;  %v5126_v9 = vmul.f32 -1.442695, %v9269_v37  ;;  %v9275_v50 = vadd.f32 %v9035_v38, %v4535_v57  ;;  %v5780_v3 = vpop.eup %5779  ;;  %v4534_v30 = vadd.f32 %v4487_v51, %v4176_v23 }
 0x3b1   : > { %v5550_v33 = vpop.f32.mrf.mxu0  ;;  %5789 = vrcp.f32 %v4695_v0  ;;  %4823 = vst.msk [vmem:[%s9100_s17 + $0xa8] sm:$0xff] %vm4801_vm11, %v4790_v21  ;;  %v4789_v2 = vmul.f32 %v5780_v3, %v9213_v14 }
 0x3b2   : > { %5791 = vpow2.f32 %v5126_v9  ;;  %v5129_v45 = vmul.f32 -1.442695, %v9275_v50  ;;  %v4537_v48 = vadd.f32 %v5550_v33, %v4179_v39  ;;  %v4573_v15 = vadd.f32 %v9035_v38, %v4534_v30 }
 0x3b3   : > { %v4497_v7 = vpop.f32.mrf.mxu0  ;;  %4822 = vst.msk [vmem:[%s9100_s17 + $0xa0] sm:$0xff] %vm4801_vm11, %v4789_v2 }
 0x3b4   : > { %5793 = vpow2.f32 %v5129_v45  ;;  %v4576_v40 = vadd.f32 %v9035_v38, %v4537_v48  ;;  %v4536_v1 = vadd.f32 %v4497_v7, %v4178_v62  ;;  %v5128_v18 = vmul.f32 -1.442695, %v4573_v15 }
 0x3b6   : > { %v5131_v55 = vmul.f32 -1.442695, %v4576_v40  ;;  %v4575_v60 = vadd.f32 %v9035_v38, %v4536_v1  ;;  %v5782_v47 = vpop.eup %5781  ;;  %5795 = vpow2.f32 %v5128_v18 }
 0x3b7   : > { %v4698_v14 = vadd.f32 1.0, %v5782_v47 }
 0x3b8   : > { %5797 = vpow2.f32 %v5131_v55  ;;  %v5130_v22 = vmul.f32 -1.442695, %v4575_v60  ;;  %v5784_v12 = vpop.eup %5783 }
 0x3b9   : > { %5799 = vrcp.f32 %v4698_v14  ;;  %v4697_v11 = vadd.f32 1.0, %v5784_v12 }
 0x3ba   : > { %5801 = vpow2.f32 %v5130_v22 }
 0x3bb   : > { %v5786_v35 = vpop.eup %5785  ;;  %5803 = vrcp.f32 %v4697_v11 }
 0x3bc   : > { %v4792_v27 = vmul.f32 %v5786_v35, %v9223_v36 }
 0x3bd   : > { %v5788_v34 = vpop.eup %5787 }
 0x3be   : > { %v5790_v41 = vpop.eup %5789  ;;  %v4700_v24 = vadd.f32 1.0, %v5788_v34  ;;  %4825 = vst.msk [vmem:[%s9100_s17 + $0xb8] sm:$0xff] %vm4801_vm11, %v4792_v27 }
 0x3bf   : > { %v5792_v28 = vpop.eup %5791  ;;  %v4791_v38 = vmul.f32 %v5790_v41, %v9228_v59 }
 0x3c0   : > { %5805 = vrcp.f32 %v4700_v24  ;;  %v4699_v5 = vadd.f32 1.0, %v5792_v28 }
 0x3c1   : > { %v5794_v43 = vpop.eup %5793  ;;  %4824 = vst.msk [vmem:[%s9100_s17 + $0xb0] sm:$0xff] %vm4801_vm11, %v4791_v38 }
 0x3c2   : > { %5807 = vrcp.f32 %v4699_v5  ;;  %v4702_v26 = vadd.f32 1.0, %v5794_v43 }
 0x3c3   : > { %v5796_v16 = vpop.eup %5795 }
 0x3c4   : > { %5809 = vrcp.f32 %v4702_v26  ;;  %v4701_v36 = vadd.f32 1.0, %v5796_v16 }
 0x3c5   : > { %v5798_v61 = vpop.eup %5797 }
 0x3c6   : > { %v4704_v31 = vadd.f32 1.0, %v5798_v61  ;;  %v5800_v19 = vpop.eup %5799  ;;  %5811 = vrcp.f32 %v4701_v36 }
 0x3c7   : > { %v5802_v8 = vpop.eup %5801  ;;  %v4794_v59 = vmul.f32 %v5800_v19, %v9245_v53 }
 0x3c8   : > { %5813 = vrcp.f32 %v4704_v31  ;;  %v5804_v49 = vpop.eup %5803  ;;  %v4703_v17 = vadd.f32 1.0, %v5802_v8 }
 0x3c9   : > { %4827 = vst.msk [vmem:[%s9100_s17 + $0xc8] sm:$0xff] %vm4801_vm11, %v4794_v59  ;;  %v4793_v58 = vmul.f32 %v5804_v49, %v9252_v56 }
 0x3ca   : > { %5815 = vrcp.f32 %v4703_v17 }
 0x3cb   : > { %4826 = vst.msk [vmem:[%s9100_s17 + $0xc0] sm:$0xff] %vm4801_vm11, %v4793_v58 }
 0x3cd   : > { %v5806_v42 = vpop.eup %5805 }
 0x3ce   : > { %v4796_v52 = vmul.f32 %v5806_v42, %v9265_v54 }
 0x3cf   : > { %v5808_v20 = vpop.eup %5807 }
 0x3d0   : > { %4829 = vst.msk [vmem:[%s9100_s17 + $0xd8] sm:$0xff] %vm4801_vm11, %v4796_v52  ;;  %v4795_v53 = vmul.f32 %v5808_v20, %v9269_v37 }
 0x3d1   : > { %v5810_v4 = vpop.eup %5809 }
 0x3d2   : > { %4828 = vst.msk [vmem:[%s9100_s17 + $0xd0] sm:$0xff] %vm4801_vm11, %v4795_v53  ;;  %v4798_v10 = vmul.f32 %v5810_v4, %v9275_v50 }
 0x3d3   : > { %v5812_v56 = vpop.eup %5811 }
 0x3d4   : > { %4831 = vst.msk [vmem:[%s9100_s17 + $0xe8] sm:$0xff] %vm4801_vm11, %v4798_v10  ;;  %v4797_v44 = vmul.f32 %v5812_v56, %v4573_v15 }
 0x3d5   : > { %v5814_v13 = vpop.eup %5813 }
 0x3d6   : > { %v4800_v25 = vmul.f32 %v5814_v13, %v4576_v40  ;;  %4830 = vst.msk [vmem:[%s9100_s17 + $0xe0] sm:$0xff] %vm4801_vm11, %v4797_v44 }
 0x3d7   : > { %v5816_v54 = vpop.eup %5815 }
 0x3d8   : > { %4833 = vst.msk [vmem:[%s9100_s17 + $0xf8] sm:$0xff] %vm4801_vm11, %v4800_v25  ;;  %v4799_v46 = vmul.f32 %v5816_v54, %v4575_v60 }
 0x3da   : > { %4832 = vst.msk [vmem:[%s9100_s17 + $0xf0] sm:$0xff] %vm4801_vm11, %v4799_v46 }
 0x3db PF: > { %s15_s18 = sadd.s32 1, %s5824_s18  }
 0x3dc   : > { %p12_p4 = scmp.ge.s32.totalorder %s15_s18, 4  }
 0x3de   :  { %14 = sbr.rel (!%p12_p4) target bundleno = 1 (0x1), region = 73 }

</bundles_post_ra>
